<compile_context>
chip_gen: v5e
topology: v5e:2x2
jax: 0.10.0
libtpu: 0.0.40
codegen_flags: <defaults>
</compile_context>

<pallas_src>
import jax
import jax.numpy as jnp
from jax.experimental import pallas as pl
from jax.experimental.pallas import tpu as pltpu

_C = 128            # lane-padded channel width
_K1 = 128           # layer1 merged contraction (9 taps x 12 ch = 108, zero-padded to 128)
_K = 9 * _C         # layers 2-4 merged contraction (9 taps x 128 ch)


# ---------------------------------------------------------------------------
# Fused Pallas kernel: layer1..layer4 + pools + fc1 + fc2 + log-softmax
# ---------------------------------------------------------------------------
def _fused_kernel(x1_ref, w1_ref, b1_ref, w2_ref, b2_ref, w3_ref, b3_ref,
                  w4_ref, b4_ref, f1w_ref, f1b_ref, f2w_ref, f2b_ref,
                  o_ref, pb10, pb6):
    nb = x1_ref.shape[0]

    def conv3x3(pbuf, w_ref, b_ref, ho, wo):
        """3x3 stride-1 conv over a zero-haloed f32 scratch (nb, ho+2, wo+2, 128).

        3 kw-shifted window reads (the only sublane relayouts), free kh slices,
        lane-aligned concat to K = 9*128 -> ONE MXU matmul per layer.
        """
        rows = nb * ho * wo
        slabs = [pbuf[:, :, kw:kw + wo, :] for kw in range(3)]          # 3 relayouts only
        taps = [slabs[kw][:, kh:kh + ho].reshape(rows, _C).astype(jnp.bfloat16)
                for kh in range(3) for kw in range(3)]
        lhs = jnp.concatenate(taps, axis=-1)                            # (rows, 1152) bf16
        y = jnp.dot(lhs, w_ref[...], preferred_element_type=jnp.float32)
        y = jnp.maximum(y + b_ref[...], 0.0)                            # folded-BN bias + ReLU
        return y.reshape(nb, ho, wo, _C)

    def maxpool2(y):
        n_, h, w, c = y.shape
        y = y.reshape(n_, h, w // 2, 2 * c)
        y = jnp.maximum(y[..., :c], y[..., c:])                         # pool along W
        y = y.reshape(n_, h // 2, 2, w // 2, c)
        return jnp.maximum(y[:, :, 0], y[:, :, 1])                      # pool along H

    # ---- layer1: Conv(3->16,k5,s2,p2)+BN+ReLU+MaxPool2 as ONE K=128 matmul ----
    y = jnp.dot(x1_ref[...].reshape(nb * 256, _K1), w1_ref[...],
                preferred_element_type=jnp.float32)
    y = jnp.maximum(y + b1_ref[...], 0.0)
    y = maxpool2(y.reshape(nb, 16, 16, _C))                             # (nb, 8, 8, 128) f32

    # ---- layer2: Conv(16->32,k3,p1)+BN+ReLU ----
    pb10[...] = jnp.zeros_like(pb10)          # zero halo (interior overwritten just below)
    pb10[:, 1:9, 1:9, :] = y
    y = conv3x3(pb10, w2_ref, b2_ref, 8, 8)                             # (nb, 8, 8, 128)
    # dropout1 (p=0.3): identity in inference mode.

    # ---- layer3: Conv(32->40,k3,p1)+BN+ReLU+MaxPool2 ----
    pb10[:, 1:9, 1:9, :] = y                  # halo is still zero
    y = maxpool2(conv3x3(pb10, w3_ref, b3_ref, 8, 8))                   # (nb, 4, 4, 128)

    # ---- layer4: Conv(40->50,k3,p1)+BN+ReLU ----
    pb6[...] = jnp.zeros_like(pb6)
    pb6[:, 1:5, 1:5, :] = y
    y = conv3x3(pb6, w4_ref, b4_ref, 4, 4)                              # (nb, 4, 4, 128)

    # ---- head: flatten (NCHW perm folded into fc1_w) -> fc1+ReLU -> fc2 -> LogSoftmax ----
    flat = y.astype(jnp.bfloat16).reshape(nb, 16 * _C)
    h = jnp.dot(flat, f1w_ref[...], preferred_element_type=jnp.float32)
    h = jnp.maximum(h + f1b_ref[...], 0.0)
    # dropout (p=0.5): identity in inference mode.
    logits = jnp.dot(h.astype(jnp.bfloat16), f2w_ref[...],
                     preferred_element_type=jnp.float32) + f2b_ref[...]
    # padded logit lanes carry bias -1e9 -> exp underflows to 0 -> exact 10-class
    # log-softmax, while the output store stays 128-lane dense (unmasked vst).
    m = jnp.max(logits, axis=-1, keepdims=True)
    z = logits - m
    lse = jnp.log(jnp.sum(jnp.exp(z), axis=-1, keepdims=True))
    o_ref[...] = (z - lse).reshape(nb, 1, _C)


# ---------------------------------------------------------------------------
# Pallas wrapper
# ---------------------------------------------------------------------------
def _pick_nb(n, cap=8):
    """Largest divisor of n that is <= cap while keeping grid length >= 2 (v7x: 2 TCs)."""
    cap = min(cap, max(1, n // 2)) if n > 1 else 1
    for d in range(cap, 0, -1):
        if n % d == 0:
            return d
    return 1


def cnn_forward(prep, x_nchw):
    n = x_nchw.shape[0]
    # Layer1 input prep (XLA, once per call): pad=2, 2x2 space-to-depth, 3x3 im2col.
    # This turns the 5x5/stride-2 conv into one full-depth K=128 MXU matmul in-kernel;
    # the im2col'd input is only ~64 KiB/image bf16.
    x = jnp.transpose(x_nchw, (0, 2, 3, 1)).astype(jnp.float32)         # NCHW -> NHWC
    xp = jnp.pad(x, ((0, 0), (2, 2), (2, 2), (0, 0)))                   # (N, 36, 36, 3)
    xs = xp.reshape(n, 18, 2, 18, 2, 3)
    xs = jnp.transpose(xs, (0, 1, 3, 2, 4, 5)).reshape(n, 18, 18, 12)   # space-to-depth
    taps = [xs[:, kh:kh + 16, kw:kw + 16, :] for kh in range(3) for kw in range(3)]
    x1 = jnp.concatenate(taps, axis=-1)                                 # (N, 16, 16, 108)
    x1 = jnp.pad(x1, ((0, 0), (0, 0), (0, 0), (0, _K1 - 108)))
    x1 = x1.reshape(n, 256, _K1).astype(jnp.bfloat16)

    nb = _pick_nb(n)
    grid = (n // nb,)

    args = (x1, prep["w1"], prep["b1"], prep["w2"], prep["b2"], prep["w3"],
            prep["b3"], prep["w4"], prep["b4"], prep["fc1_w"], prep["fc1_b"],
            prep["fc2_w"], prep["fc2_b"])
    flops = 2 * n * (256 * _K1 * _C + (64 + 64 + 16) * _K * _C + 16 * _C * _C + _C * _C)
    bytes_accessed = sum(int(a.size) * a.dtype.itemsize for a in args) + n * _C * 4

    const = lambda i: (0, 0)
    out = pl.pallas_call(
        _fused_kernel,
        out_shape=jax.ShapeDtypeStruct((n, 1, _C), jnp.float32),
        grid=grid,
        in_specs=[
            pl.BlockSpec((nb, 256, _K1), lambda i: (i, 0, 0)),   # layer1 im2col block
            pl.BlockSpec((_K1, _C), const),                      # w1 (resident)
            pl.BlockSpec((1, _C), const),                        # b1
            pl.BlockSpec((_K, _C), const),                       # w2
            pl.BlockSpec((1, _C), const),                        # b2
            pl.BlockSpec((_K, _C), const),                       # w3
            pl.BlockSpec((1, _C), const),                        # b3
            pl.BlockSpec((_K, _C), const),                       # w4
            pl.BlockSpec((1, _C), const),                        # b4
            pl.BlockSpec((16 * _C, _C), const),                  # fc1_w
            pl.BlockSpec((1, _C), const),                        # fc1_b
            pl.BlockSpec((_C, _C), const),                       # fc2_w (lane-dense)
            pl.BlockSpec((1, _C), const),                        # fc2_b (-1e9 in pad lanes)
        ],
        out_specs=pl.BlockSpec((nb, 1, _C), lambda i: (i, 0, 0)),
        scratch_shapes=[
            pltpu.VMEM((nb, 10, 10, _C), jnp.float32),           # padded act (layers 2/3)
            pltpu.VMEM((nb, 6, 6, _C), jnp.float32),             # padded act (layer 4)
        ],
        compiler_params=pltpu.CompilerParams(
            dimension_semantics=("parallel",),
            vmem_limit_bytes=40 * 1024 * 1024),
        cost_estimate=pl.CostEstimate(flops=flops, transcendentals=n * _C,
                                      bytes_accessed=bytes_accessed),
    )(*args)
    return out.reshape(n, _C)[:, :10]


# ---------------------------------------------------------------------------
# Parameter init (torch-like layouts) and one-time Pallas prep
# ---------------------------------------------------------------------------
def init_params(key):
    ks = jax.random.split(key, 12)

    def conv(kw, kb, cin, cout, k):
        fan_in = cin * k * k
        w = jax.random.normal(kw, (cout, cin, k, k), jnp.float32) / jnp.sqrt(fan_in)
        b = jax.random.normal(kb, (cout,), jnp.float32) * 0.01
        return w, b

    def bn(c):
        return (jnp.ones((c,), jnp.float32), jnp.zeros((c,), jnp.float32),
                jnp.zeros((c,), jnp.float32), jnp.ones((c,), jnp.float32))

    p = {}
    p["c1_w"], p["c1_b"] = conv(ks[0], ks[1], 3, 16, 5);  p["bn1"] = bn(16)
    p["c2_w"], p["c2_b"] = conv(ks[2], ks[3], 16, 32, 3); p["bn2"] = bn(32)
    p["c3_w"], p["c3_b"] = conv(ks[4], ks[5], 32, 40, 3); p["bn3"] = bn(40)
    p["c4_w"], p["c4_b"] = conv(ks[6], ks[7], 40, 50, 3); p["bn4"] = bn(50)
    p["fc1_w"] = jax.random.normal(ks[8], (4 * 4 * 50, 15), jnp.float32) / jnp.sqrt(800.0)
    p["fc1_b"] = jax.random.normal(ks[9], (1, 15), jnp.float32) * 0.01
    p["fc2_w"] = jax.random.normal(ks[10], (15, 10), jnp.float32) / jnp.sqrt(15.0)
    p["fc2_b"] = jax.random.normal(ks[11], (1, 10), jnp.float32) * 0.01
    return p


def prepare_params(p, eps=1e-5):
    """One-time prep: fold BN, pad channels to 128, merge conv taps along K (bf16),
    fold the torch NCHW flatten permutation into fc1_w, lane-pad fc2 (-1e9 pad bias)."""

    def bn_fold(conv_b, bn):
        gamma, beta, mean, var = bn
        scale = gamma / jnp.sqrt(var + eps)
        bias = (conv_b - mean) * scale + beta
        return scale, bias

    def conv_prep(w, b, bn):
        # torch (Cout,Cin,3,3) -> merged-K (9*128, 128); row = (kh*3+kw)*128 + cin.
        cout, cin, k, _ = w.shape
        scale, bias = bn_fold(b, bn)
        wm = jnp.transpose(w, (2, 3, 1, 0)) * scale                       # (k,k,cin,cout)
        wm = jnp.pad(wm, ((0, 0), (0, 0), (0, _C - cin), (0, _C - cout)))
        wm = wm.reshape(k * k * _C, _C).astype(jnp.bfloat16)
        bb = jnp.pad(bias, (0, _C - cout)).reshape(1, _C).astype(jnp.float32)
        return wm, bb

    def conv1_prep(w, b, bn):
        # 5x5/stride-2 conv == 3x3/stride-1 conv over 2x2 space-to-depth (12ch) input;
        # merged over the 9 taps -> (108, cout), zero-padded to K=128.
        cout = w.shape[0]
        scale, bias = bn_fold(b, bn)
        wp = jnp.pad(w, ((0, 0), (0, 0), (0, 1), (0, 1)))                 # (16,3,6,6)
        wp = wp.reshape(cout, 3, 3, 2, 3, 2)                              # (co,ci,rh,ph,rw,pw)
        wp = jnp.transpose(wp, (2, 4, 3, 5, 1, 0))                        # (rh,rw,ph,pw,ci,co)
        wp = wp.reshape(3, 3, 12, cout) * scale
        wp = jnp.pad(wp, ((0, 0), (0, 0), (0, 0), (0, _C - cout)))
        wp = wp.reshape(9 * 12, _C)                                       # row = (kh*3+kw)*12+ch
        wp = jnp.pad(wp, ((0, _K1 - 108), (0, 0)))
        bb = jnp.pad(bias, (0, _C - cout)).reshape(1, _C)
        return wp.astype(jnp.bfloat16), bb.astype(jnp.float32)

    prep = {}
    prep["w1"], prep["b1"] = conv1_prep(p["c1_w"], p["c1_b"], p["bn1"])
    prep["w2"], prep["b2"] = conv_prep(p["c2_w"], p["c2_b"], p["bn2"])
    prep["w3"], prep["b3"] = conv_prep(p["c3_w"], p["c3_b"], p["bn3"])
    prep["w4"], prep["b4"] = conv_prep(p["c4_w"], p["c4_b"], p["bn4"])

    # fc1: fold torch's NCHW flatten (c*16 + h*4 + w) into the weight so the head consumes
    # the in-kernel NHWC (channel-padded) flatten order directly (no runtime transpose).
    w1 = p["fc1_w"].reshape(50, 4, 4, 15)                                 # (c,h,w,15)
    w1 = jnp.transpose(w1, (1, 2, 0, 3))                                  # (h,w,c,15)
    w1 = jnp.pad(w1, ((0, 0), (0, 0), (0, _C - 50), (0, _C - 15)))
    prep["fc1_w"] = w1.reshape(4 * 4 * _C, _C).astype(jnp.bfloat16)
    prep["fc1_b"] = jnp.pad(p["fc1_b"].reshape(-1), (0, _C - 15)).reshape(1, _C).astype(jnp.float32)
    # fc2: lane-dense 128-wide output; padded columns get bias -1e9 so they vanish
    # under log-softmax.
    prep["fc2_w"] = jnp.pad(p["fc2_w"], ((0, _C - 15), (0, _C - 10))).astype(jnp.bfloat16)
    f2b = jnp.full((1, _C), -1e9, jnp.float32)
    prep["fc2_b"] = f2b.at[:, :10].set(p["fc2_b"].astype(jnp.float32))
    return prep


# ---------------------------------------------------------------------------
# Pure-JAX reference (f32, torch semantics, eval mode) for a tolerance check
# ---------------------------------------------------------------------------
def _reference_forward(p, x_nchw, eps=1e-5):
    def conv2d(x, w, b, stride, pad):
        y = jax.lax.conv_general_dilated(
            x, w, window_strides=(stride, stride), padding=[(pad, pad), (pad, pad)],
            dimension_numbers=("NCHW", "OIHW", "NCHW"))
        return y + b.reshape(1, -1, 1, 1)

    def bn(x, bnp):
        gamma, beta, mean, var = bnp
        inv = (gamma / jnp.sqrt(var + eps)).reshape(1, -1, 1, 1)
        return (x - mean.reshape(1, -1, 1, 1)) * inv + beta.reshape(1, -1, 1, 1)

    def maxpool2(x):
        n, c, h, w = x.shape
        return x.reshape(n, c, h // 2, 2, w // 2, 2).max(axis=(3, 5))

    y = jnp.maximum(bn(conv2d(x_nchw, p["c1_w"], p["c1_b"], 2, 2), p["bn1"]), 0.0)
    y = maxpool2(y)
    y = jnp.maximum(bn(conv2d(y, p["c2_w"], p["c2_b"], 1, 1), p["bn2"]), 0.0)
    y = jnp.maximum(bn(conv2d(y, p["c3_w"], p["c3_b"], 1, 1), p["bn3"]), 0.0)
    y = maxpool2(y)
    y = jnp.maximum(bn(conv2d(y, p["c4_w"], p["c4_b"], 1, 1), p["bn4"]), 0.0)
    flat = y.reshape(y.shape[0], -1)                                      # torch NCHW flatten
    h = jnp.maximum(flat @ p["fc1_w"] + p["fc1_b"], 0.0)
    logits = h @ p["fc2_w"] + p["fc2_b"]
    return jax.nn.log_softmax(logits, axis=1)


if __name__ == "__main__":
    key = jax.random.PRNGKey(0)
    k_param, k_x = jax.random.split(key)
    params = init_params(k_param)
    prep = prepare_params(params)          # one-time parameter prep (BN fold, K-merge, bf16)
    # fc1 expects 4*4*50 features => 32x32 spatial input (CIFAR-like), batch=2.
    x = jax.random.normal(k_x, (2, 3, 32, 32), jnp.float32)

    fwd = jax.jit(cnn_forward)
    out = jax.block_until_ready(fwd(prep, x))

    assert out.shape == (2, 10), out.shape
    assert bool(jnp.all(jnp.isfinite(out)))
    # log-softmax rows exponentiate-and-sum to ~1
    assert bool(jnp.all(jnp.abs(jnp.sum(jnp.exp(out), axis=1) - 1.0) < 1e-4))
    # tolerance check vs the pure-JAX f32 reference (bf16 weights/activations in the kernel)
    ref = _reference_forward(params, x)
    assert bool(jnp.max(jnp.abs(out - ref)) < 1e-1), float(jnp.max(jnp.abs(out - ref)))
    print("KERNEL_OK")
</pallas_src>

<mosaic_0001>
module attributes {stable_mosaic.version = 11 : i64} {
  func.func @_fused_kernel(%arg0: i32, %arg1: memref<1x256x128xbf16, #tpu.memory_space<vmem>>, %arg2: memref<128x128xbf16, #tpu.memory_space<vmem>>, %arg3: memref<1x128xf32, #tpu.memory_space<vmem>>, %arg4: memref<1152x128xbf16, #tpu.memory_space<vmem>>, %arg5: memref<1x128xf32, #tpu.memory_space<vmem>>, %arg6: memref<1152x128xbf16, #tpu.memory_space<vmem>>, %arg7: memref<1x128xf32, #tpu.memory_space<vmem>>, %arg8: memref<1152x128xbf16, #tpu.memory_space<vmem>>, %arg9: memref<1x128xf32, #tpu.memory_space<vmem>>, %arg10: memref<2048x128xbf16, #tpu.memory_space<vmem>>, %arg11: memref<1x128xf32, #tpu.memory_space<vmem>>, %arg12: memref<128x128xbf16, #tpu.memory_space<vmem>>, %arg13: memref<1x128xf32, #tpu.memory_space<vmem>>, %arg14: memref<1x1x128xf32, #tpu.memory_space<vmem>>, %arg15: memref<1x10x10x128xf32, #tpu.memory_space<vmem>>, %arg16: memref<1x6x6x128xf32, #tpu.memory_space<vmem>>) attributes {dimension_semantics = [#tpu.dimension_semantics<parallel>], iteration_bounds = array<i64: 2>, scalar_prefetch = 0 : i64, scratch_operands = 2 : i64, tpu.core_type = #tpu.core_type<tc>, window_params = [{transform_indices = @transform_0, window_bounds = array<i64: 1, 256, 128>}, {pipeline_mode = #tpu.pipeline_mode<synchronous>, transform_indices = @transform_1, window_bounds = array<i64: 128, 128>}, {pipeline_mode = #tpu.pipeline_mode<synchronous>, transform_indices = @transform_2, window_bounds = array<i64: 1, 128>}, {pipeline_mode = #tpu.pipeline_mode<synchronous>, transform_indices = @transform_3, window_bounds = array<i64: 1152, 128>}, {pipeline_mode = #tpu.pipeline_mode<synchronous>, transform_indices = @transform_4, window_bounds = array<i64: 1, 128>}, {pipeline_mode = #tpu.pipeline_mode<synchronous>, transform_indices = @transform_5, window_bounds = array<i64: 1152, 128>}, {pipeline_mode = #tpu.pipeline_mode<synchronous>, transform_indices = @transform_6, window_bounds = array<i64: 1, 128>}, {pipeline_mode = #tpu.pipeline_mode<synchronous>, transform_indices = @transform_7, window_bounds = array<i64: 1152, 128>}, {pipeline_mode = #tpu.pipeline_mode<synchronous>, transform_indices = @transform_8, window_bounds = array<i64: 1, 128>}, {pipeline_mode = #tpu.pipeline_mode<synchronous>, transform_indices = @transform_9, window_bounds = array<i64: 2048, 128>}, {pipeline_mode = #tpu.pipeline_mode<synchronous>, transform_indices = @transform_10, window_bounds = array<i64: 1, 128>}, {pipeline_mode = #tpu.pipeline_mode<synchronous>, transform_indices = @transform_11, window_bounds = array<i64: 128, 128>}, {pipeline_mode = #tpu.pipeline_mode<synchronous>, transform_indices = @transform_12, window_bounds = array<i64: 1, 128>}, {transform_indices = @transform_13, window_bounds = array<i64: 1, 1, 128>}]} {
    %c0 = arith.constant 0 : index
    %c0_0 = arith.constant 0 : index
    %c0_1 = arith.constant 0 : index
    %0 = vector.load %arg1[%c0, %c0_0, %c0_1] : memref<1x256x128xbf16, #tpu.memory_space<vmem>>, vector<1x256x128xbf16>
    %1 = vector.shape_cast %0 : vector<1x256x128xbf16> to vector<256x128xbf16>
    %c0_2 = arith.constant 0 : index
    %c0_3 = arith.constant 0 : index
    %2 = vector.load %arg2[%c0_2, %c0_3] : memref<128x128xbf16, #tpu.memory_space<vmem>>, vector<128x128xbf16>
    %cst = arith.constant dense<0.000000e+00> : vector<256x128xf32>
    %3 = tpu.matmul %1, %2, %cst {dimension_numbers = #tpu.dot_dimension_numbers<[1], [0], [0], [1], [0, 0, 1, 1], [], []>} : vector<256x128xbf16>, vector<128x128xbf16>, vector<256x128xf32> -> vector<256x128xf32>
    %c0_4 = arith.constant 0 : index
    %c0_5 = arith.constant 0 : index
    %4 = vector.load %arg3[%c0_4, %c0_5] : memref<1x128xf32, #tpu.memory_space<vmem>>, vector<1x128xf32>
    %5 = vector.broadcast %4 : vector<1x128xf32> to vector<256x128xf32>
    %6 = arith.addf %3, %5 : vector<256x128xf32>
    %cst_6 = arith.constant 0.000000e+00 : f32
    %7 = vector.broadcast %cst_6 : f32 to vector<256x128xf32>
    %8 = arith.maximumf %6, %7 : vector<256x128xf32>
    %9 = vector.shape_cast %8 : vector<256x128xf32> to vector<1x16x16x128xf32>
    %10 = vector.shape_cast %9 : vector<1x16x16x128xf32> to vector<1x16x8x256xf32>
    %11 = vector.extract_strided_slice %10 {offsets = [0, 0, 0, 0], sizes = [1, 16, 8, 128], strides = [1, 1, 1, 1]} : vector<1x16x8x256xf32> to vector<1x16x8x128xf32>
    %12 = vector.extract_strided_slice %10 {offsets = [0, 0, 0, 128], sizes = [1, 16, 8, 128], strides = [1, 1, 1, 1]} : vector<1x16x8x256xf32> to vector<1x16x8x128xf32>
    %13 = arith.maximumf %11, %12 : vector<1x16x8x128xf32>
    %14 = vector.shape_cast %13 : vector<1x16x8x128xf32> to vector<1x8x2x8x128xf32>
    %15 = vector.extract_strided_slice %14 {offsets = [0, 0, 0, 0, 0], sizes = [1, 8, 1, 8, 128], strides = [1, 1, 1, 1, 1]} : vector<1x8x2x8x128xf32> to vector<1x8x1x8x128xf32>
    %16 = vector.shape_cast %15 : vector<1x8x1x8x128xf32> to vector<1x8x8x128xf32>
    %17 = vector.extract_strided_slice %14 {offsets = [0, 0, 1, 0, 0], sizes = [1, 8, 1, 8, 128], strides = [1, 1, 1, 1, 1]} : vector<1x8x2x8x128xf32> to vector<1x8x1x8x128xf32>
    %18 = vector.shape_cast %17 : vector<1x8x1x8x128xf32> to vector<1x8x8x128xf32>
    %19 = arith.maximumf %16, %18 : vector<1x8x8x128xf32>
    %cst_7 = arith.constant 0.000000e+00 : f32
    %20 = vector.broadcast %cst_7 : f32 to vector<1x10x10x128xf32>
    %c0_8 = arith.constant 0 : index
    %c0_9 = arith.constant 0 : index
    %c0_10 = arith.constant 0 : index
    %c0_11 = arith.constant 0 : index
    %21 = vector.load %arg15[%c0_8, %c0_9, %c0_10, %c0_11] : memref<1x10x10x128xf32, #tpu.memory_space<vmem>>, vector<1x10x10x128xf32>
    tpu.vector_store %arg15[%c0_8, %c0_9, %c0_10, %c0_11], %20 {strides = array<i32>} : memref<1x10x10x128xf32, #tpu.memory_space<vmem>>, vector<1x10x10x128xf32>,
    %c0_12 = arith.constant 0 : index
    %c1 = arith.constant 1 : index
    %c1_13 = arith.constant 1 : index
    %c0_14 = arith.constant 0 : index
    %22 = vector.load %arg15[%c0_12, %c1, %c1_13, %c0_14] : memref<1x10x10x128xf32, #tpu.memory_space<vmem>>, vector<1x8x8x128xf32>
    tpu.vector_store %arg15[%c0_12, %c1, %c1_13, %c0_14], %19 {strides = array<i32>} : memref<1x10x10x128xf32, #tpu.memory_space<vmem>>, vector<1x8x8x128xf32>,
    %c0_15 = arith.constant 0 : index
    %c0_16 = arith.constant 0 : index
    %c0_17 = arith.constant 0 : index
    %c0_18 = arith.constant 0 : index
    %23 = vector.load %arg15[%c0_15, %c0_16, %c0_17, %c0_18] : memref<1x10x10x128xf32, #tpu.memory_space<vmem>>, vector<1x10x8x128xf32>
    %c0_19 = arith.constant 0 : index
    %c0_20 = arith.constant 0 : index
    %c1_21 = arith.constant 1 : index
    %c0_22 = arith.constant 0 : index
    %24 = vector.load %arg15[%c0_19, %c0_20, %c1_21, %c0_22] : memref<1x10x10x128xf32, #tpu.memory_space<vmem>>, vector<1x10x8x128xf32>
    %c0_23 = arith.constant 0 : index
    %c0_24 = arith.constant 0 : index
    %c2 = arith.constant 2 : index
    %c0_25 = arith.constant 0 : index
    %25 = vector.load %arg15[%c0_23, %c0_24, %c2, %c0_25] : memref<1x10x10x128xf32, #tpu.memory_space<vmem>>, vector<1x10x8x128xf32>
    %26 = vector.extract_strided_slice %23 {offsets = [0, 0, 0, 0], sizes = [1, 8, 8, 128], strides = [1, 1, 1, 1]} : vector<1x10x8x128xf32> to vector<1x8x8x128xf32>
    %27 = vector.shape_cast %26 : vector<1x8x8x128xf32> to vector<64x128xf32>
    %28 = arith.truncf %27 : vector<64x128xf32> to vector<64x128xbf16>
    %29 = vector.extract_strided_slice %24 {offsets = [0, 0, 0, 0], sizes = [1, 8, 8, 128], strides = [1, 1, 1, 1]} : vector<1x10x8x128xf32> to vector<1x8x8x128xf32>
    %30 = vector.shape_cast %29 : vector<1x8x8x128xf32> to vector<64x128xf32>
    %31 = arith.truncf %30 : vector<64x128xf32> to vector<64x128xbf16>
    %32 = vector.extract_strided_slice %25 {offsets = [0, 0, 0, 0], sizes = [1, 8, 8, 128], strides = [1, 1, 1, 1]} : vector<1x10x8x128xf32> to vector<1x8x8x128xf32>
    %33 = vector.shape_cast %32 : vector<1x8x8x128xf32> to vector<64x128xf32>
    %34 = arith.truncf %33 : vector<64x128xf32> to vector<64x128xbf16>
    %35 = vector.extract_strided_slice %23 {offsets = [0, 1, 0, 0], sizes = [1, 8, 8, 128], strides = [1, 1, 1, 1]} : vector<1x10x8x128xf32> to vector<1x8x8x128xf32>
    %36 = vector.shape_cast %35 : vector<1x8x8x128xf32> to vector<64x128xf32>
    %37 = arith.truncf %36 : vector<64x128xf32> to vector<64x128xbf16>
    %38 = vector.extract_strided_slice %24 {offsets = [0, 1, 0, 0], sizes = [1, 8, 8, 128], strides = [1, 1, 1, 1]} : vector<1x10x8x128xf32> to vector<1x8x8x128xf32>
    %39 = vector.shape_cast %38 : vector<1x8x8x128xf32> to vector<64x128xf32>
    %40 = arith.truncf %39 : vector<64x128xf32> to vector<64x128xbf16>
    %41 = vector.extract_strided_slice %25 {offsets = [0, 1, 0, 0], sizes = [1, 8, 8, 128], strides = [1, 1, 1, 1]} : vector<1x10x8x128xf32> to vector<1x8x8x128xf32>
    %42 = vector.shape_cast %41 : vector<1x8x8x128xf32> to vector<64x128xf32>
    %43 = arith.truncf %42 : vector<64x128xf32> to vector<64x128xbf16>
    %44 = vector.extract_strided_slice %23 {offsets = [0, 2, 0, 0], sizes = [1, 8, 8, 128], strides = [1, 1, 1, 1]} : vector<1x10x8x128xf32> to vector<1x8x8x128xf32>
    %45 = vector.shape_cast %44 : vector<1x8x8x128xf32> to vector<64x128xf32>
    %46 = arith.truncf %45 : vector<64x128xf32> to vector<64x128xbf16>
    %47 = vector.extract_strided_slice %24 {offsets = [0, 2, 0, 0], sizes = [1, 8, 8, 128], strides = [1, 1, 1, 1]} : vector<1x10x8x128xf32> to vector<1x8x8x128xf32>
    %48 = vector.shape_cast %47 : vector<1x8x8x128xf32> to vector<64x128xf32>
    %49 = arith.truncf %48 : vector<64x128xf32> to vector<64x128xbf16>
    %50 = vector.extract_strided_slice %25 {offsets = [0, 2, 0, 0], sizes = [1, 8, 8, 128], strides = [1, 1, 1, 1]} : vector<1x10x8x128xf32> to vector<1x8x8x128xf32>
    %51 = vector.shape_cast %50 : vector<1x8x8x128xf32> to vector<64x128xf32>
    %52 = arith.truncf %51 : vector<64x128xf32> to vector<64x128xbf16>
    %53 = tpu.concatenate %28, %31, %34, %37, %40, %43, %46, %49, %52 in 1 : vector<64x128xbf16>, vector<64x128xbf16>, vector<64x128xbf16>, vector<64x128xbf16>, vector<64x128xbf16>, vector<64x128xbf16>, vector<64x128xbf16>, vector<64x128xbf16>, vector<64x128xbf16> -> vector<64x1152xbf16>
    %c0_26 = arith.constant 0 : index
    %c0_27 = arith.constant 0 : index
    %54 = vector.load %arg4[%c0_26, %c0_27] : memref<1152x128xbf16, #tpu.memory_space<vmem>>, vector<1152x128xbf16>
    %cst_28 = arith.constant dense<0.000000e+00> : vector<64x128xf32>
    %55 = tpu.matmul %53, %54, %cst_28 {dimension_numbers = #tpu.dot_dimension_numbers<[1], [0], [0], [1], [0, 0, 1, 1], [], []>} : vector<64x1152xbf16>, vector<1152x128xbf16>, vector<64x128xf32> -> vector<64x128xf32>
    %c0_29 = arith.constant 0 : index
    %c0_30 = arith.constant 0 : index
    %56 = vector.load %arg5[%c0_29, %c0_30] : memref<1x128xf32, #tpu.memory_space<vmem>>, vector<1x128xf32>
    %57 = vector.broadcast %56 : vector<1x128xf32> to vector<64x128xf32>
    %58 = arith.addf %55, %57 : vector<64x128xf32>
    %cst_31 = arith.constant 0.000000e+00 : f32
    %59 = vector.broadcast %cst_31 : f32 to vector<64x128xf32>
    %60 = arith.maximumf %58, %59 : vector<64x128xf32>
    %61 = vector.shape_cast %60 : vector<64x128xf32> to vector<1x8x8x128xf32>
    %c0_32 = arith.constant 0 : index
    %c1_33 = arith.constant 1 : index
    %c1_34 = arith.constant 1 : index
    %c0_35 = arith.constant 0 : index
    %62 = vector.load %arg15[%c0_32, %c1_33, %c1_34, %c0_35] : memref<1x10x10x128xf32, #tpu.memory_space<vmem>>, vector<1x8x8x128xf32>
    tpu.vector_store %arg15[%c0_32, %c1_33, %c1_34, %c0_35], %61 {strides = array<i32>} : memref<1x10x10x128xf32, #tpu.memory_space<vmem>>, vector<1x8x8x128xf32>,
    %c0_36 = arith.constant 0 : index
    %c0_37 = arith.constant 0 : index
    %c0_38 = arith.constant 0 : index
    %c0_39 = arith.constant 0 : index
    %63 = vector.load %arg15[%c0_36, %c0_37, %c0_38, %c0_39] : memref<1x10x10x128xf32, #tpu.memory_space<vmem>>, vector<1x10x8x128xf32>
    %c0_40 = arith.constant 0 : index
    %c0_41 = arith.constant 0 : index
    %c1_42 = arith.constant 1 : index
    %c0_43 = arith.constant 0 : index
    %64 = vector.load %arg15[%c0_40, %c0_41, %c1_42, %c0_43] : memref<1x10x10x128xf32, #tpu.memory_space<vmem>>, vector<1x10x8x128xf32>
    %c0_44 = arith.constant 0 : index
    %c0_45 = arith.constant 0 : index
    %c2_46 = arith.constant 2 : index
    %c0_47 = arith.constant 0 : index
    %65 = vector.load %arg15[%c0_44, %c0_45, %c2_46, %c0_47] : memref<1x10x10x128xf32, #tpu.memory_space<vmem>>, vector<1x10x8x128xf32>
    %66 = vector.extract_strided_slice %63 {offsets = [0, 0, 0, 0], sizes = [1, 8, 8, 128], strides = [1, 1, 1, 1]} : vector<1x10x8x128xf32> to vector<1x8x8x128xf32>
    %67 = vector.shape_cast %66 : vector<1x8x8x128xf32> to vector<64x128xf32>
    %68 = arith.truncf %67 : vector<64x128xf32> to vector<64x128xbf16>
    %69 = vector.extract_strided_slice %64 {offsets = [0, 0, 0, 0], sizes = [1, 8, 8, 128], strides = [1, 1, 1, 1]} : vector<1x10x8x128xf32> to vector<1x8x8x128xf32>
    %70 = vector.shape_cast %69 : vector<1x8x8x128xf32> to vector<64x128xf32>
    %71 = arith.truncf %70 : vector<64x128xf32> to vector<64x128xbf16>
    %72 = vector.extract_strided_slice %65 {offsets = [0, 0, 0, 0], sizes = [1, 8, 8, 128], strides = [1, 1, 1, 1]} : vector<1x10x8x128xf32> to vector<1x8x8x128xf32>
    %73 = vector.shape_cast %72 : vector<1x8x8x128xf32> to vector<64x128xf32>
    %74 = arith.truncf %73 : vector<64x128xf32> to vector<64x128xbf16>
    %75 = vector.extract_strided_slice %63 {offsets = [0, 1, 0, 0], sizes = [1, 8, 8, 128], strides = [1, 1, 1, 1]} : vector<1x10x8x128xf32> to vector<1x8x8x128xf32>
    %76 = vector.shape_cast %75 : vector<1x8x8x128xf32> to vector<64x128xf32>
    %77 = arith.truncf %76 : vector<64x128xf32> to vector<64x128xbf16>
    %78 = vector.extract_strided_slice %64 {offsets = [0, 1, 0, 0], sizes = [1, 8, 8, 128], strides = [1, 1, 1, 1]} : vector<1x10x8x128xf32> to vector<1x8x8x128xf32>
    %79 = vector.shape_cast %78 : vector<1x8x8x128xf32> to vector<64x128xf32>
    %80 = arith.truncf %79 : vector<64x128xf32> to vector<64x128xbf16>
    %81 = vector.extract_strided_slice %65 {offsets = [0, 1, 0, 0], sizes = [1, 8, 8, 128], strides = [1, 1, 1, 1]} : vector<1x10x8x128xf32> to vector<1x8x8x128xf32>
    %82 = vector.shape_cast %81 : vector<1x8x8x128xf32> to vector<64x128xf32>
    %83 = arith.truncf %82 : vector<64x128xf32> to vector<64x128xbf16>
    %84 = vector.extract_strided_slice %63 {offsets = [0, 2, 0, 0], sizes = [1, 8, 8, 128], strides = [1, 1, 1, 1]} : vector<1x10x8x128xf32> to vector<1x8x8x128xf32>
    %85 = vector.shape_cast %84 : vector<1x8x8x128xf32> to vector<64x128xf32>
    %86 = arith.truncf %85 : vector<64x128xf32> to vector<64x128xbf16>
    %87 = vector.extract_strided_slice %64 {offsets = [0, 2, 0, 0], sizes = [1, 8, 8, 128], strides = [1, 1, 1, 1]} : vector<1x10x8x128xf32> to vector<1x8x8x128xf32>
    %88 = vector.shape_cast %87 : vector<1x8x8x128xf32> to vector<64x128xf32>
    %89 = arith.truncf %88 : vector<64x128xf32> to vector<64x128xbf16>
    %90 = vector.extract_strided_slice %65 {offsets = [0, 2, 0, 0], sizes = [1, 8, 8, 128], strides = [1, 1, 1, 1]} : vector<1x10x8x128xf32> to vector<1x8x8x128xf32>
    %91 = vector.shape_cast %90 : vector<1x8x8x128xf32> to vector<64x128xf32>
    %92 = arith.truncf %91 : vector<64x128xf32> to vector<64x128xbf16>
    %93 = tpu.concatenate %68, %71, %74, %77, %80, %83, %86, %89, %92 in 1 : vector<64x128xbf16>, vector<64x128xbf16>, vector<64x128xbf16>, vector<64x128xbf16>, vector<64x128xbf16>, vector<64x128xbf16>, vector<64x128xbf16>, vector<64x128xbf16>, vector<64x128xbf16> -> vector<64x1152xbf16>
    %c0_48 = arith.constant 0 : index
    %c0_49 = arith.constant 0 : index
    %94 = vector.load %arg6[%c0_48, %c0_49] : memref<1152x128xbf16, #tpu.memory_space<vmem>>, vector<1152x128xbf16>
    %cst_50 = arith.constant dense<0.000000e+00> : vector<64x128xf32>
    %95 = tpu.matmul %93, %94, %cst_50 {dimension_numbers = #tpu.dot_dimension_numbers<[1], [0], [0], [1], [0, 0, 1, 1], [], []>} : vector<64x1152xbf16>, vector<1152x128xbf16>, vector<64x128xf32> -> vector<64x128xf32>
    %c0_51 = arith.constant 0 : index
    %c0_52 = arith.constant 0 : index
    %96 = vector.load %arg7[%c0_51, %c0_52] : memref<1x128xf32, #tpu.memory_space<vmem>>, vector<1x128xf32>
    %97 = vector.broadcast %96 : vector<1x128xf32> to vector<64x128xf32>
    %98 = arith.addf %95, %97 : vector<64x128xf32>
    %cst_53 = arith.constant 0.000000e+00 : f32
    %99 = vector.broadcast %cst_53 : f32 to vector<64x128xf32>
    %100 = arith.maximumf %98, %99 : vector<64x128xf32>
    %101 = vector.shape_cast %100 : vector<64x128xf32> to vector<1x8x8x128xf32>
    %102 = vector.shape_cast %101 : vector<1x8x8x128xf32> to vector<1x8x4x256xf32>
    %103 = vector.extract_strided_slice %102 {offsets = [0, 0, 0, 0], sizes = [1, 8, 4, 128], strides = [1, 1, 1, 1]} : vector<1x8x4x256xf32> to vector<1x8x4x128xf32>
    %104 = vector.extract_strided_slice %102 {offsets = [0, 0, 0, 128], sizes = [1, 8, 4, 128], strides = [1, 1, 1, 1]} : vector<1x8x4x256xf32> to vector<1x8x4x128xf32>
    %105 = arith.maximumf %103, %104 : vector<1x8x4x128xf32>
    %106 = vector.shape_cast %105 : vector<1x8x4x128xf32> to vector<1x4x2x4x128xf32>
    %107 = vector.extract_strided_slice %106 {offsets = [0, 0, 0, 0, 0], sizes = [1, 4, 1, 4, 128], strides = [1, 1, 1, 1, 1]} : vector<1x4x2x4x128xf32> to vector<1x4x1x4x128xf32>
    %108 = vector.shape_cast %107 : vector<1x4x1x4x128xf32> to vector<1x4x4x128xf32>
    %109 = vector.extract_strided_slice %106 {offsets = [0, 0, 1, 0, 0], sizes = [1, 4, 1, 4, 128], strides = [1, 1, 1, 1, 1]} : vector<1x4x2x4x128xf32> to vector<1x4x1x4x128xf32>
    %110 = vector.shape_cast %109 : vector<1x4x1x4x128xf32> to vector<1x4x4x128xf32>
    %111 = arith.maximumf %108, %110 : vector<1x4x4x128xf32>
    %cst_54 = arith.constant 0.000000e+00 : f32
    %112 = vector.broadcast %cst_54 : f32 to vector<1x6x6x128xf32>
    %c0_55 = arith.constant 0 : index
    %c0_56 = arith.constant 0 : index
    %c0_57 = arith.constant 0 : index
    %c0_58 = arith.constant 0 : index
    %113 = vector.load %arg16[%c0_55, %c0_56, %c0_57, %c0_58] : memref<1x6x6x128xf32, #tpu.memory_space<vmem>>, vector<1x6x6x128xf32>
    tpu.vector_store %arg16[%c0_55, %c0_56, %c0_57, %c0_58], %112 {strides = array<i32>} : memref<1x6x6x128xf32, #tpu.memory_space<vmem>>, vector<1x6x6x128xf32>,
    %c0_59 = arith.constant 0 : index
    %c1_60 = arith.constant 1 : index
    %c1_61 = arith.constant 1 : index
    %c0_62 = arith.constant 0 : index
    %114 = vector.load %arg16[%c0_59, %c1_60, %c1_61, %c0_62] : memref<1x6x6x128xf32, #tpu.memory_space<vmem>>, vector<1x4x4x128xf32>
    tpu.vector_store %arg16[%c0_59, %c1_60, %c1_61, %c0_62], %111 {strides = array<i32>} : memref<1x6x6x128xf32, #tpu.memory_space<vmem>>, vector<1x4x4x128xf32>,
    %c0_63 = arith.constant 0 : index
    %c0_64 = arith.constant 0 : index
    %c0_65 = arith.constant 0 : index
    %c0_66 = arith.constant 0 : index
    %115 = vector.load %arg16[%c0_63, %c0_64, %c0_65, %c0_66] : memref<1x6x6x128xf32, #tpu.memory_space<vmem>>, vector<1x6x4x128xf32>
    %c0_67 = arith.constant 0 : index
    %c0_68 = arith.constant 0 : index
    %c1_69 = arith.constant 1 : index
    %c0_70 = arith.constant 0 : index
    %116 = vector.load %arg16[%c0_67, %c0_68, %c1_69, %c0_70] : memref<1x6x6x128xf32, #tpu.memory_space<vmem>>, vector<1x6x4x128xf32>
    %c0_71 = arith.constant 0 : index
    %c0_72 = arith.constant 0 : index
    %c2_73 = arith.constant 2 : index
    %c0_74 = arith.constant 0 : index
    %117 = vector.load %arg16[%c0_71, %c0_72, %c2_73, %c0_74] : memref<1x6x6x128xf32, #tpu.memory_space<vmem>>, vector<1x6x4x128xf32>
    %118 = vector.extract_strided_slice %115 {offsets = [0, 0, 0, 0], sizes = [1, 4, 4, 128], strides = [1, 1, 1, 1]} : vector<1x6x4x128xf32> to vector<1x4x4x128xf32>
    %119 = vector.shape_cast %118 : vector<1x4x4x128xf32> to vector<16x128xf32>
    %120 = arith.truncf %119 : vector<16x128xf32> to vector<16x128xbf16>
    %121 = vector.extract_strided_slice %116 {offsets = [0, 0, 0, 0], sizes = [1, 4, 4, 128], strides = [1, 1, 1, 1]} : vector<1x6x4x128xf32> to vector<1x4x4x128xf32>
    %122 = vector.shape_cast %121 : vector<1x4x4x128xf32> to vector<16x128xf32>
    %123 = arith.truncf %122 : vector<16x128xf32> to vector<16x128xbf16>
    %124 = vector.extract_strided_slice %117 {offsets = [0, 0, 0, 0], sizes = [1, 4, 4, 128], strides = [1, 1, 1, 1]} : vector<1x6x4x128xf32> to vector<1x4x4x128xf32>
    %125 = vector.shape_cast %124 : vector<1x4x4x128xf32> to vector<16x128xf32>
    %126 = arith.truncf %125 : vector<16x128xf32> to vector<16x128xbf16>
    %127 = vector.extract_strided_slice %115 {offsets = [0, 1, 0, 0], sizes = [1, 4, 4, 128], strides = [1, 1, 1, 1]} : vector<1x6x4x128xf32> to vector<1x4x4x128xf32>
    %128 = vector.shape_cast %127 : vector<1x4x4x128xf32> to vector<16x128xf32>
    %129 = arith.truncf %128 : vector<16x128xf32> to vector<16x128xbf16>
    %130 = vector.extract_strided_slice %116 {offsets = [0, 1, 0, 0], sizes = [1, 4, 4, 128], strides = [1, 1, 1, 1]} : vector<1x6x4x128xf32> to vector<1x4x4x128xf32>
    %131 = vector.shape_cast %130 : vector<1x4x4x128xf32> to vector<16x128xf32>
    %132 = arith.truncf %131 : vector<16x128xf32> to vector<16x128xbf16>
    %133 = vector.extract_strided_slice %117 {offsets = [0, 1, 0, 0], sizes = [1, 4, 4, 128], strides = [1, 1, 1, 1]} : vector<1x6x4x128xf32> to vector<1x4x4x128xf32>
    %134 = vector.shape_cast %133 : vector<1x4x4x128xf32> to vector<16x128xf32>
    %135 = arith.truncf %134 : vector<16x128xf32> to vector<16x128xbf16>
    %136 = vector.extract_strided_slice %115 {offsets = [0, 2, 0, 0], sizes = [1, 4, 4, 128], strides = [1, 1, 1, 1]} : vector<1x6x4x128xf32> to vector<1x4x4x128xf32>
    %137 = vector.shape_cast %136 : vector<1x4x4x128xf32> to vector<16x128xf32>
    %138 = arith.truncf %137 : vector<16x128xf32> to vector<16x128xbf16>
    %139 = vector.extract_strided_slice %116 {offsets = [0, 2, 0, 0], sizes = [1, 4, 4, 128], strides = [1, 1, 1, 1]} : vector<1x6x4x128xf32> to vector<1x4x4x128xf32>
    %140 = vector.shape_cast %139 : vector<1x4x4x128xf32> to vector<16x128xf32>
    %141 = arith.truncf %140 : vector<16x128xf32> to vector<16x128xbf16>
    %142 = vector.extract_strided_slice %117 {offsets = [0, 2, 0, 0], sizes = [1, 4, 4, 128], strides = [1, 1, 1, 1]} : vector<1x6x4x128xf32> to vector<1x4x4x128xf32>
    %143 = vector.shape_cast %142 : vector<1x4x4x128xf32> to vector<16x128xf32>
    %144 = arith.truncf %143 : vector<16x128xf32> to vector<16x128xbf16>
    %145 = tpu.concatenate %120, %123, %126, %129, %132, %135, %138, %141, %144 in 1 : vector<16x128xbf16>, vector<16x128xbf16>, vector<16x128xbf16>, vector<16x128xbf16>, vector<16x128xbf16>, vector<16x128xbf16>, vector<16x128xbf16>, vector<16x128xbf16>, vector<16x128xbf16> -> vector<16x1152xbf16>
    %c0_75 = arith.constant 0 : index
    %c0_76 = arith.constant 0 : index
    %146 = vector.load %arg8[%c0_75, %c0_76] : memref<1152x128xbf16, #tpu.memory_space<vmem>>, vector<1152x128xbf16>
    %cst_77 = arith.constant dense<0.000000e+00> : vector<16x128xf32>
    %147 = tpu.matmul %145, %146, %cst_77 {dimension_numbers = #tpu.dot_dimension_numbers<[1], [0], [0], [1], [0, 0, 1, 1], [], []>} : vector<16x1152xbf16>, vector<1152x128xbf16>, vector<16x128xf32> -> vector<16x128xf32>
    %c0_78 = arith.constant 0 : index
    %c0_79 = arith.constant 0 : index
    %148 = vector.load %arg9[%c0_78, %c0_79] : memref<1x128xf32, #tpu.memory_space<vmem>>, vector<1x128xf32>
    %149 = vector.broadcast %148 : vector<1x128xf32> to vector<16x128xf32>
    %150 = arith.addf %147, %149 : vector<16x128xf32>
    %cst_80 = arith.constant 0.000000e+00 : f32
    %151 = vector.broadcast %cst_80 : f32 to vector<16x128xf32>
    %152 = arith.maximumf %150, %151 : vector<16x128xf32>
    %153 = vector.shape_cast %152 : vector<16x128xf32> to vector<1x4x4x128xf32>
    %154 = arith.truncf %153 : vector<1x4x4x128xf32> to vector<1x4x4x128xbf16>
    %155 = vector.shape_cast %154 : vector<1x4x4x128xbf16> to vector<1x2048xbf16>
    %c0_81 = arith.constant 0 : index
    %c0_82 = arith.constant 0 : index
    %156 = vector.load %arg10[%c0_81, %c0_82] : memref<2048x128xbf16, #tpu.memory_space<vmem>>, vector<2048x128xbf16>
    %cst_83 = arith.constant dense<0.000000e+00> : vector<1x128xf32>
    %157 = tpu.matmul %155, %156, %cst_83 {dimension_numbers = #tpu.dot_dimension_numbers<[1], [0], [0], [1], [0, 0, 1, 1], [], []>} : vector<1x2048xbf16>, vector<2048x128xbf16>, vector<1x128xf32> -> vector<1x128xf32>
    %c0_84 = arith.constant 0 : index
    %c0_85 = arith.constant 0 : index
    %158 = vector.load %arg11[%c0_84, %c0_85] : memref<1x128xf32, #tpu.memory_space<vmem>>, vector<1x128xf32>
    %159 = arith.addf %157, %158 : vector<1x128xf32>
    %cst_86 = arith.constant 0.000000e+00 : f32
    %160 = vector.broadcast %cst_86 : f32 to vector<1x128xf32>
    %161 = arith.maximumf %159, %160 : vector<1x128xf32>
    %162 = arith.truncf %161 : vector<1x128xf32> to vector<1x128xbf16>
    %c0_87 = arith.constant 0 : index
    %c0_88 = arith.constant 0 : index
    %163 = vector.load %arg12[%c0_87, %c0_88] : memref<128x128xbf16, #tpu.memory_space<vmem>>, vector<128x128xbf16>
    %cst_89 = arith.constant dense<0.000000e+00> : vector<1x128xf32>
    %164 = tpu.matmul %162, %163, %cst_89 {dimension_numbers = #tpu.dot_dimension_numbers<[1], [0], [0], [1], [0, 0, 1, 1], [], []>} : vector<1x128xbf16>, vector<128x128xbf16>, vector<1x128xf32> -> vector<1x128xf32>
    %c0_90 = arith.constant 0 : index
    %c0_91 = arith.constant 0 : index
    %165 = vector.load %arg13[%c0_90, %c0_91] : memref<1x128xf32, #tpu.memory_space<vmem>>, vector<1x128xf32>
    %166 = arith.addf %164, %165 : vector<1x128xf32>
    %cst_92 = arith.constant dense<0xFF800000> : vector<1xf32>
    %167 = vector.multi_reduction <maximumf>, %166, %cst_92 [1] : vector<1x128xf32> to vector<1xf32>
    %168 = vector.shape_cast %167 : vector<1xf32> to vector<1x1xf32>
    %169 = vector.broadcast %168 : vector<1x1xf32> to vector<1x128xf32>
    %170 = arith.subf %166, %169 : vector<1x128xf32>
    %171 = math.exp %170 : vector<1x128xf32>
    %cst_93 = arith.constant dense<0.000000e+00> : vector<1xf32>
    %172 = vector.multi_reduction <add>, %171, %cst_93 [1] : vector<1x128xf32> to vector<1xf32>
    %173 = vector.shape_cast %172 : vector<1xf32> to vector<1x1xf32>
    %174 = math.log %173 : vector<1x1xf32>
    %175 = vector.broadcast %174 : vector<1x1xf32> to vector<1x128xf32>
    %176 = arith.subf %170, %175 : vector<1x128xf32>
    %177 = vector.shape_cast %176 : vector<1x128xf32> to vector<1x1x128xf32>
    %c0_94 = arith.constant 0 : index
    %c0_95 = arith.constant 0 : index
    %c0_96 = arith.constant 0 : index
    %178 = vector.load %arg14[%c0_94, %c0_95, %c0_96] : memref<1x1x128xf32, #tpu.memory_space<vmem>>, vector<1x1x128xf32>
    tpu.vector_store %arg14[%c0_94, %c0_95, %c0_96], %177 {strides = array<i32>} : memref<1x1x128xf32, #tpu.memory_space<vmem>>, vector<1x1x128xf32>,
    return
  }
  func.func @transform_0(%arg0: i32) -> (i32, i32, i32) {
    %c0_i32 = arith.constant 0 : i32
    %c0_i32_0 = arith.constant 0 : i32
    %c0_i32_1 = arith.constant 0 : i32
    return %arg0, %c0_i32, %c0_i32_0 : i32, i32, i32
  }
  func.func @transform_1(%arg0: i32) -> (i32, i32) {
    %c0_i32 = arith.constant 0 : i32
    %c0_i32_0 = arith.constant 0 : i32
    %c0_i32_1 = arith.constant 0 : i32
    return %c0_i32, %c0_i32_0 : i32, i32
  }
  func.func @transform_2(%arg0: i32) -> (i32, i32) {
    %c0_i32 = arith.constant 0 : i32
    %c0_i32_0 = arith.constant 0 : i32
    %c0_i32_1 = arith.constant 0 : i32
    return %c0_i32, %c0_i32_0 : i32, i32
  }
  func.func @transform_3(%arg0: i32) -> (i32, i32) {
    %c0_i32 = arith.constant 0 : i32
    %c0_i32_0 = arith.constant 0 : i32
    %c0_i32_1 = arith.constant 0 : i32
    return %c0_i32, %c0_i32_0 : i32, i32
  }
  func.func @transform_4(%arg0: i32) -> (i32, i32) {
    %c0_i32 = arith.constant 0 : i32
    %c0_i32_0 = arith.constant 0 : i32
    %c0_i32_1 = arith.constant 0 : i32
    return %c0_i32, %c0_i32_0 : i32, i32
  }
  func.func @transform_5(%arg0: i32) -> (i32, i32) {
    %c0_i32 = arith.constant 0 : i32
    %c0_i32_0 = arith.constant 0 : i32
    %c0_i32_1 = arith.constant 0 : i32
    return %c0_i32, %c0_i32_0 : i32, i32
  }
  func.func @transform_6(%arg0: i32) -> (i32, i32) {
    %c0_i32 = arith.constant 0 : i32
    %c0_i32_0 = arith.constant 0 : i32
    %c0_i32_1 = arith.constant 0 : i32
    return %c0_i32, %c0_i32_0 : i32, i32
  }
  func.func @transform_7(%arg0: i32) -> (i32, i32) {
    %c0_i32 = arith.constant 0 : i32
    %c0_i32_0 = arith.constant 0 : i32
    %c0_i32_1 = arith.constant 0 : i32
    return %c0_i32, %c0_i32_0 : i32, i32
  }
  func.func @transform_8(%arg0: i32) -> (i32, i32) {
    %c0_i32 = arith.constant 0 : i32
    %c0_i32_0 = arith.constant 0 : i32
    %c0_i32_1 = arith.constant 0 : i32
    return %c0_i32, %c0_i32_0 : i32, i32
  }
  func.func @transform_9(%arg0: i32) -> (i32, i32) {
    %c0_i32 = arith.constant 0 : i32
    %c0_i32_0 = arith.constant 0 : i32
    %c0_i32_1 = arith.constant 0 : i32
    return %c0_i32, %c0_i32_0 : i32, i32
  }
  func.func @transform_10(%arg0: i32) -> (i32, i32) {
    %c0_i32 = arith.constant 0 : i32
    %c0_i32_0 = arith.constant 0 : i32
    %c0_i32_1 = arith.constant 0 : i32
    return %c0_i32, %c0_i32_0 : i32, i32
  }
  func.func @transform_11(%arg0: i32) -> (i32, i32) {
    %c0_i32 = arith.constant 0 : i32
    %c0_i32_0 = arith.constant 0 : i32
    %c0_i32_1 = arith.constant 0 : i32
    return %c0_i32, %c0_i32_0 : i32, i32
  }
  func.func @transform_12(%arg0: i32) -> (i32, i32) {
    %c0_i32 = arith.constant 0 : i32
    %c0_i32_0 = arith.constant 0 : i32
    %c0_i32_1 = arith.constant 0 : i32
    return %c0_i32, %c0_i32_0 : i32, i32
  }
  func.func @transform_13(%arg0: i32) -> (i32, i32, i32) {
    %c0_i32 = arith.constant 0 : i32
    %c0_i32_0 = arith.constant 0 : i32
    %c0_i32_1 = arith.constant 0 : i32
    return %arg0, %c0_i32, %c0_i32_0 : i32, i32, i32
  }
}

</mosaic_0001>

<bundles_post_ra>
// kernel: cnn_forward.1
= control target key start
LH: loop header
LB: loop body
LE: loop exit
PB: predicated region body
PF: predicated region fallthrough
CT: control target
= control target key end

     0   :  { %s9512_s0 = inlined_call_operand.vmem [shape: bf16[2,256,128], index: 0, kind: input, shape index: {}]   ;;  %s9513_s1 = inlined_call_operand.vmem [shape: bf16[128,128], index: 1, kind: input, shape index: {}]   ;;  %s9514_s2 = inlined_call_operand.vmem [shape: f32[1,128], index: 2, kind: input, shape index: {}]   ;;  %s9515_s3 = inlined_call_operand.vmem [shape: bf16[1152,128], index: 3, kind: input, shape index: {}]   ;;  %s9516_s4 = inlined_call_operand.vmem [shape: f32[1,128], index: 4, kind: input, shape index: {}]   ;;  %s9517_s5 = inlined_call_operand.vmem [shape: bf16[1152,128], index: 5, kind: input, shape index: {}]   ;;  %s9518_s6 = inlined_call_operand.vmem [shape: f32[1,128], index: 6, kind: input, shape index: {}]   ;;  %s9519_s7 = inlined_call_operand.vmem [shape: bf16[1152,128], index: 7, kind: input, shape index: {}]   ;;  %s9520_s8 = inlined_call_operand.vmem [shape: f32[1,128], index: 8, kind: input, shape index: {}]   ;;  %s9521_s9 = inlined_call_operand.vmem [shape: bf16[2048,128], index: 9, kind: input, shape index: {}]   ;;  %s9522_s10 = inlined_call_operand.vmem [shape: f32[1,128], index: 10, kind: input, shape index: {}]   ;;  %s9523_s11 = inlined_call_operand.vmem [shape: bf16[128,128], index: 11, kind: input, shape index: {}]   ;;  %s9524_s12 = inlined_call_operand.vmem [shape: f32[1,128], index: 12, kind: input, shape index: {}]   ;;  %s9525_s13 = inlined_call_operand.hbm [shape: f32[2,1,128], index: 13, kind: output, shape index: {}]  }
   0x1   :  { %9529 = sst [smem:[#allocation10_spill]] %s9512_s0 }
   0x2   :  { %18 = vsyncpa [#allocation5], 0 }
   0x3   :  { %20 = vsyncpa [#allocation5 + $0x1], 0  ;;  %s7687_s25 = smov 0   ;;  %s7689_s26 = smov 0  }
   0x4   :  { %s7691_s27 = smov 0   ;;  %s7693_s28 = smov 0  }
   0x5 LB: > { %9530 = sst [smem:[#allocation7_spill]] %s7608_s27  ;;  %s7708_s29 = sadd.s32 4294967295, %s7612_s28   ;;  %s7612_s28 = sphi %s7693_s28, %s9536_s28   ;;  %s7608_s27 = sphi %s7691_s27, %s9538_s27   ;;  %s7604_s26 = sphi %s7689_s26, %s9540_s26   ;;  %s7600_s25 = sphi %s7687_s25, %s9539_s25  }
   0x6   : > { %s5610_s30 = sadd.s32 4294967294, %s7612_s28   ;;  %s7712_s14 = sadd.s32 1, %s7612_s28  }
   0x7   : > { %9531 = sst [smem:[#allocation8_spill]] %s7712_s14  ;;  %s311_s15 = sadd.s32 1, %s7608_s27 }
   0x8   : > { %s308_s16 = ssub.s32 %s7612_s28, %s7712_s14  ;;  %p321_p0 = scmp.ne.s32.totalorder %s7608_s27, %s7604_s26 }
   0x9   : > { %p309_p1 = scmp.eq.s32.totalorder %s308_s16, 0  ;;  %p322_p2 = scmp.eq.s32.totalorder %s7708_s29, 1 }
   0xa   : > { %p327_p3 = scmp.ne.s32.totalorder %s7604_s26, %s7600_s25  ;;  %p328_p4 = scmp.eq.s32.totalorder %s5610_s30, 1 }
   0xb   : > { %s7723_s17 = scalar_select %p309_p1, %s7608_s27, %s311_s15  }
   0xc   : > { %p7725_p5 = por %p322_p2, %p321_p0  ;;  %p7729_p6 = por %p328_p4, %p327_p3 }
   0xd   : > { %9532 = sst [smem:[#allocation9_spill]] %s7723_s17  ;;  %p5613_p7 = scmp.ge.s32.totalorder %s7612_s28, 1 }
   0xe   : > { %p390_p8 = scmp.lt.s32.totalorder %s7612_s28, 3 }
  0x10   : > { %p391_p9 = pnand %p5613_p7, %p390_p8 }
  0x11   : > { %p433_p10 = scmp.lt.s32.totalorder (!%p391_p9), %s7708_s29, 1  ;;  %s9535_s0 = sld [smem:[#allocation10_spill]] (!%p391_p9) }
  0x12   : > { %394 = sbr.rel (%p391_p9) target bundleno = 1790 (0x6fe), region = 72  ;;  %s431_s16 = sand.u32 (!%p391_p9), 1, %s7604_s26  }
  0x17   : > { %v7146_v0 = vld [vmem:[%s9513_s1 + $0x38] sm:$0xff]  ;;  %v7145_v1 = vld [vmem:[%s9513_s1 + $0x30] sm:$0xff]  ;;  %v7144_v2 = vld [vmem:[%s9513_s1 + $0x28] sm:$0xff]  ;;  %s434_s23 = scalar_select %p433_p10, %s7708_s29, 1  ;;  %v7614_v30 = vmov 0.0   ;;  %vm5528_vm1 = vcmask 1040384  }
  0x18   : > { %635 = vmatpush.bf16.msra.mxu0 %v7146_v0  ;;  %v7143_v3 = vld [vmem:[%s9513_s1 + $0x20] sm:$0xff]  ;;  %v7142_v4 = vld [vmem:[%s9513_s1 + $0x18] sm:$0xff]  ;;  %v7141_v5 = vld [vmem:[%s9513_s1 + $0x10] sm:$0xff]  ;;  %1028 = vst [vmem:[#allocation2] sm:$0xff] %v7614_v30  ;;  %v7615_v36 = vmov 1966171168  }
  0x19   : > { %v7140_v6 = vld [vmem:[%s9513_s1 + $0x8] sm:$0xff]  ;;  %s7122_s27 = sshll.u32 %s434_s23, 7  ;;  %v7139_v7 = vld [vmem:[%s9513_s1] sm:$0xff]  ;;  %v7162_v16 = vld [vmem:[%s9515_s3 + $0x78] sm:$0xff]  ;;  %1030 = vst [vmem:[#allocation2 + $0x10] sm:$0xff] %v7614_v30  ;;  %v757_v37 = vunpack.c.l.s4 %v7615_v36  ;;  %s5543_s23 = scalar_lea.sflag [#allocation5], %s431_s16 }
  0x1a   : > { %s7764_s14 = scalar_lea.vmem %s9535_s0, %s7122_s27  ;;  %1895 = vmatpush.bf16.msra.mxu2 %v7162_v16  ;;  %v7161_v17 = vld [vmem:[%s9515_s3 + $0x70] sm:$0xff]  ;;  %v7154_v18 = vld [vmem:[%s9515_s3 + $0x38] sm:$0xff]  ;;  %v7160_v20 = vld [vmem:[%s9515_s3 + $0x68] sm:$0xff]  ;;  %1031 = vst [vmem:[#allocation2 + $0x18] sm:$0x3] %v7614_v30  ;;  %s432_s27 = scalar_lea.vmem [#allocation4], %s431_s16 }
  0x1b   : > { %v7123_v8 = vld [vmem:[%s7764_s14] sm:$0xff]  ;;  %v7124_v9 = vld [vmem:[%s7764_s14 + $0x8] sm:$0xff]  ;;  %v7125_v10 = vld [vmem:[%s7764_s14 + $0x10] sm:$0xff]  ;;  %1866 = vmatpush.bf16.msra.mxu1 %v7154_v18  ;;  %1029 = vst [vmem:[#allocation2 + $0x8] sm:$0x3] %v7614_v30  ;;  %v7840_v42 = vunpack.c.0.s8 %v757_v37  ;;  %s5553_s17 = sshll.u32 %s432_s27, 4  ;;  %s5554_s17 = int_to_ptr.vmem [resolvable:$true] %s5553_s17 }
  0x1c   : > { %636 = vmatpush.bf16.msra.mxu0 %v7145_v1  ;;  %v7126_v11 = vld [vmem:[%s7764_s14 + $0x18] sm:$0xff]  ;;  %v7127_v12 = vld [vmem:[%s7764_s14 + $0x20] sm:$0xff]  ;;  %v7128_v13 = vld [vmem:[%s7764_s14 + $0x28] sm:$0xff]  ;;  %1032 = vst [vmem:[#allocation2 + $0x20] sm:$0xff] %v7614_v30  ;;  %vm4170_vm0 = vsmask.f32 256 }
  0x1d   : > { %v7129_v14 = vld [vmem:[%s7764_s14 + $0x30] sm:$0xff]  ;;  %v7130_v15 = vld [vmem:[%s7764_s14 + $0x38] sm:$0xff]  ;;  %v7159_v23 = vld [vmem:[%s9515_s3 + $0x60] sm:$0xff]  ;;  %1033 = vst [vmem:[#allocation2 + $0x28] sm:$0x3] %v7614_v30 }
  0x1e   : > { %1896 = vmatpush.bf16.msra.mxu2 %v7161_v17  ;;  %v7170_v19 = vld [vmem:[%s9515_s3 + $0xb8] sm:$0xff]  ;;  %v7153_v21 = vld [vmem:[%s9515_s3 + $0x30] sm:$0xff]  ;;  %v7131_v24 = vld [vmem:[%s7764_s14 + $0x40] sm:$0xff]  ;;  %1034 = vst [vmem:[#allocation2 + $0x30] sm:$0xff] %v7614_v30 }
  0x1f   : > { %1924 = vmatpush.bf16.msra.mxu3 %v7170_v19  ;;  %v7169_v22 = vld [vmem:[%s9515_s3 + $0xb0] sm:$0xff]  ;;  %1867 = vmatpush.bf16.msra.mxu1 %v7153_v21  ;;  %v7152_v26 = vld [vmem:[%s9515_s3 + $0x28] sm:$0xff]  ;;  %v7158_v28 = vld [vmem:[%s9515_s3 + $0x58] sm:$0xff]  ;;  %1035 = vst [vmem:[#allocation2 + $0x38] sm:$0x3] %v7614_v30 }
  0x20   : > { %637 = vmatpush.bf16.msra.mxu0 %v7144_v2  ;;  %v7168_v27 = vld [vmem:[%s9515_s3 + $0xa8] sm:$0xff]  ;;  %v7811_v29 = vld [vmem:[%s9514_s2] ss:$0 sm:$0xff]  ;;  %v7157_v33 = vld [vmem:[%s9515_s3 + $0x50] sm:$0xff]  ;;  %1036 = vst [vmem:[#allocation2 + $0x40] sm:$0xff] %v7614_v30 }
  0x21   : > { %v7151_v31 = vld [vmem:[%s9515_s3 + $0x20] sm:$0xff]  ;;  %v7150_v38 = vld [vmem:[%s9515_s3 + $0x18] sm:$0xff]  ;;  %v7156_v40 = vld [vmem:[%s9515_s3 + $0x48] sm:$0xff]  ;;  %1037 = vst [vmem:[#allocation2 + $0x48] sm:$0x3] %v7614_v30 }
  0x22   : > { %1897 = vmatpush.bf16.msra.mxu2 %v7160_v20  ;;  %v7167_v32 = vld [vmem:[%s9515_s3 + $0xa0] sm:$0xff]  ;;  %v7166_v39 = vld [vmem:[%s9515_s3 + $0x98] sm:$0xff]  ;;  %v7149_v43 = vld [vmem:[%s9515_s3 + $0x10] sm:$0xff]  ;;  %1038 = vst [vmem:[#allocation2 + $0x50] sm:$0xff] %v7614_v30 }
  0x23   : > { %1925 = vmatpush.bf16.msra.mxu3 %v7169_v22  ;;  %1868 = vmatpush.bf16.msra.mxu1 %v7152_v26  ;;  %v7165_v44 = vld [vmem:[%s9515_s3 + $0x90] sm:$0xff]  ;;  %v7155_v45 = vld [vmem:[%s9515_s3 + $0x40] sm:$0xff]  ;;  %v7132_v46 = vld [vmem:[%s7764_s14 + $0x48] sm:$0xff]  ;;  %1039 = vst [vmem:[#allocation2 + $0x58] sm:$0x3] %v7614_v30 }
  0x24   : > { %638 = vmatpush.bf16.msra.mxu0 %v7143_v3  ;;  %1040 = vst [vmem:[#allocation2 + $0x60] sm:$0xff] %v7614_v30  ;;  %v7148_v51 = vld [vmem:[%s9515_s3 + $0x8] sm:$0xff]  ;;  %v7147_v57 = vld [vmem:[%s9515_s3] sm:$0xff]  ;;  %v7134_v20 = vld [vmem:[%s7764_s14 + $0x58] sm:$0xff] }
  0x25   : > { %v7164_v52 = vld [vmem:[%s9515_s3 + $0x88] sm:$0xff]  ;;  %1041 = vst [vmem:[#allocation2 + $0x68] sm:$0x3] %v7614_v30  ;;  %v7163_v58 = vld [vmem:[%s9515_s3 + $0x80] sm:$0xff] }
  0x26   : > { %1898 = vmatpush.bf16.msra.mxu2 %v7159_v23  ;;  %1042 = vst [vmem:[#allocation2 + $0x70] sm:$0xff] %v7614_v30  ;;  %v1132_v19 = vld [vmem:[#allocation2 + $0x2] sm:$0xff] }
  0x27   : > { %1926 = vmatpush.bf16.msra.mxu3 %v7168_v27  ;;  %1869 = vmatpush.bf16.msra.mxu1 %v7151_v31  ;;  %1043 = vst [vmem:[#allocation2 + $0x78] sm:$0x3] %v7614_v30  ;;  %v1158_v27 = vpack.c.bf16 %v1132_v19, %v1132_v19 }
  0x28   : > { %639 = vmatpush.bf16.msra.mxu0 %v7142_v4  ;;  %1044 = vst [vmem:[#allocation2 + $0x80] sm:$0xff] %v7614_v30 }
  0x29   : > { %1045 = vst [vmem:[#allocation2 + $0x88] sm:$0x3] %v7614_v30 }
  0x2a   : > { %1899 = vmatpush.bf16.msra.mxu2 %v7158_v28  ;;  %1046 = vst [vmem:[#allocation2 + $0x90] sm:$0xff] %v7614_v30 }
  0x2b   : > { %1927 = vmatpush.bf16.msra.mxu3 %v7167_v32  ;;  %1870 = vmatpush.bf16.msra.mxu1 %v7150_v38  ;;  %1047 = vst [vmem:[#allocation2 + $0x98] sm:$0x3] %v7614_v30 }
  0x2c   : > { %640 = vmatpush.bf16.msra.mxu0 %v7141_v5  ;;  %3234 = vst [vmem:[#allocation3] sm:$0x3f] %v7614_v30 }
  0x2d   : > { %3235 = vst [vmem:[#allocation3 + $0x8] sm:$0x3f] %v7614_v30 }
  0x2e   : > { %1900 = vmatpush.bf16.msra.mxu2 %v7157_v33  ;;  %3236 = vst [vmem:[#allocation3 + $0x10] sm:$0x3f] %v7614_v30  ;;  %v7616_v33 = vmov 0.0|0.0  }
  0x2f   : > { %1928 = vmatpush.bf16.msra.mxu3 %v7166_v39  ;;  %1871 = vmatpush.bf16.msra.mxu1 %v7149_v43  ;;  %3237 = vst [vmem:[#allocation3 + $0x18] sm:$0x3f] %v7614_v30  ;;  %v1228_v39 = vunpack.c.l.b16 %v1158_v27 }
  0x30   : > { %641 = vmatpush.bf16.msra.mxu0 %v7140_v6  ;;  %3238 = vst [vmem:[#allocation3 + $0x20] sm:$0x3f] %v7614_v30  ;;  %v7133_v6 = vld [vmem:[%s7764_s14 + $0x50] sm:$0xff] }
  0x31   : > { %3239 = vst [vmem:[#allocation3 + $0x28] sm:$0x3f] %v7614_v30 }
  0x32   : > { %1901 = vmatpush.bf16.msra.mxu2 %v7156_v40 }
  0x33   : > { %1929 = vmatpush.bf16.msra.mxu3 %v7165_v44  ;;  %1872 = vmatpush.bf16.msra.mxu1 %v7148_v51 }
  0x34   : > { %642 = vmatpush.bf16.msra.mxu0 %v7139_v7 }
  0x36   : > { %1902 = vmatpush.bf16.msra.mxu2 %v7155_v45 }
  0x37   : > { %643 = vmatmul.bf16.vlgmr.msra.gmra.mxu0 %v7123_v8  ;;  %1930 = vmatpush.bf16.msra.mxu3 %v7164_v52 }
  0x38   : > { %1873 = vmatpush.bf16.msra.mxu1 %v7147_v57 }
  0x3b   : > { %1931 = vmatpush.bf16.msra.mxu3 %v7163_v58 }
  0x47   : > { %648 = vmatmul.bf16.gmra.mxu0 %v7124_v9 }
  0x57   : > { %653 = vmatmul.bf16.gmra.mxu0 %v7125_v10 }
  0x67   : > { %658 = vmatmul.bf16.gmra.mxu0 %v7126_v11  ;;  %v1122_v11 = vld [vmem:[#allocation2 + $0x1] sm:$0xff] }
  0x77   : > { %663 = vmatmul.bf16.gmra.mxu0 %v7127_v12 }
  0x87   : > { %668 = vmatmul.bf16.gmra.mxu0 %v7128_v13 }
  0x97   : > { %673 = vmatmul.bf16.gmra.mxu0 %v7129_v14  ;;  %v1150_v14 = vpack.c.bf16 %v1122_v11, %v1122_v11 }
  0x99   : > { %v1204_v18 = vunpack.c.l.b16 %v1150_v14 }
  0xa7   : > { %678 = vmatmul.bf16.gmra.mxu0 %v7130_v15 }
  0xb4   : > { %v644_v25 = vpop.f32.mrf.mxu0 }
  0xb5   : > { %v645_v35 = vadd.f32 %v7811_v29, %v644_v25 }
  0xb7   : > { %683 = vmatmul.bf16.gmra.mxu0 %v7131_v24  ;;  %v724_v41 = vmax.f32 %v645_v35, 0.0 }
  0xb9   : > { %v759_v48 = vperm.slane %v724_v41, %v7840_v42 }
  0xbb   : > { %v916_v54 = vrot.slane %v759_v48, 4 }
  0xbc   : > { %v646_v34 = vpop.f32.mrf.mxu0 }
  0xbd   : > { %v647_v49 = vadd.f32 %v7811_v29, %v646_v34  ;;  %v980_v61 = vmax.f32 %v759_v48, %v916_v54  ;;  %v1180_v34 = vunpack.c.l.b16 %v7616_v33 }
  0xbf   : > { %v725_v55 = vmax.f32 %v647_v49, 0.0 }
  0xc1   : > { %v763_v62 = vperm.slane %v725_v55, %v7840_v42 }
  0xc3   : > { %v917_v3 = vrot.slane %v763_v62, 4 }
  0xc4   : > { %v649_v47 = vpop.f32.mrf.mxu0 }
  0xc5   : > { %v650_v50 = vadd.f32 %v7811_v29, %v649_v47  ;;  %v981_v8 = vmax.f32 %v763_v62, %v917_v3 }
  0xc7   : > { %v726_v53 = vmax.f32 %v650_v50, 0.0  ;;  %688 = vmatmul.bf16.gmra.mxu0 %v7132_v46 }
  0xc9   : > { %v767_v56 = vperm.slane %v726_v53, %v7840_v42 }
  0xcb   : > { %v918_v59 = vrot.slane %v767_v56, 4 }
  0xcc   : > { %v651_v60 = vpop.f32.mrf.mxu0 }
  0xcd   : > { %v982_v63 = vmax.f32 %v767_v56, %v918_v59  ;;  %v652_v0 = vadd.f32 %v7811_v29, %v651_v60  ;;  %v7135_v56 = vld [vmem:[%s7764_s14 + $0x60] sm:$0xff] }
  0xcf   : > { %v1012_v1 = vmax.f32 %v980_v61, %v982_v63  ;;  %v727_v2 = vmax.f32 %v652_v0, 0.0 }
  0xd1   : > { %1064 = vst [vmem:[#allocation1] ss:$2 sm:$0xff] %v1012_v1  ;;  %v771_v4 = vperm.slane %v727_v2, %v7840_v42  ;;  %v7136_v2 = vld [vmem:[%s7764_s14 + $0x68] sm:$0xff] }
  0xd3   : > { %v919_v5 = vrot.slane %v771_v4, 4 }
  0xd4   : > { %v654_v7 = vpop.f32.mrf.mxu0 }
  0xd5   : > { %v983_v9 = vmax.f32 %v771_v4, %v919_v5  ;;  %v655_v12 = vadd.f32 %v7811_v29, %v654_v7 }
  0xd7   : > { %v1013_v10 = vmax.f32 %v981_v8, %v983_v9  ;;  %693 = vmatmul.bf16.gmra.mxu0 %v7133_v6  ;;  %v728_v16 = vmax.f32 %v655_v12, 0.0 }
  0xd9   : > { %1066 = vst [vmem:[#allocation1 + $0x1] ss:$2 sm:$0xff] %v1013_v10  ;;  %v775_v22 = vperm.slane %v728_v16, %v7840_v42 }
  0xdb   : > { %v920_v30 = vrot.slane %v775_v22, 4 }
  0xdc   : > { %v656_v13 = vpop.f32.mrf.mxu0 }
  0xdd   : > { %v657_v23 = vadd.f32 %v7811_v29, %v656_v13  ;;  %v984_v44 = vmax.f32 %v775_v22, %v920_v30 }
  0xdf   : > { %v729_v31 = vmax.f32 %v657_v23, 0.0 }
  0xe0   : > { %v1067_v15 = vld.sshfl [vmem:[#allocation1] sm:$0xff pattern:$0x75316420] }
  0xe1   : > { %1104 = vst [vmem:[#allocation2 + $0x11] sm:$0xff] %v1067_v15  ;;  %v1151_v17 = vpack.c.bf16 %v1067_v15, %v1067_v15  ;;  %v779_v45 = vperm.slane %v729_v31, %v7840_v42 }
  0xe3   : > { %v7892_v21 = vunpack.c.l.b16 %v1151_v17  ;;  %v921_v53 = vrot.slane %v779_v45, 4 }
  0xe4   : > { %v659_v24 = vpop.f32.mrf.mxu0 }
  0xe5   : > { %v660_v25 = vadd.f32 %v7811_v29, %v659_v24  ;;  %v1212_v26 = vpack.c.b16 %v7892_v21, %v1204_v18  ;;  %v985_v58 = vmax.f32 %v779_v45, %v921_v53 }
  0xe7   : > { %v730_v28 = vmax.f32 %v660_v25, 0.0  ;;  %698 = vmatmul.bf16.gmra.mxu0 %v7134_v20  ;;  %1903 = vmatmul.bf16.vlgmr.msra.gmra.mxu2 %v1212_v26 }
  0xe8   : > { %v1113_v32 = vld [vmem:[#allocation2 + $0x10] sm:$0xff] }
  0xe9   : > { %v1133_v35 = vld [vmem:[#allocation2 + $0x12] sm:$0xff]  ;;  %v783_v36 = vperm.slane %v730_v28, %v7840_v42  ;;  %v1143_v37 = vpack.c.bf16 %v1113_v32, %v1113_v32 }
  0xea   : > { %v1159_v38 = vpack.c.bf16 %v1133_v35, %v1133_v35 }
  0xeb   : > { %v922_v40 = vrot.slane %v783_v36, 4  ;;  %v7899_v41 = vunpack.c.l.b16 %v1143_v37 }
  0xec   : > { %v7901_v43 = vunpack.c.l.b16 %v1159_v38  ;;  %v661_v46 = vpop.f32.mrf.mxu0 }
  0xed   : > { %v986_v47 = vmax.f32 %v783_v36, %v922_v40  ;;  %v662_v48 = vadd.f32 %v7811_v29, %v661_v46  ;;  %v1188_v49 = vpack.c.b16 %v7899_v41, %v1180_v34  ;;  %v7137_v34 = vld [vmem:[%s7764_s14 + $0x70] sm:$0xff] }
  0xee   : > { %v1236_v50 = vpack.c.b16 %v7901_v43, %v1228_v39 }
  0xef   : > { %v1014_v51 = vmax.f32 %v984_v44, %v986_v47  ;;  %v731_v52 = vmax.f32 %v662_v48, 0.0  ;;  %1874 = vmatmul.bf16.vlgmr.msra.gmra.mxu1 %v1188_v49  ;;  %v7138_v47 = vld [vmem:[%s7764_s14 + $0x78] sm:$0xff]  ;;  %s5551_s14 = scalar_lea.hbm %s9525_s13, %s7708_s29  ;;  %s7570_s29 = scalar_lea.hbm %s9525_s13, 2 }
  0xf0   : > { %1932 = vmatmul.bf16.vlgmr.msra.gmra.mxu3 %v1236_v50  ;;  %s5555_s22 = sshll.u32 %s5551_s14, 4  ;;  %s5556_s22 = int_to_ptr.hbm [resolvable:$true] %s5555_s22 }
  0xf1   : > { %1069 = vst [vmem:[#allocation1 + $0x10] ss:$2 sm:$0xff] %v1014_v51  ;;  %v787_v54 = vperm.slane %v731_v52, %v7840_v42  ;;  %s7564_s24 = sshra.s32 %s5556_s22, 4  ;;  %s7565_s24 = int_to_ptr.hbm [resolvable:$true] %s7564_s24 }
  0xf2   : > { %s7566_s30 = scalar_lea.hbm %s7565_s24, 1  ;;  %p7571_p0 = scmp.lt.s32.totalorder %s7565_s24, %s9525_s13 }
  0xf3   : > { %v923_v55 = vrot.slane %v787_v54, 4  ;;  %p7567_p11 = scmp.ne.s32.totalorder %s7565_s24, %s7566_s30  ;;  %p7572_p1 = scmp.lt.s32.totalorder %s7570_s29, %s7566_s30 }
  0xf4   : > { %v664_v57 = vpop.f32.mrf.mxu0 }
  0xf5   : > { %v987_v59 = vmax.f32 %v787_v54, %v923_v55  ;;  %v665_v61 = vadd.f32 %v7811_v29, %v664_v57  ;;  %p7568_p12 = pnand %p7567_p11, %p7725_p5  ;;  %p7573_p2 = por %p7572_p1, %p7571_p0 }
  0xf7   : > { %v1015_v60 = vmax.f32 %v985_v58, %v987_v59  ;;  %703 = vmatmul.bf16.gmra.mxu0 %v7135_v56  ;;  %v732_v0 = vmax.f32 %v665_v61, 0.0  ;;  %p7569_p13 = pneg %p7568_p12 }
  0xf9   : > { %1071 = vst [vmem:[#allocation1 + $0x11] ss:$2 sm:$0xff] %v1015_v60  ;;  %v791_v4 = vperm.slane %v732_v0, %v7840_v42  ;;  %p7574_p3 = pnand %p7573_p2, %p7569_p13 }
  0xfb   : > { %v924_v10 = vrot.slane %v791_v4, 4 }
  0xfc   : > { %v666_v62 = vpop.f32.mrf.mxu0 }
  0xfd   : > { %v667_v5 = vadd.f32 %v7811_v29, %v666_v62  ;;  %v988_v20 = vmax.f32 %v791_v4, %v924_v10 }
  0xff   : > { %v733_v11 = vmax.f32 %v667_v5, 0.0 }
 0x100   : > { %v1072_v63 = vld.sshfl [vmem:[#allocation1 + $0x10] sm:$0xff pattern:$0x75316420] }
 0x101   : > { %1105 = vst [vmem:[#allocation2 + $0x21] sm:$0xff] %v1072_v63  ;;  %v1152_v1 = vpack.c.bf16 %v1072_v63, %v1072_v63  ;;  %v795_v22 = vperm.slane %v733_v11, %v7840_v42 }
 0x103   : > { %v7911_v3 = vunpack.c.l.b16 %v1152_v1  ;;  %v925_v31 = vrot.slane %v795_v22, 4 }
 0x104   : > { %v669_v6 = vpop.f32.mrf.mxu0 }
 0x105   : > { %v670_v7 = vadd.f32 %v7811_v29, %v669_v6  ;;  %v1256_v8 = vpack.c.b16 %v7911_v3, %v7892_v21  ;;  %v989_v36 = vmax.f32 %v795_v22, %v925_v31  ;;  %v7207_v21 = vld [vmem:[%s9515_s3 + $0x1e0] sm:$0xff] }
 0x107   : > { %v734_v9 = vmax.f32 %v670_v7, 0.0  ;;  %708 = vmatmul.bf16.gmra.mxu0 %v7136_v2 }
 0x108   : > { %v1114_v12 = vld [vmem:[#allocation2 + $0x20] sm:$0xff] }
 0x109   : > { %v1134_v13 = vld [vmem:[#allocation2 + $0x22] sm:$0xff]  ;;  %v799_v14 = vperm.slane %v734_v9, %v7840_v42  ;;  %v1144_v15 = vpack.c.bf16 %v1114_v12, %v1114_v12 }
 0x10a   : > { %v1160_v16 = vpack.c.bf16 %v1134_v13, %v1134_v13 }
 0x10b   : > { %v926_v17 = vrot.slane %v799_v14, 4  ;;  %v7919_v18 = vunpack.c.l.b16 %v1144_v15 }
 0x10c   : > { %v7921_v19 = vunpack.c.l.b16 %v1160_v16  ;;  %v671_v23 = vpop.f32.mrf.mxu0 }
 0x10d   : > { %v990_v24 = vmax.f32 %v799_v14, %v926_v17  ;;  %v672_v25 = vadd.f32 %v7811_v29, %v671_v23  ;;  %v1246_v26 = vpack.c.b16 %v7919_v18, %v7899_v41  ;;  %v7215_v41 = vld [vmem:[%s9515_s3 + $0x220] sm:$0xff] }
 0x10e   : > { %v1266_v27 = vpack.c.b16 %v7921_v19, %v7901_v43  ;;  %v7199_v43 = vld [vmem:[%s9515_s3 + $0x1a0] sm:$0xff] }
 0x10f   : > { %v1016_v28 = vmax.f32 %v988_v20, %v990_v24  ;;  %v735_v30 = vmax.f32 %v672_v25, 0.0 }
 0x111   : > { %1074 = vst [vmem:[#allocation1 + $0x20] ss:$2 sm:$0xff] %v1016_v28  ;;  %v803_v32 = vperm.slane %v735_v30, %v7840_v42 }
 0x113   : > { %v927_v33 = vrot.slane %v803_v32, 4 }
 0x114   : > { %v674_v35 = vpop.f32.mrf.mxu0 }
 0x115   : > { %v991_v37 = vmax.f32 %v803_v32, %v927_v33  ;;  %v675_v39 = vadd.f32 %v7811_v29, %v674_v35 }
 0x117   : > { %v1017_v38 = vmax.f32 %v989_v36, %v991_v37  ;;  %713 = vmatmul.bf16.gmra.mxu0 %v7137_v34  ;;  %v736_v44 = vmax.f32 %v675_v39, 0.0 }
 0x119   : > { %1076 = vst [vmem:[#allocation1 + $0x21] ss:$2 sm:$0xff] %v1017_v38  ;;  %v807_v49 = vperm.slane %v736_v44, %v7840_v42 }
 0x11b   : > { %v928_v55 = vrot.slane %v807_v49, 4 }
 0x11c   : > { %v676_v40 = vpop.f32.mrf.mxu0 }
 0x11d   : > { %v677_v50 = vadd.f32 %v7811_v29, %v676_v40  ;;  %v992_v1 = vmax.f32 %v807_v49, %v928_v55 }
 0x11f   : > { %v737_v56 = vmax.f32 %v677_v50, 0.0 }
 0x120   : > { %v1077_v45 = vld.sshfl [vmem:[#allocation1 + $0x20] sm:$0xff pattern:$0x75316420] }
 0x121   : > { %1106 = vst [vmem:[#allocation2 + $0x31] sm:$0xff] %v1077_v45  ;;  %v1153_v46 = vpack.c.bf16 %v1077_v45, %v1077_v45  ;;  %v811_v2 = vperm.slane %v737_v56, %v7840_v42 }
 0x123   : > { %v7933_v48 = vunpack.c.l.b16 %v1153_v46  ;;  %v929_v12 = vrot.slane %v811_v2, 4 }
 0x124   : > { %v679_v51 = vpop.f32.mrf.mxu0 }
 0x125   : > { %v680_v52 = vadd.f32 %v7811_v29, %v679_v51  ;;  %v7940_v53 = vpack.c.b16 %v7933_v48, %v7911_v3  ;;  %v993_v16 = vmax.f32 %v811_v2, %v929_v12 }
 0x127   : > { %v738_v54 = vmax.f32 %v680_v52, 0.0  ;;  %718 = vmatmul.bf16.gmra.mxu0 %v7138_v47  ;;  %1908 = vmatmul.bf16.gmra.mxu2 %v7940_v53 }
 0x128   : > { %v1115_v57 = vld [vmem:[#allocation2 + $0x30] sm:$0xff] }
 0x129   : > { %v1135_v58 = vld [vmem:[#allocation2 + $0x32] sm:$0xff]  ;;  %v815_v59 = vperm.slane %v738_v54, %v7840_v42  ;;  %v1145_v60 = vpack.c.bf16 %v1115_v57, %v1115_v57 }
 0x12a   : > { %v1161_v61 = vpack.c.bf16 %v1135_v58, %v1135_v58 }
 0x12b   : > { %v930_v62 = vrot.slane %v815_v59, 4  ;;  %v7944_v63 = vunpack.c.l.b16 %v1145_v60 }
 0x12c   : > { %v7946_v0 = vunpack.c.l.b16 %v1161_v61  ;;  %v681_v4 = vpop.f32.mrf.mxu0 }
 0x12d   : > { %v994_v5 = vmax.f32 %v815_v59, %v930_v62  ;;  %v682_v6 = vadd.f32 %v7811_v29, %v681_v4  ;;  %v7952_v7 = vpack.c.b16 %v7944_v63, %v7919_v18  ;;  %v7205_v18 = vld [vmem:[%s9515_s3 + $0x1d0] sm:$0xff] }
 0x12e   : > { %v7956_v9 = vpack.c.b16 %v7946_v0, %v7921_v19  ;;  %v7214_v19 = vld [vmem:[%s9515_s3 + $0x218] sm:$0xff] }
 0x12f   : > { %v1018_v10 = vmax.f32 %v992_v1, %v994_v5  ;;  %v739_v11 = vmax.f32 %v682_v6, 0.0  ;;  %1879 = vmatmul.bf16.gmra.mxu1 %v7952_v7 }
 0x130   : > { %1937 = vmatmul.bf16.gmra.mxu3 %v7956_v9 }
 0x131   : > { %1079 = vst [vmem:[#allocation1 + $0x30] ss:$2 sm:$0xff] %v1018_v10  ;;  %v819_v13 = vperm.slane %v739_v11, %v7840_v42 }
 0x133   : > { %v931_v14 = vrot.slane %v819_v13, 4 }
 0x134   : > { %v684_v15 = vpop.f32.mrf.mxu0 }
 0x135   : > { %v995_v17 = vmax.f32 %v819_v13, %v931_v14  ;;  %v685_v22 = vadd.f32 %v7811_v29, %v684_v15 }
 0x137   : > { %v1019_v20 = vmax.f32 %v993_v16, %v995_v17  ;;  %v740_v24 = vmax.f32 %v685_v22, 0.0 }
 0x139   : > { %1081 = vst [vmem:[#allocation1 + $0x31] ss:$2 sm:$0xff] %v1019_v20  ;;  %v823_v31 = vperm.slane %v740_v24, %v7840_v42 }
 0x13b   : > { %v932_v37 = vrot.slane %v823_v31, 4 }
 0x13c   : > { %v686_v23 = vpop.f32.mrf.mxu0 }
 0x13d   : > { %v687_v32 = vadd.f32 %v7811_v29, %v686_v23  ;;  %v996_v51 = vmax.f32 %v823_v31, %v932_v37 }
 0x13f   : > { %v741_v38 = vmax.f32 %v687_v32, 0.0 }
 0x140   : > { %v1082_v25 = vld.sshfl [vmem:[#allocation1 + $0x30] sm:$0xff pattern:$0x75316420] }
 0x141   : > { %1107 = vst [vmem:[#allocation2 + $0x41] sm:$0xff] %v1082_v25  ;;  %v1154_v28 = vpack.c.bf16 %v1082_v25, %v1082_v25  ;;  %v827_v52 = vperm.slane %v741_v38, %v7840_v42 }
 0x143   : > { %v7962_v30 = vunpack.c.l.b16 %v1154_v28  ;;  %v933_v61 = vrot.slane %v827_v52, 4 }
 0x144   : > { %v689_v33 = vpop.f32.mrf.mxu0 }
 0x145   : > { %v690_v34 = vadd.f32 %v7811_v29, %v689_v33  ;;  %v1257_v35 = vpack.c.b16 %v7962_v30, %v7933_v48  ;;  %v997_v4 = vmax.f32 %v827_v52, %v933_v61  ;;  %v7197_v48 = vld [vmem:[%s9515_s3 + $0x190] sm:$0xff] }
 0x147   : > { %v742_v36 = vmax.f32 %v690_v34, 0.0  ;;  %v7996_v34 = vld [vmem:[%s9516_s4] ss:$0 sm:$0xff] }
 0x148   : > { %v1116_v39 = vld [vmem:[#allocation2 + $0x40] sm:$0xff] }
 0x149   : > { %v1136_v40 = vld [vmem:[#allocation2 + $0x42] sm:$0xff]  ;;  %v831_v44 = vperm.slane %v742_v36, %v7840_v42  ;;  %v1146_v45 = vpack.c.bf16 %v1116_v39, %v1116_v39 }
 0x14a   : > { %v1162_v46 = vpack.c.bf16 %v1136_v40, %v1136_v40 }
 0x14b   : > { %v934_v47 = vrot.slane %v831_v44, 4  ;;  %v7970_v49 = vunpack.c.l.b16 %v1146_v45 }
 0x14c   : > { %v7972_v50 = vunpack.c.l.b16 %v1162_v46  ;;  %v691_v54 = vpop.f32.mrf.mxu0 }
 0x14d   : > { %v998_v55 = vmax.f32 %v831_v44, %v934_v47  ;;  %v692_v56 = vadd.f32 %v7811_v29, %v691_v54  ;;  %v1247_v57 = vpack.c.b16 %v7970_v49, %v7944_v63  ;;  %v7213_v63 = vld [vmem:[%s9515_s3 + $0x210] sm:$0xff] }
 0x14e   : > { %v1267_v58 = vpack.c.b16 %v7972_v50, %v7946_v0  ;;  %v7203_v0 = vld [vmem:[%s9515_s3 + $0x1c0] sm:$0xff] }
 0x14f   : > { %v1020_v59 = vmax.f32 %v996_v51, %v998_v55  ;;  %v743_v60 = vmax.f32 %v692_v56, 0.0 }
 0x151   : > { %1083 = vst [vmem:[#allocation1] ss:$2 sm:$0xff] %v1020_v59  ;;  %v835_v62 = vperm.slane %v743_v60, %v7840_v42 }
 0x153   : > { %v935_v1 = vrot.slane %v835_v62, 4 }
 0x154   : > { %v694_v2 = vpop.f32.mrf.mxu0 }
 0x155   : > { %v999_v5 = vmax.f32 %v835_v62, %v935_v1  ;;  %v695_v10 = vadd.f32 %v7811_v29, %v694_v2 }
 0x157   : > { %v1021_v6 = vmax.f32 %v997_v4, %v999_v5  ;;  %v744_v13 = vmax.f32 %v695_v10, 0.0  ;;  %v7186_v4 = vld [vmem:[%s9515_s3 + $0x138] sm:$0xff] }
 0x158   : > { %1982 = vmatpush.bf16.msrb.mxu2 %v7186_v4 }
 0x159   : > { %1084 = vst [vmem:[#allocation1 + $0x1] ss:$2 sm:$0xff] %v1021_v6  ;;  %v839_v16 = vperm.slane %v744_v13, %v7840_v42 }
 0x15b   : > { %v936_v25 = vrot.slane %v839_v16, 4 }
 0x15c   : > { %v696_v11 = vpop.f32.mrf.mxu0 }
 0x15d   : > { %v697_v17 = vadd.f32 %v7811_v29, %v696_v11  ;;  %v1000_v44 = vmax.f32 %v839_v16, %v936_v25  ;;  %v7194_v16 = vld [vmem:[%s9515_s3 + $0x178] sm:$0xff]  ;;  %v7193_v25 = vld [vmem:[%s9515_s3 + $0x170] sm:$0xff] }
 0x15e   : > { %2011 = vmatpush.bf16.msrb.mxu3 %v7194_v16  ;;  %v7190_v16 = vld [vmem:[%s9515_s3 + $0x158] sm:$0xff] }
 0x15f   : > { %v745_v28 = vmax.f32 %v697_v17, 0.0  ;;  %v7178_v17 = vld [vmem:[%s9515_s3 + $0xf8] sm:$0xff] }
 0x160   : > { %v1085_v12 = vld.sshfl [vmem:[#allocation1] sm:$0xff pattern:$0x75316420]  ;;  %1953 = vmatpush.bf16.msrb.mxu1 %v7178_v17  ;;  %v7174_v17 = vld [vmem:[%s9515_s3 + $0xd8] sm:$0xff] }
 0x161   : > { %1108 = vst [vmem:[#allocation2 + $0x51] sm:$0xff] %v1085_v12  ;;  %v1155_v14 = vpack.c.bf16 %v1085_v12, %v1085_v12  ;;  %v843_v45 = vperm.slane %v745_v28, %v7840_v42  ;;  %v7177_v28 = vld [vmem:[%s9515_s3 + $0xf0] sm:$0xff] }
 0x162   : > { %2012 = vmatpush.bf16.msrb.mxu3 %v7193_v25 }
 0x163   : > { %v7982_v15 = vunpack.c.l.b16 %v1155_v14  ;;  %v937_v1 = vrot.slane %v843_v45, 4 }
 0x164   : > { %v699_v20 = vpop.f32.mrf.mxu0  ;;  %1954 = vmatpush.bf16.msrb.mxu1 %v7177_v28  ;;  %v7173_v28 = vld [vmem:[%s9515_s3 + $0xd0] sm:$0xff] }
 0x165   : > { %v700_v22 = vadd.f32 %v7811_v29, %v699_v20  ;;  %v7989_v23 = vpack.c.b16 %v7982_v15, %v7962_v30  ;;  %v1001_v12 = vmax.f32 %v843_v45, %v937_v1  ;;  %v7185_v20 = vld [vmem:[%s9515_s3 + $0x130] sm:$0xff]  ;;  %v7175_v1 = vld [vmem:[%s9515_s3 + $0xe0] sm:$0xff] }
 0x166   : > { %1983 = vmatpush.bf16.msrb.mxu2 %v7185_v20  ;;  %v7180_v20 = vld [vmem:[%s9515_s3 + $0x108] sm:$0xff] }
 0x167   : > { %v746_v24 = vmax.f32 %v700_v22, 0.0  ;;  %1913 = vmatmul.bf16.gmra.mxu2 %v7989_v23 }
 0x168   : > { %v1117_v31 = vld [vmem:[#allocation2 + $0x50] sm:$0xff] }
 0x169   : > { %v1137_v32 = vld [vmem:[#allocation2 + $0x52] sm:$0xff]  ;;  %v847_v33 = vperm.slane %v746_v24, %v7840_v42  ;;  %v1147_v36 = vpack.c.bf16 %v1117_v31, %v1117_v31  ;;  %v7184_v31 = vld [vmem:[%s9515_s3 + $0x128] sm:$0xff] }
 0x16a   : > { %v1163_v37 = vpack.c.bf16 %v1137_v32, %v1137_v32  ;;  %v1904_v59 = vpop.f32.mrf.mxu2  ;;  %1984 = vmatpush.bf16.msrb.mxu2 %v7184_v31  ;;  %v7189_v31 = vld [vmem:[%s9515_s3 + $0x150] sm:$0xff] }
 0x16b   : > { %v938_v38 = vrot.slane %v847_v33, 4  ;;  %v7998_v39 = vunpack.c.l.b16 %v1147_v36  ;;  %v7183_v36 = vld [vmem:[%s9515_s3 + $0x120] sm:$0xff] }
 0x16c   : > { %v8000_v40 = vunpack.c.l.b16 %v1163_v37  ;;  %v701_v46 = vpop.f32.mrf.mxu0  ;;  %v1875_v47 = vpop.f32.mrf.mxu1 }
 0x16d   : > { %v1002_v51 = vmax.f32 %v847_v33, %v938_v38  ;;  %v702_v52 = vadd.f32 %v7811_v29, %v701_v46  ;;  %v1876_v54 = vadd.f32 %v7996_v34, %v1875_v47  ;;  %v8007_v55 = vpack.c.b16 %v7998_v39, %v7970_v49  ;;  %v7192_v46 = vld [vmem:[%s9515_s3 + $0x168] sm:$0xff] }
 0x16e   : > { %v8011_v56 = vpack.c.b16 %v8000_v40, %v7972_v50  ;;  %v7176_v47 = vld [vmem:[%s9515_s3 + $0xe8] sm:$0xff]  ;;  %1985 = vmatpush.bf16.msrb.mxu2 %v7183_v36  ;;  %2013 = vmatpush.bf16.msrb.mxu3 %v7192_v46  ;;  %v7195_v50 = vld [vmem:[%s9515_s3 + $0x180] sm:$0xff] }
 0x16f   : > { %v1022_v60 = vmax.f32 %v1000_v44, %v1002_v51  ;;  %v747_v61 = vmax.f32 %v702_v52, 0.0  ;;  %1884 = vmatmul.bf16.gmra.mxu1 %v8007_v55  ;;  %v1905_v62 = vadd.f32 %v1904_v59, %v1876_v54  ;;  %v7182_v52 = vld [vmem:[%s9515_s3 + $0x118] sm:$0xff]  ;;  %v7188_v46 = vld [vmem:[%s9515_s3 + $0x148] sm:$0xff] }
 0x170   : > { %1942 = vmatmul.bf16.gmra.mxu3 %v8011_v56  ;;  %1955 = vmatpush.bf16.msrb.mxu1 %v7176_v47  ;;  %v7212_v49 = vld [vmem:[%s9515_s3 + $0x208] sm:$0xff] }
 0x171   : > { %1086 = vst [vmem:[#allocation1 + $0x10] ss:$2 sm:$0xff] %v1022_v60  ;;  %v851_v2 = vperm.slane %v747_v61, %v7840_v42 }
 0x172   : > { %1986 = vmatpush.bf16.msrb.mxu2 %v7182_v52  ;;  %v7187_v52 = vld [vmem:[%s9515_s3 + $0x140] sm:$0xff] }
 0x173   : > { %v1933_v5 = vpop.f32.mrf.mxu3  ;;  %v939_v6 = vrot.slane %v851_v2, 4 }
 0x174   : > { %v8019_v10 = vadd.f32 %v1933_v5, %v1905_v62  ;;  %v704_v11 = vpop.f32.mrf.mxu0  ;;  %v7191_v62 = vld [vmem:[%s9515_s3 + $0x160] sm:$0xff]  ;;  %1956 = vmatpush.bf16.msrb.mxu1 %v7175_v1  ;;  %v7218_v1 = vld [vmem:[%s9515_s3 + $0x238] sm:$0xff] }
 0x175   : > { %v1003_v13 = vmax.f32 %v851_v2, %v939_v6  ;;  %v705_v22 = vadd.f32 %v7811_v29, %v704_v11  ;;  %v7181_v2 = vld [vmem:[%s9515_s3 + $0x110] sm:$0xff]  ;;  %2014 = vmatpush.bf16.msrb.mxu3 %v7191_v62  ;;  %v7210_v62 = vld [vmem:[%s9515_s3 + $0x1f8] sm:$0xff] }
 0x176   : > { %1987 = vmatpush.bf16.msrb.mxu2 %v7181_v2 }
 0x177   : > { %v1023_v14 = vmax.f32 %v1001_v12, %v1003_v13  ;;  %v748_v33 = vmax.f32 %v705_v22, 0.0 }
 0x178   : > { %1957 = vmatpush.bf16.msrb.mxu1 %v7174_v17 }
 0x179   : > { %1087 = vst [vmem:[#allocation1 + $0x11] ss:$2 sm:$0xff] %v1023_v14  ;;  %v855_v37 = vperm.slane %v748_v33, %v7840_v42  ;;  %2015 = vmatpush.bf16.msrb.mxu3 %v7190_v16  ;;  %v7179_v33 = vld [vmem:[%s9515_s3 + $0x100] sm:$0xff] }
 0x17a   : > { %1988 = vmatpush.bf16.msrb.mxu2 %v7180_v20  ;;  %v8123_v20 = vpop.f32.mrf.mxu2 }
 0x17b   : > { %v940_v54 = vrot.slane %v855_v37, 4 }
 0x17c   : > { %v706_v24 = vpop.f32.mrf.mxu0  ;;  %1958 = vmatpush.bf16.msrb.mxu1 %v7173_v28 }
 0x17d   : > { %v707_v44 = vadd.f32 %v7811_v29, %v706_v24  ;;  %v1004_v4 = vmax.f32 %v855_v37, %v940_v54  ;;  %2016 = vmatpush.bf16.msrb.mxu3 %v7189_v31 }
 0x17e   : > { %1989 = vmatpush.bf16.msrb.mxu2 %v7179_v33 }
 0x17f   : > { %v749_v59 = vmax.f32 %v707_v44, 0.0 }
 0x180   : > { %v8040_v32 = vld.sshfl [vmem:[#allocation1 + $0x10] sm:$0xff pattern:$0x75316420] }
 0x181   : > { %1109 = vst [vmem:[#allocation2 + $0x61] sm:$0xff] %v8040_v32  ;;  %v859_v6 = vperm.slane %v749_v59, %v7840_v42  ;;  %2017 = vmatpush.bf16.msrb.mxu3 %v7188_v46 }
 0x182   : > { %2069 = vmatpush.bf16.msra.mxu2 %v7210_v62 }
 0x183   : > { %v941_v22 = vrot.slane %v859_v6, 4 }
 0x184   : > { %v709_v38 = vpop.f32.mrf.mxu0 }
 0x185   : > { %v710_v45 = vadd.f32 %v7811_v29, %v709_v38  ;;  %v1005_v37 = vmax.f32 %v859_v6, %v941_v22  ;;  %2018 = vmatpush.bf16.msrb.mxu3 %v7187_v52 }
 0x187   : > { %v750_v51 = vmax.f32 %v710_v45, 0.0  ;;  %v7172_v45 = vld [vmem:[%s9515_s3 + $0xc8] sm:$0xff] }
 0x188   : > { %1959 = vmatpush.bf16.msrb.mxu1 %v7172_v45  ;;  %v1118_v6 = vld [vmem:[#allocation2 + $0x60] sm:$0xff]  ;;  %v8127_v45 = vpop.f32.mrf.mxu3 }
 0x189   : > { %v863_v60 = vperm.slane %v750_v51, %v7840_v42  ;;  %v7171_v51 = vld [vmem:[%s9515_s3 + $0xc0] sm:$0xff]  ;;  %2098 = vmatpush.bf16.msra.mxu3 %v7218_v1  ;;  %v1138_v17 = vld [vmem:[#allocation2 + $0x62] sm:$0xff] }
 0x18b   : > { %v942_v61 = vrot.slane %v863_v60, 4 }
 0x18c   : > { %v711_v5 = vpop.f32.mrf.mxu0  ;;  %1960 = vmatpush.bf16.msrb.mxu1 %v7171_v51 }
 0x18d   : > { %v1006_v11 = vmax.f32 %v863_v60, %v942_v61  ;;  %v712_v12 = vadd.f32 %v7811_v29, %v711_v5  ;;  %v1156_v60 = vpack.c.bf16 %v8040_v32, %v8040_v32 }
 0x18f   : > { %v1024_v13 = vmax.f32 %v1004_v4, %v1006_v11  ;;  %v751_v14 = vmax.f32 %v712_v12, 0.0  ;;  %v8112_v11 = vunpack.c.l.b16 %v1156_v60  ;;  %v8116_v12 = vpop.f32.mrf.mxu1 }
 0x191   : > { %1089 = vst [vmem:[#allocation1 + $0x20] ss:$2 sm:$0xff] %v1024_v13  ;;  %v867_v24 = vperm.slane %v751_v14, %v7840_v42  ;;  %v1258_v30 = vpack.c.b16 %v8112_v11, %v7982_v15 }
 0x193   : > { %v943_v25 = vrot.slane %v867_v24, 4 }
 0x194   : > { %v714_v36 = vpop.f32.mrf.mxu0 }
 0x195   : > { %v1007_v38 = vmax.f32 %v867_v24, %v943_v25  ;;  %v715_v47 = vadd.f32 %v7811_v29, %v714_v36  ;;  %v1148_v24 = vpack.c.bf16 %v1118_v6, %v1118_v6  ;;  %v1164_v36 = vpack.c.bf16 %v1138_v17, %v1138_v17 }
 0x197   : > { %v1025_v44 = vmax.f32 %v1005_v37, %v1007_v38  ;;  %v752_v59 = vmax.f32 %v715_v47, 0.0  ;;  %v8129_v47 = vunpack.c.l.b16 %v1148_v24  ;;  %v8136_v62 = vunpack.c.l.b16 %v1164_v36  ;;  %v7201_v36 = vld [vmem:[%s9515_s3 + $0x1b0] sm:$0xff] }
 0x199   : > { %1090 = vst [vmem:[#allocation1 + $0x21] ss:$2 sm:$0xff] %v1025_v44  ;;  %v871_v4 = vperm.slane %v752_v59, %v7840_v42 }
 0x19b   : > { %v944_v22 = vrot.slane %v871_v4, 4 }
 0x19c   : > { %v716_v54 = vpop.f32.mrf.mxu0 }
 0x19d   : > { %v717_v5 = vadd.f32 %v7811_v29, %v716_v54  ;;  %v1008_v46 = vmax.f32 %v871_v4, %v944_v22 }
 0x19f   : > { %v753_v25 = vmax.f32 %v717_v5, 0.0 }
 0x1a0   : > { %v1091_v61 = vld.sshfl [vmem:[#allocation1 + $0x20] sm:$0xff pattern:$0x75316420] }
 0x1a1   : > { %1110 = vst [vmem:[#allocation2 + $0x71] sm:$0xff] %v1091_v61  ;;  %v1157_v2 = vpack.c.bf16 %v1091_v61, %v1091_v61  ;;  %v875_v51 = vperm.slane %v753_v25, %v7840_v42  ;;  %v7209_v25 = vld [vmem:[%s9515_s3 + $0x1f0] sm:$0xff] }
 0x1a2   : > { %2070 = vmatpush.bf16.msra.mxu2 %v7209_v25 }
 0x1a3   : > { %v8114_v32 = vunpack.c.l.b16 %v1157_v2 }
 0x1a4   : > { %v719_v13 = vpop.f32.mrf.mxu0 }
 0x1a5   : > { %v720_v14 = vadd.f32 %v7811_v29, %v719_v13  ;;  %v8121_v16 = vpack.c.b16 %v8114_v32, %v8112_v11  ;;  %v1268_v11 = vpack.c.b16 %v8136_v62, %v8000_v40 }
 0x1a7   : > { %v754_v28 = vmax.f32 %v720_v14, 0.0  ;;  %1918 = vmatmul.bf16.gmra.mxu2 %v8121_v16  ;;  %v945_v14 = vrot.slane %v875_v51, 4 }
 0x1a8   : > { %v1119_v31 = vld [vmem:[#allocation2 + $0x70] sm:$0xff] }
 0x1a9   : > { %v1139_v33 = vld [vmem:[#allocation2 + $0x72] sm:$0xff]  ;;  %v879_v37 = vperm.slane %v754_v28, %v7840_v42  ;;  %v1149_v38 = vpack.c.bf16 %v1119_v31, %v1119_v31  ;;  %v7217_v28 = vld [vmem:[%s9515_s3 + $0x230] sm:$0xff] }
 0x1aa   : > { %v1165_v44 = vpack.c.bf16 %v1139_v33, %v1139_v33  ;;  %v1909_v13 = vpop.f32.mrf.mxu2  ;;  %2099 = vmatpush.bf16.msra.mxu3 %v7217_v28 }
 0x1ab   : > { %v946_v52 = vrot.slane %v879_v37, 4  ;;  %v8132_v54 = vunpack.c.l.b16 %v1149_v38  ;;  %v1009_v38 = vmax.f32 %v875_v51, %v945_v14  ;;  %v7200_v51 = vld [vmem:[%s9515_s3 + $0x1a8] sm:$0xff] }
 0x1ac   : > { %v8134_v59 = vunpack.c.l.b16 %v1165_v44  ;;  %v721_v60 = vpop.f32.mrf.mxu0  ;;  %v1880_v61 = vpop.f32.mrf.mxu1 }
 0x1ad   : > { %v1010_v1 = vmax.f32 %v879_v37, %v946_v52  ;;  %v722_v2 = vadd.f32 %v7811_v29, %v721_v60  ;;  %v1881_v5 = vadd.f32 %v7996_v34, %v1880_v61  ;;  %v8142_v4 = vpack.c.b16 %v8132_v54, %v8129_v47  ;;  %v7202_v29 = vld [vmem:[%s9515_s3 + $0x1b8] sm:$0xff]  ;;  %v7208_v37 = vld [vmem:[%s9515_s3 + $0x1e8] sm:$0xff] }
 0x1ae   : > { %v8146_v6 = vpack.c.b16 %v8134_v59, %v8136_v62  ;;  %2040 = vmatpush.bf16.msra.mxu1 %v7202_v29  ;;  %v7216_v52 = vld [vmem:[%s9515_s3 + $0x228] sm:$0xff]  ;;  %2071 = vmatpush.bf16.msra.mxu2 %v7208_v37 }
 0x1af   : > { %v1026_v17 = vmax.f32 %v1008_v46, %v1010_v1  ;;  %v755_v22 = vmax.f32 %v722_v2, 0.0  ;;  %1889 = vmatmul.bf16.gmra.mxu1 %v8142_v4  ;;  %v1910_v24 = vadd.f32 %v1909_v13, %v1881_v5  ;;  %2100 = vmatpush.bf16.msra.mxu3 %v7216_v52  ;;  %v7250_v1 = vld [vmem:[%s9517_s5 + $0xf8] sm:$0xff]  ;;  %v7249_v2 = vld [vmem:[%s9517_s5 + $0xf0] sm:$0xff] }
 0x1b0   : > { %1947 = vmatmul.bf16.gmra.mxu3 %v8146_v6  ;;  %2984 = vmatpush.bf16.msrb.mxu0 %v7250_v1 }
 0x1b1   : > { %1092 = vst [vmem:[#allocation1 + $0x30] ss:$2 sm:$0xff] %v1026_v17  ;;  %v883_v31 = vperm.slane %v755_v22, %v7840_v42 }
 0x1b2   : > { %2041 = vmatpush.bf16.msra.mxu1 %v7201_v36  ;;  %2072 = vmatpush.bf16.msra.mxu2 %v7207_v21 }
 0x1b3   : > { %v1938_v33 = vpop.f32.mrf.mxu3  ;;  %v947_v44 = vrot.slane %v883_v31, 4  ;;  %2101 = vmatpush.bf16.msra.mxu3 %v7215_v41 }
 0x1b4   : > { %v8166_v46 = vadd.f32 %v1938_v33, %v1910_v24  ;;  %2985 = vmatpush.bf16.msrb.mxu0 %v7249_v2  ;;  %v8249_v17 = vpop.f32.mrf.mxu1  ;;  %v7234_v2 = vld [vmem:[%s9517_s5 + $0x78] sm:$0xff] }
 0x1b5   : > { %v1011_v60 = vmax.f32 %v883_v31, %v947_v44  ;;  %v7248_v44 = vld [vmem:[%s9517_s5 + $0xe8] sm:$0xff] }
 0x1b6   : > { %2042 = vmatpush.bf16.msra.mxu1 %v7200_v51 }
 0x1b7   : > { %v1027_v61 = vmax.f32 %v1009_v38, %v1011_v60  ;;  %1990 = vmatmul.bf16.vlgmr.msrb.gmra.mxu2 %v1256_v8  ;;  %v7206_v8 = vld [vmem:[%s9515_s3 + $0x1d8] sm:$0xff]  ;;  %2102 = vmatpush.bf16.msra.mxu3 %v7214_v19 }
 0x1b8   : > { %2073 = vmatpush.bf16.msra.mxu2 %v7206_v8  ;;  %2986 = vmatpush.bf16.msrb.mxu0 %v7248_v44  ;;  %v7230_v44 = vld [vmem:[%s9517_s5 + $0x58] sm:$0xff] }
 0x1b9   : > { %1093 = vst [vmem:[#allocation1 + $0x31] ss:$2 sm:$0xff] %v1027_v61 }
 0x1ba   : > { %2043 = vmatpush.bf16.msra.mxu1 %v7199_v43 }
 0x1bb   : > { %2103 = vmatpush.bf16.msra.mxu3 %v7213_v63  ;;  %v8254_v29 = vpop.f32.mrf.mxu3 }
 0x1bc   : > { %2074 = vmatpush.bf16.msra.mxu2 %v7205_v18 }
 0x1bf   : > { %1961 = vmatmul.bf16.vlgmr.msrb.gmra.mxu1 %v1246_v26  ;;  %v7198_v26 = vld [vmem:[%s9515_s3 + $0x198] sm:$0xff]  ;;  %2104 = vmatpush.bf16.msra.mxu3 %v7212_v49 }
 0x1c0   : > { %2019 = vmatmul.bf16.vlgmr.msrb.gmra.mxu3 %v1266_v27  ;;  %v1094_v3 = vld.sshfl [vmem:[#allocation1 + $0x30] sm:$0xff pattern:$0x75316420]  ;;  %v7204_v27 = vld [vmem:[%s9515_s3 + $0x1c8] sm:$0xff]  ;;  %2044 = vmatpush.bf16.msra.mxu1 %v7198_v26 }
 0x1c1   : > { %1111 = vst [vmem:[#allocation2 + $0x81] sm:$0xff] %v1094_v3  ;;  %2075 = vmatpush.bf16.msra.mxu2 %v7204_v27  ;;  %v1167_v15 = vpack.c.bf16 %v1094_v3, %v1094_v3 }
 0x1c3   : > { %v1255_v5 = vunpack.c.l.b16 %v1167_v15 }
 0x1c4   : > { %2045 = vmatpush.bf16.msra.mxu1 %v7197_v48 }
 0x1c5   : > { %2076 = vmatpush.bf16.msra.mxu2 %v7203_v0  ;;  %v7246_v0 = vld [vmem:[%s9517_s5 + $0xd8] sm:$0xff] }
 0x1c7   : > { %1995 = vmatmul.bf16.gmra.mxu2 %v1257_v35  ;;  %v7196_v35 = vld [vmem:[%s9515_s3 + $0x188] sm:$0xff] }
 0x1c8   : > { %2046 = vmatpush.bf16.msra.mxu1 %v7196_v35  ;;  %v1120_v13 = vld [vmem:[#allocation2 + $0x80] sm:$0xff] }
 0x1c9   : > { %v1140_v14 = vld [vmem:[#allocation2 + $0x82] sm:$0xff]  ;;  %v1166_v22 = vpack.c.bf16 %v1120_v13, %v1120_v13  ;;  %2926 = vmatpush.bf16.msrb.mxu2 %v7234_v2 }
 0x1ca   : > { %v1168_v40 = vpack.c.bf16 %v1140_v14, %v1140_v14  ;;  %v7233_v13 = vld [vmem:[%s9517_s5 + $0x70] sm:$0xff] }
 0x1cb   : > { %v1245_v62 = vunpack.c.l.b16 %v1166_v22 }
 0x1cc   : > { %2047 = vmatpush.bf16.msra.mxu1 %v7195_v50  ;;  %v1265_v24 = vunpack.c.l.b16 %v1168_v40  ;;  %v7226_v50 = vld [vmem:[%s9517_s5 + $0x38] sm:$0xff] }
 0x1cd   : > { %v1249_v31 = vpack.c.b16 %v1245_v62, %v8132_v54  ;;  %v1131_v54 = vld [vmem:[#allocation2 + $0x91] sm:$0xff]  ;;  %2927 = vmatpush.bf16.msrb.mxu2 %v7233_v13  ;;  %v1878_v13 = vadd.f32 %v7996_v34, %v8116_v12 }
 0x1ce   : > { %v1269_v33 = vpack.c.b16 %v1265_v24, %v8134_v59  ;;  %v1170_v59 = vpack.c.bf16 %v1131_v54, %v1131_v54  ;;  %v7242_v40 = vld [vmem:[%s9517_s5 + $0xb8] sm:$0xff] }
 0x1cf   : > { %1966 = vmatmul.bf16.gmra.mxu1 %v1247_v57  ;;  %v7211_v57 = vld [vmem:[%s9515_s3 + $0x200] sm:$0xff] }
 0x1d0   : > { %2024 = vmatmul.bf16.gmra.mxu3 %v1267_v58  ;;  %v1248_v58 = vpack.c.b16 %v8129_v47, %v7998_v39  ;;  %v1259_v39 = vpack.c.b16 %v1255_v5, %v8114_v32  ;;  %v8252_v47 = vpop.f32.mrf.mxu2  ;;  %2897 = vmatpush.bf16.msrb.mxu1 %v7226_v50  ;;  %v7235_v50 = vld [vmem:[%s9517_s5 + $0x80] sm:$0xff] }
 0x1d1   : > { %2105 = vmatpush.bf16.msra.mxu3 %v7211_v57 }
 0x1d5   : > { %2955 = vmatpush.bf16.msrb.mxu3 %v7242_v40  ;;  %v7244_v40 = vld [vmem:[%s9517_s5 + $0xc8] sm:$0xff] }
 0x1d7   : > { %2000 = vmatmul.bf16.gmra.mxu2 %v1258_v30 }
 0x1df   : > { %1971 = vmatmul.bf16.gmra.mxu1 %v1248_v58 }
 0x1e0   : > { %2029 = vmatmul.bf16.gmra.mxu3 %v1268_v11  ;;  %v7225_v11 = vld [vmem:[%s9517_s5 + $0x30] sm:$0xff] }
 0x1e1   : > { %2898 = vmatpush.bf16.msrb.mxu1 %v7225_v11 }
 0x1e7   : > { %2005 = vmatmul.bf16.gmra.mxu2 %v1259_v39  ;;  %v7224_v39 = vld [vmem:[%s9517_s5 + $0x28] sm:$0xff] }
 0x1e8   : > { %2899 = vmatpush.bf16.msrb.mxu1 %v7224_v39 }
 0x1ea   : > { %v1914_v36 = vpop.f32.mrf.mxu2 }
 0x1ec   : > { %v1885_v25 = vpop.f32.mrf.mxu1 }
 0x1ed   : > { %v1886_v28 = vadd.f32 %v7996_v34, %v1885_v25  ;;  %v7241_v25 = vld [vmem:[%s9517_s5 + $0xb0] sm:$0xff] }
 0x1ee   : > { %2956 = vmatpush.bf16.msrb.mxu3 %v7241_v25 }
 0x1ef   : > { %1976 = vmatmul.bf16.gmra.mxu1 %v1249_v31  ;;  %v1915_v37 = vadd.f32 %v1914_v36, %v1886_v28  ;;  %v7231_v28 = vld [vmem:[%s9517_s5 + $0x60] sm:$0xff] }
 0x1f0   : > { %2034 = vmatmul.bf16.gmra.mxu3 %v1269_v33  ;;  %v7223_v36 = vld [vmem:[%s9517_s5 + $0x20] sm:$0xff] }
 0x1f1   : > { %2900 = vmatpush.bf16.msrb.mxu1 %v7223_v36  ;;  %v7243_v36 = vld [vmem:[%s9517_s5 + $0xc0] sm:$0xff] }
 0x1f3   : > { %v1943_v32 = vpop.f32.mrf.mxu3 }
 0x1f4   : > { %v8259_v38 = vadd.f32 %v1943_v32, %v1915_v37  ;;  %v7240_v37 = vld [vmem:[%s9517_s5 + $0xa8] sm:$0xff]  ;;  %v7245_v32 = vld [vmem:[%s9517_s5 + $0xd0] sm:$0xff] }
 0x1f5   : > { %2957 = vmatpush.bf16.msrb.mxu3 %v7240_v37 }
 0x1f7   : > { %2077 = vmatmul.bf16.vlgmr.msra.gmra.mxu2 %v7940_v53  ;;  %v7247_v53 = vld [vmem:[%s9517_s5 + $0xe0] sm:$0xff] }
 0x1f8   : > { %2987 = vmatpush.bf16.msrb.mxu0 %v7247_v53  ;;  %v7229_v53 = vld [vmem:[%s9517_s5 + $0x50] sm:$0xff] }
 0x1fb   : > { %v8282_v21 = vpop.f32.mrf.mxu3 }
 0x1fc   : > { %2988 = vmatpush.bf16.msrb.mxu0 %v7246_v0  ;;  %v7219_v0 = vld [vmem:[%s9517_s5] sm:$0xff] }
 0x1ff   : > { %2048 = vmatmul.bf16.vlgmr.msra.gmra.mxu1 %v7952_v7  ;;  %v1279_v7 = vunpack.c.l.b16 %v1170_v59  ;;  %v7239_v59 = vld [vmem:[%s9517_s5 + $0xa0] sm:$0xff] }
 0x200   : > { %2106 = vmatmul.bf16.vlgmr.msra.gmra.mxu3 %v7956_v9  ;;  %v8276_v9 = vpop.f32.mrf.mxu2  ;;  %2989 = vmatpush.bf16.msrb.mxu0 %v7245_v32 }
 0x201   : > { %2958 = vmatpush.bf16.msrb.mxu3 %v7239_v59  ;;  %v2153_v59 = vld [vmem:[#allocation2 + $0x1] sm:$0xff] }
 0x204   : > { %2990 = vmatpush.bf16.msrb.mxu0 %v7244_v40 }
 0x207   : > { %2082 = vmatmul.bf16.gmra.mxu2 %v7989_v23  ;;  %v1141_v23 = vld [vmem:[#allocation2 + $0x92] sm:$0xff] }
 0x208   : > { %v1171_v60 = vpack.c.bf16 %v1141_v23, %v1141_v23  ;;  %2991 = vmatpush.bf16.msrb.mxu0 %v7243_v36 }
 0x20a   : > { %v1283_v51 = vunpack.c.l.b16 %v1171_v60 }
 0x20c   : > { %v1284_v43 = vpack.c.b16 %v1283_v51, %v1265_v24  ;;  %v7221_v51 = vld [vmem:[%s9517_s5 + $0x10] sm:$0xff] }
 0x20f   : > { %2053 = vmatmul.bf16.gmra.mxu1 %v8007_v55  ;;  %v8278_v55 = vpop.f32.mrf.mxu1 }
 0x210   : > { %2111 = vmatmul.bf16.gmra.mxu3 %v8011_v56  ;;  %v7548_v56 = vld [vmem:[#allocation2] sm:$0xff] }
 0x211   : > { %v1169_v52 = vpack.c.bf16 %v7548_v56, %v7548_v56  ;;  %v7222_v56 = vld [vmem:[%s9517_s5 + $0x18] sm:$0xff] }
 0x212   : > { %2901 = vmatpush.bf16.msrb.mxu1 %v7222_v56 }
 0x213   : > { %v8280_v61 = vunpack.c.l.b16 %v1169_v52  ;;  %v7238_v52 = vld [vmem:[%s9517_s5 + $0x98] sm:$0xff] }
 0x214   : > { %2959 = vmatpush.bf16.msrb.mxu3 %v7238_v52 }
 0x215   : > { %v1276_v41 = vpack.c.b16 %v8280_v61, %v1245_v62  ;;  %v7232_v62 = vld [vmem:[%s9517_s5 + $0x68] sm:$0xff] }
 0x216   : > { %2928 = vmatpush.bf16.msrb.mxu2 %v7232_v62  ;;  %2902 = vmatpush.bf16.msrb.mxu1 %v7221_v51  ;;  %v1907_v62 = vadd.f32 %v8123_v20, %v1878_v13 }
 0x217   : > { %2087 = vmatmul.bf16.gmra.mxu2 %v8121_v16  ;;  %v1280_v16 = vpack.c.b16 %v1279_v7, %v1255_v5 }
 0x218   : > { %v1936_v12 = vadd.f32 %v8127_v45, %v1907_v62  ;;  %v1883_v45 = vadd.f32 %v7996_v34, %v8249_v17 }
 0x21a   : > { %2929 = vmatpush.bf16.msrb.mxu2 %v7231_v28 }
 0x21e   : > { %2930 = vmatpush.bf16.msrb.mxu2 %v7230_v44 }
 0x21f   : > { %2058 = vmatmul.bf16.gmra.mxu1 %v8142_v4 }
 0x220   : > { %2116 = vmatmul.bf16.gmra.mxu3 %v8146_v6 }
 0x222   : > { %2931 = vmatpush.bf16.msrb.mxu2 %v7229_v53 }
 0x227   : > { %2092 = vmatmul.bf16.gmra.mxu2 %v1280_v16  ;;  %v7228_v16 = vld [vmem:[%s9517_s5 + $0x48] sm:$0xff] }
 0x228   : > { %2932 = vmatpush.bf16.msrb.mxu2 %v7228_v16 }
 0x22a   : > { %v1919_v1 = vpop.f32.mrf.mxu2 }
 0x22c   : > { %v1890_v4 = vpop.f32.mrf.mxu1 }
 0x22d   : > { %v1891_v6 = vadd.f32 %v7996_v34, %v1890_v4  ;;  %v7227_v4 = vld [vmem:[%s9517_s5 + $0x40] sm:$0xff] }
 0x22e   : > { %2933 = vmatpush.bf16.msrb.mxu2 %v7227_v4 }
 0x22f   : > { %2063 = vmatmul.bf16.gmra.mxu1 %v1276_v41  ;;  %v1920_v3 = vadd.f32 %v1919_v1, %v1891_v6  ;;  %v7237_v1 = vld [vmem:[%s9517_s5 + $0x90] sm:$0xff] }
 0x230   : > { %2121 = vmatmul.bf16.gmra.mxu3 %v1284_v43  ;;  %v7220_v43 = vld [vmem:[%s9517_s5 + $0x8] sm:$0xff] }
 0x231   : > { %2960 = vmatpush.bf16.msrb.mxu3 %v7237_v1  ;;  %2903 = vmatpush.bf16.msrb.mxu1 %v7220_v43  ;;  %v2181_v1 = vpack.c.bf16 %v2153_v59, %v2153_v59  ;;  %v7257_v59 = vld [vmem:[%s9517_s5 + $0x130] sm:$0xff] }
 0x232   : > { %v8286_v8 = vpop.f32.mrf.mxu2 }
 0x233   : > { %v1948_v18 = vpop.f32.mrf.mxu3 }
 0x234   : > { %v8288_v19 = vadd.f32 %v1948_v18, %v1920_v3  ;;  %v8290_v26 = vpop.f32.mrf.mxu1  ;;  %v7236_v3 = vld [vmem:[%s9517_s5 + $0x88] sm:$0xff] }
 0x235   : > { %2961 = vmatpush.bf16.msrb.mxu3 %v7236_v3  ;;  %2904 = vmatpush.bf16.msrb.mxu1 %v7219_v0  ;;  %v2235_v3 = vunpack.c.l.b16 %v2181_v1  ;;  %v2163_v0 = vld [vmem:[#allocation2 + $0x2] sm:$0xff] }
 0x236   : > { %v2189_v36 = vpack.c.bf16 %v2163_v0, %v2163_v0 }
 0x239   : > { %2962 = vmatpush.bf16.msrb.mxu3 %v7235_v50 }
 0x23a   : > { %v8292_v27 = vpop.f32.mrf.mxu2 }
 0x23b   : > { %v8294_v48 = vpop.f32.mrf.mxu3 }
 0x23c   : > { %v8296_v63 = vpop.f32.mrf.mxu1 }
 0x23d   : > { %v1963_v39 = vadd.f32 %v8296_v63, %v8019_v10 }
 0x23f   : > { %v1992_v25 = vadd.f32 %v8292_v27, %v1963_v39 }
 0x242   : > { %v8301_v30 = vpop.f32.mrf.mxu2 }
 0x243   : > { %v8303_v35 = vpop.f32.mrf.mxu3 }
 0x244   : > { %v8305_v49 = vpop.f32.mrf.mxu1  ;;  %v2021_v10 = vadd.f32 %v8303_v35, %v1992_v25 }
 0x245   : > { %v1965_v32 = vadd.f32 %v8305_v49, %v1936_v12 }
 0x247   : > { %v1994_v20 = vadd.f32 %v8301_v30, %v1965_v32  ;;  %v7258_v30 = vld [vmem:[%s9517_s5 + $0x138] sm:$0xff] }
 0x248   : > { %3013 = vmatpush.bf16.msra.mxu1 %v7258_v30 }
 0x24a   : > { %v8310_v57 = vpop.f32.mrf.mxu2 }
 0x24b   : > { %v8312_v58 = vpop.f32.mrf.mxu3 }
 0x24c   : > { %v8314_v15 = vpop.f32.mrf.mxu1  ;;  %v2023_v52 = vadd.f32 %v8312_v58, %v1994_v20  ;;  %v1912_v58 = vadd.f32 %v8252_v47, %v1883_v45  ;;  %3014 = vmatpush.bf16.msra.mxu1 %v7257_v59 }
 0x24d   : > { %v1968_v35 = vadd.f32 %v8314_v15, %v8166_v46 }
 0x24e   : > { %v1941_v46 = vadd.f32 %v8254_v29, %v1912_v58  ;;  %v7264_v58 = vld [vmem:[%s9517_s5 + $0x168] sm:$0xff] }
 0x24f   : > { %v1997_v50 = vadd.f32 %v8310_v57, %v1968_v35  ;;  %v7266_v57 = vld [vmem:[%s9517_s5 + $0x178] sm:$0xff] }
 0x250   : > { %3042 = vmatpush.bf16.msra.mxu2 %v7266_v57 }
 0x252   : > { %v8322_v5 = vpop.f32.mrf.mxu2 }
 0x253   : > { %v8327_v14 = vpop.f32.mrf.mxu3 }
 0x254   : > { %v8329_v22 = vpop.f32.mrf.mxu1  ;;  %v2026_v40 = vadd.f32 %v8327_v14, %v1997_v50  ;;  %v2259_v14 = vunpack.c.l.b16 %v2189_v36 }
 0x255   : > { %v1970_v47 = vadd.f32 %v8329_v22, %v1941_v46 }
 0x257   : > { %v1999_v22 = vadd.f32 %v8322_v5, %v1970_v47  ;;  %v1888_v5 = vadd.f32 %v7996_v34, %v8278_v55 }
 0x259   : > { %v1917_v55 = vadd.f32 %v8276_v9, %v1888_v5 }
 0x25a   : > { %v8340_v24 = vpop.f32.mrf.mxu2 }
 0x25b   : > { %v8348_v31 = vpop.f32.mrf.mxu3 }
 0x25c   : > { %v8350_v33 = vpop.f32.mrf.mxu1 }
 0x262   : > { %v8364_v54 = vpop.f32.mrf.mxu2 }
 0x263   : > { %v8372_v7 = vpop.f32.mrf.mxu3 }
 0x264   : > { %v8374_v23 = vpop.f32.mrf.mxu1 }
 0x26a   : > { %v8385_v60 = vpop.f32.mrf.mxu2 }
 0x26b   : > { %v8396_v6 = vpop.f32.mrf.mxu3 }
 0x26c   : > { %v8398_v41 = vpop.f32.mrf.mxu1 }
 0x272   : > { %v8406_v18 = vpop.f32.mrf.mxu2 }
 0x273   : > { %v8414_v11 = vpop.f32.mrf.mxu3 }
 0x274   : > { %v8416_v2 = vpop.f32.mrf.mxu1 }
 0x27a   : > { %v2078_v28 = vpop.f32.mrf.mxu2 }
 0x27b   : > { %v8430_v37 = vpop.f32.mrf.mxu3 }
 0x27c   : > { %v2049_v63 = vpop.f32.mrf.mxu1 }
 0x27d   : > { %v2050_v44 = vadd.f32 %v2049_v63, %v2021_v10 }
 0x27f   : > { %v2079_v27 = vadd.f32 %v2078_v28, %v2050_v44 }
 0x282   : > { %v2080_v53 = vpop.f32.mrf.mxu2 }
 0x283   : > { %v2107_v56 = vpop.f32.mrf.mxu3 }
 0x284   : > { %v2108_v16 = vadd.f32 %v2107_v56, %v2079_v27  ;;  %v2051_v51 = vpop.f32.mrf.mxu1 }
 0x285   : > { %v2052_v49 = vadd.f32 %v2051_v51, %v2023_v52  ;;  %v7265_v52 = vld [vmem:[%s9517_s5 + $0x170] sm:$0xff]  ;;  %v2028_v51 = vadd.f32 %v8348_v31, %v1999_v22  ;;  %v7274_v31 = vld [vmem:[%s9517_s5 + $0x1b8] sm:$0xff] }
 0x286   : > { %v2127_v4 = vmax.f32 %v2108_v16, 0.0  ;;  %3043 = vmatpush.bf16.msra.mxu2 %v7265_v52  ;;  %3071 = vmatpush.bf16.msra.mxu3 %v7274_v31 }
 0x287   : > { %v2081_v13 = vadd.f32 %v2080_v53, %v2052_v49  ;;  %v1973_v49 = vadd.f32 %v8350_v33, %v8259_v38  ;;  %v7256_v38 = vld [vmem:[%s9517_s5 + $0x128] sm:$0xff] }
 0x288   : > { %2135 = vst [vmem:[#allocation2 + $0x11] sm:$0xff] %v2127_v4  ;;  %v2182_v43 = vpack.c.bf16 %v2127_v4, %v2127_v4  ;;  %3015 = vmatpush.bf16.msra.mxu1 %v7256_v38 }
 0x289   : > { %v2002_v33 = vadd.f32 %v8340_v24, %v1973_v49 }
 0x28a   : > { %v2083_v39 = vpop.f32.mrf.mxu2  ;;  %v8446_v17 = vunpack.c.l.b16 %v2182_v43  ;;  %3044 = vmatpush.bf16.msra.mxu2 %v7264_v58  ;;  %v7549_v58 = vld [vmem:[%s9516_s4] ss:$0 sm:$0xff] }
 0x28b   : > { %v2109_v15 = vpop.f32.mrf.mxu3  ;;  %v2031_v36 = vadd.f32 %v8372_v7, %v2002_v33  ;;  %v7272_v7 = vld [vmem:[%s9517_s5 + $0x1a8] sm:$0xff]  ;;  %v7270_v33 = vld [vmem:[%s9517_s5 + $0x198] sm:$0xff] }
 0x28c   : > { %v2110_v62 = vadd.f32 %v2109_v15, %v2081_v13  ;;  %v2054_v25 = vpop.f32.mrf.mxu1  ;;  %v2243_v28 = vpack.c.b16 %v8446_v17, %v2235_v3 }
 0x28d   : > { %v2055_v10 = vadd.f32 %v2054_v25, %v2026_v40  ;;  %v7273_v40 = vld [vmem:[%s9517_s5 + $0x1b0] sm:$0xff]  ;;  %v1946_v25 = vadd.f32 %v8282_v21, %v1917_v55 }
 0x28e   : > { %v2128_v12 = vmax.f32 %v2110_v62, 0.0  ;;  %2934 = vmatmul.bf16.vlgmr.msrb.gmra.mxu2 %v2243_v28  ;;  %v7263_v62 = vld [vmem:[%s9517_s5 + $0x160] sm:$0xff]  ;;  %3072 = vmatpush.bf16.msra.mxu3 %v7273_v40  ;;  %v7269_v40 = vld [vmem:[%s9517_s5 + $0x190] sm:$0xff] }
 0x28f   : > { %v2144_v63 = vld [vmem:[#allocation2 + $0x10] sm:$0xff]  ;;  %v2084_v20 = vadd.f32 %v2083_v39, %v2055_v10  ;;  %3045 = vmatpush.bf16.msra.mxu2 %v7263_v62  ;;  %v7279_v62 = vld [vmem:[%s9517_s5 + $0x1e0] sm:$0xff] }
 0x290   : > { %v2164_v32 = vld [vmem:[#allocation2 + $0x12] sm:$0xff]  ;;  %2136 = vst [vmem:[#allocation2 + $0x21] sm:$0xff] %v2128_v12  ;;  %v2174_v29 = vpack.c.bf16 %v2144_v63, %v2144_v63  ;;  %v2183_v30 = vpack.c.bf16 %v2128_v12, %v2128_v12  ;;  %v1975_v63 = vadd.f32 %v8374_v23, %v1946_v25  ;;  %v7260_v25 = vld [vmem:[%s9517_s5 + $0x148] sm:$0xff] }
 0x291   : > { %v2190_v44 = vpack.c.bf16 %v2164_v32, %v2164_v32 }
 0x292   : > { %v2212_v27 = vunpack.c.l.b16 %v2174_v29  ;;  %v2085_v56 = vpop.f32.mrf.mxu2  ;;  %v8482_v46 = vunpack.c.l.b16 %v2183_v30  ;;  %3073 = vmatpush.bf16.msra.mxu3 %v7272_v7  ;;  %v2004_v52 = vadd.f32 %v8364_v54, %v1975_v63  ;;  %v7254_v54 = vld [vmem:[%s9517_s5 + $0x118] sm:$0xff] }
 0x293   : > { %v8459_v53 = vunpack.c.l.b16 %v2190_v44  ;;  %v2112_v16 = vpop.f32.mrf.mxu3  ;;  %v7282_v44 = vld [vmem:[%s9517_s5 + $0x1f8] sm:$0xff] }
 0x294   : > { %v2113_v1 = vadd.f32 %v2112_v16, %v2084_v20  ;;  %v2056_v45 = vpop.f32.mrf.mxu1  ;;  %v2219_v35 = vpack.c.b16 %v2212_v27, %v8280_v61  ;;  %3100 = vmatpush.bf16.msra.mxu0 %v7282_v44  ;;  %v7281_v16 = vld [vmem:[%s9517_s5 + $0x1f0] sm:$0xff]  ;;  %v2033_v5 = vadd.f32 %v8396_v6, %v2004_v52  ;;  %v1893_v6 = vadd.f32 %v7549_v58, %v8290_v26  ;;  %v7280_v26 = vld [vmem:[%s9517_s5 + $0x1e8] sm:$0xff] }
 0x295   : > { %v2267_v4 = vpack.c.b16 %v8459_v53, %v2259_v14  ;;  %v2057_v3 = vadd.f32 %v2056_v45, %v2028_v51  ;;  %v7262_v14 = vld [vmem:[%s9517_s5 + $0x158] sm:$0xff] }
 0x296   : > { %v2129_v43 = vmax.f32 %v2113_v1, 0.0  ;;  %2905 = vmatmul.bf16.vlgmr.msrb.gmra.mxu1 %v2219_v35  ;;  %3046 = vmatpush.bf16.msra.mxu2 %v7262_v14 }
 0x297   : > { %2963 = vmatmul.bf16.vlgmr.msrb.gmra.mxu3 %v2267_v4  ;;  %v2145_v0 = vld [vmem:[#allocation2 + $0x20] sm:$0xff]  ;;  %v2086_v13 = vadd.f32 %v2085_v56, %v2057_v3  ;;  %v7271_v56 = vld [vmem:[%s9517_s5 + $0x1a0] sm:$0xff]  ;;  %v7261_v4 = vld [vmem:[%s9517_s5 + $0x150] sm:$0xff] }
 0x298   : > { %2137 = vst [vmem:[#allocation2 + $0x31] sm:$0xff] %v2129_v43  ;;  %v2175_v50 = vpack.c.bf16 %v2145_v0, %v2145_v0  ;;  %v2184_v34 = vpack.c.bf16 %v2129_v43, %v2129_v43  ;;  %v2165_v24 = vld [vmem:[#allocation2 + $0x22] sm:$0xff]  ;;  %3074 = vmatpush.bf16.msra.mxu3 %v7271_v56  ;;  %3101 = vmatpush.bf16.msra.mxu0 %v7281_v16 }
 0x299   : > { %v2191_v21 = vpack.c.bf16 %v2165_v24, %v2165_v24  ;;  %v1978_v0 = vadd.f32 %v8398_v41, %v8288_v19  ;;  %v7253_v19 = vld [vmem:[%s9517_s5 + $0x110] sm:$0xff] }
 0x29a   : > { %v2213_v39 = vunpack.c.l.b16 %v2175_v50  ;;  %v8484_v15 = vunpack.c.l.b16 %v2184_v34  ;;  %v2088_v28 = vpop.f32.mrf.mxu2  ;;  %3047 = vmatpush.bf16.msra.mxu2 %v7261_v4 }
 0x29b   : > { %v2114_v9 = vpop.f32.mrf.mxu3  ;;  %v8519_v45 = vunpack.c.l.b16 %v2191_v21 }
 0x29c   : > { %v2115_v47 = vadd.f32 %v2114_v9, %v2086_v13  ;;  %v2059_v12 = vpop.f32.mrf.mxu1  ;;  %v2277_v10 = vpack.c.b16 %v2213_v39, %v2212_v27  ;;  %v8496_v57 = vpack.c.b16 %v8484_v15, %v8482_v46  ;;  %v7255_v27 = vld [vmem:[%s9517_s5 + $0x120] sm:$0xff]  ;;  %3075 = vmatpush.bf16.msra.mxu3 %v7270_v33  ;;  %3102 = vmatpush.bf16.msra.mxu0 %v7280_v26 }
 0x29d   : > { %v2060_v29 = vadd.f32 %v2059_v12, %v2031_v36  ;;  %3016 = vmatpush.bf16.msra.mxu1 %v7255_v27  ;;  %v1922_v9 = vadd.f32 %v8286_v8, %v1893_v6  ;;  %v7259_v8 = vld [vmem:[%s9517_s5 + $0x140] sm:$0xff] }
 0x29e   : > { %v2130_v32 = vmax.f32 %v2115_v47, 0.0  ;;  %2992 = vmatmul.bf16.vlgmr.msrb.gmra.mxu0 %v2277_v10  ;;  %2939 = vmatmul.bf16.gmra.mxu2 %v8496_v57 }
 0x29f   : > { %v2146_v23 = vld [vmem:[#allocation2 + $0x30] sm:$0xff]  ;;  %v2089_v51 = vadd.f32 %v2088_v28, %v2060_v29  ;;  %v2007_v28 = vadd.f32 %v8385_v60, %v1978_v0  ;;  %3048 = vmatpush.bf16.msra.mxu2 %v7260_v25  ;;  %v1951_v10 = vadd.f32 %v8294_v48, %v1922_v9 }
 0x2a0   : > { %v2166_v59 = vld [vmem:[#allocation2 + $0x32] sm:$0xff]  ;;  %2138 = vst [vmem:[#allocation2 + $0x41] sm:$0xff] %v2130_v32  ;;  %v2176_v22 = vpack.c.bf16 %v2146_v23, %v2146_v23  ;;  %v2185_v55 = vpack.c.bf16 %v2130_v32, %v2130_v32  ;;  %3076 = vmatpush.bf16.msra.mxu3 %v7269_v40  ;;  %3103 = vmatpush.bf16.msra.mxu0 %v7279_v62 }
 0x2a1   : > { %v2192_v20 = vpack.c.bf16 %v2166_v59, %v2166_v59  ;;  %3017 = vmatpush.bf16.msra.mxu1 %v7254_v54  ;;  %v2036_v63 = vadd.f32 %v8414_v11, %v2007_v28  ;;  %v1980_v48 = vadd.f32 %v8416_v2, %v1951_v10  ;;  %v7252_v59 = vld [vmem:[%s9517_s5 + $0x108] sm:$0xff] }
 0x2a2   : > { %v2214_v1 = vunpack.c.l.b16 %v2176_v22  ;;  %v2090_v50 = vpop.f32.mrf.mxu2  ;;  %v8564_v47 = vunpack.c.l.b16 %v2185_v55  ;;  %v7268_v22 = vld [vmem:[%s9517_s5 + $0x188] sm:$0xff] }
 0x2a3   : > { %v8521_v35 = vunpack.c.l.b16 %v2192_v20  ;;  %v2117_v49 = vpop.f32.mrf.mxu3  ;;  %v7278_v20 = vld [vmem:[%s9517_s5 + $0x1d8] sm:$0xff]  ;;  %3049 = vmatpush.bf16.msra.mxu2 %v7259_v8  ;;  %v2009_v4 = vadd.f32 %v8406_v18, %v1980_v48 }
 0x2a4   : > { %v2118_v43 = vadd.f32 %v2117_v49, %v2089_v51  ;;  %v2061_v3 = vpop.f32.mrf.mxu1  ;;  %v8530_v30 = vpack.c.b16 %v2214_v1, %v2213_v39  ;;  %3077 = vmatpush.bf16.msra.mxu3 %v7268_v22  ;;  %v7251_v51 = vld [vmem:[%s9517_s5 + $0x100] sm:$0xff]  ;;  %3104 = vmatpush.bf16.msra.mxu0 %v7278_v20  ;;  %v7290_v8 = vld [vmem:[%s9517_s5 + $0x238] sm:$0xff] }
 0x2a5   : > { %v8534_v31 = vpack.c.b16 %v8521_v35, %v8519_v45  ;;  %v2062_v38 = vadd.f32 %v2061_v3, %v2033_v5  ;;  %3018 = vmatpush.bf16.msra.mxu1 %v7253_v19  ;;  %v7277_v5 = vld [vmem:[%s9517_s5 + $0x1d0] sm:$0xff]  ;;  %v2038_v58 = vadd.f32 %v8430_v37, %v2009_v4  ;;  %v7276_v37 = vld [vmem:[%s9517_s5 + $0x1c8] sm:$0xff] }
 0x2a6   : > { %v2131_v34 = vmax.f32 %v2118_v43, 0.0  ;;  %2910 = vmatmul.bf16.gmra.mxu1 %v8530_v30 }
 0x2a7   : > { %2968 = vmatmul.bf16.gmra.mxu3 %v8534_v31  ;;  %v2147_v13 = vld [vmem:[#allocation2 + $0x40] sm:$0xff]  ;;  %v2091_v24 = vadd.f32 %v2090_v50, %v2062_v38 }
 0x2a8   : > { %2139 = vst [vmem:[#allocation2 + $0x51] sm:$0xff] %v2131_v34  ;;  %v2177_v41 = vpack.c.bf16 %v2147_v13, %v2147_v13  ;;  %v2186_v39 = vpack.c.bf16 %v2131_v34, %v2131_v34  ;;  %v2167_v29 = vld [vmem:[#allocation2 + $0x42] sm:$0xff]  ;;  %3105 = vmatpush.bf16.msra.mxu0 %v7277_v5 }
 0x2a9   : > { %v2193_v23 = vpack.c.bf16 %v2167_v29, %v2167_v29  ;;  %3019 = vmatpush.bf16.msra.mxu1 %v7252_v59  ;;  %v7288_v5 = vld [vmem:[%s9517_s5 + $0x228] sm:$0xff] }
 0x2aa   : > { %v2215_v36 = vunpack.c.l.b16 %v2177_v41  ;;  %v8566_v12 = vunpack.c.l.b16 %v2186_v39  ;;  %v2093_v27 = vpop.f32.mrf.mxu2  ;;  %v7275_v39 = vld [vmem:[%s9517_s5 + $0x1c0] sm:$0xff] }
 0x2ab   : > { %v2119_v32 = vpop.f32.mrf.mxu3  ;;  %v8598_v43 = vunpack.c.l.b16 %v2193_v23 }
 0x2ac   : > { %v2120_v21 = vadd.f32 %v2119_v32, %v2091_v24  ;;  %v2064_v60 = vpop.f32.mrf.mxu1  ;;  %v2278_v7 = vpack.c.b16 %v2215_v36, %v2214_v1  ;;  %v8575_v44 = vpack.c.b16 %v8566_v12, %v8564_v47  ;;  %v7267_v1 = vld [vmem:[%s9517_s5 + $0x180] sm:$0xff]  ;;  %3106 = vmatpush.bf16.msra.mxu0 %v7276_v37 }
 0x2ad   : > { %v2065_v11 = vadd.f32 %v2064_v60, %v2036_v63  ;;  %3020 = vmatpush.bf16.msra.mxu1 %v7251_v51  ;;  %3078 = vmatpush.bf16.msra.mxu3 %v7267_v1  ;;  %v2297_v1 = vpack.c.b16 %v8519_v45, %v8459_v53  ;;  %v2298_v53 = vpack.c.b16 %v8598_v43, %v8521_v35  ;;  %v7286_v45 = vld [vmem:[%s9517_s5 + $0x218] sm:$0xff] }
 0x2ae   : > { %v2132_v14 = vmax.f32 %v2120_v21, 0.0  ;;  %2997 = vmatmul.bf16.gmra.mxu0 %v2278_v7  ;;  %2944 = vmatmul.bf16.gmra.mxu2 %v8575_v44 }
 0x2af   : > { %v2148_v2 = vld [vmem:[#allocation2 + $0x50] sm:$0xff]  ;;  %v2094_v49 = vadd.f32 %v2093_v27, %v2065_v11 }
 0x2b0   : > { %v2168_v56 = vld [vmem:[#allocation2 + $0x52] sm:$0xff]  ;;  %2140 = vst [vmem:[#allocation2 + $0x61] sm:$0xff] %v2132_v14  ;;  %v2178_v52 = vpack.c.bf16 %v2148_v2, %v2148_v2  ;;  %v2187_v33 = vpack.c.bf16 %v2132_v14, %v2132_v14  ;;  %3107 = vmatpush.bf16.msra.mxu0 %v7275_v39 }
 0x2b1   : > { %v2194_v16 = vpack.c.bf16 %v2168_v56, %v2168_v56  ;;  %3129 = vmatpush.bf16.msrb.mxu1 %v7290_v8  ;;  %v7289_v56 = vld [vmem:[%s9517_s5 + $0x230] sm:$0xff] }
 0x2b2   : > { %v2216_v54 = vunpack.c.l.b16 %v2178_v52  ;;  %v2095_v41 = vpop.f32.mrf.mxu2  ;;  %v8617_v25 = vunpack.c.l.b16 %v2187_v33 }
 0x2b3   : > { %v8600_v3 = vunpack.c.l.b16 %v2194_v16  ;;  %v2122_v6 = vpop.f32.mrf.mxu3 }
 0x2b4   : > { %v2123_v0 = vadd.f32 %v2122_v6, %v2094_v49  ;;  %v2066_v50 = vpop.f32.mrf.mxu1  ;;  %v8603_v34 = vpack.c.b16 %v2216_v54, %v2215_v36  ;;  %v2287_v49 = vpack.c.b16 %v8482_v46, %v8446_v17  ;;  %v2288_v17 = vpack.c.b16 %v8564_v47, %v8484_v15  ;;  %v7285_v46 = vld [vmem:[%s9517_s5 + $0x210] sm:$0xff]  ;;  %v7283_v15 = vld [vmem:[%s9517_s5 + $0x200] sm:$0xff] }
 0x2b5   : > { %v8607_v18 = vpack.c.b16 %v8600_v3, %v8598_v43  ;;  %v2067_v55 = vadd.f32 %v2066_v50, %v2038_v58  ;;  %3130 = vmatpush.bf16.msrb.mxu1 %v7289_v56  ;;  %v2289_v47 = vpack.c.b16 %v8617_v25, %v8566_v12  ;;  %v2162_v58 = vld [vmem:[#allocation2 + $0x91] sm:$0xff] }
 0x2b6   : > { %v2133_v38 = vmax.f32 %v2123_v0, 0.0  ;;  %2915 = vmatmul.bf16.gmra.mxu1 %v8603_v34  ;;  %v2201_v0 = vpack.c.bf16 %v2162_v58, %v2162_v58  ;;  %v8674_v12 = vld [vmem:[%s9518_s6] ss:$0 sm:$0xff] }
 0x2b7   : > { %2973 = vmatmul.bf16.gmra.mxu3 %v8607_v18  ;;  %v2149_v26 = vld [vmem:[#allocation2 + $0x60] sm:$0xff]  ;;  %v2096_v40 = vadd.f32 %v2095_v41, %v2067_v55 }
 0x2b8   : > { %2141 = vst [vmem:[#allocation2 + $0x71] sm:$0xff] %v2133_v38  ;;  %v2179_v13 = vpack.c.bf16 %v2149_v26, %v2149_v26  ;;  %v2188_v19 = vpack.c.bf16 %v2133_v38, %v2133_v38  ;;  %v2169_v24 = vld [vmem:[#allocation2 + $0x62] sm:$0xff]  ;;  %v2310_v50 = vunpack.c.l.b16 %v2201_v0 }
 0x2b9   : > { %v2195_v29 = vpack.c.bf16 %v2169_v24, %v2169_v24  ;;  %3131 = vmatpush.bf16.msrb.mxu1 %v7288_v5 }
 0x2ba   : > { %v2217_v62 = vunpack.c.l.b16 %v2179_v13  ;;  %v8619_v9 = vunpack.c.l.b16 %v2188_v19 }
 0x2bb   : > { %v2124_v28 = vpop.f32.mrf.mxu3  ;;  %v2265_v23 = vunpack.c.l.b16 %v2195_v29 }
 0x2bc   : > { %v2125_v36 = vadd.f32 %v2124_v28, %v2096_v40  ;;  %v2279_v10 = vpack.c.b16 %v2217_v62, %v2216_v54  ;;  %v8623_v63 = vpack.c.b16 %v8619_v9, %v8617_v25  ;;  %v7287_v54 = vld [vmem:[%s9517_s5 + $0x220] sm:$0xff] }
 0x2bd   : > { %3132 = vmatpush.bf16.msrb.mxu1 %v7287_v54  ;;  %v2299_v35 = vpack.c.b16 %v2265_v23, %v8600_v3 }
 0x2be   : > { %v2134_v32 = vmax.f32 %v2125_v36, 0.0  ;;  %3002 = vmatmul.bf16.gmra.mxu0 %v2279_v10  ;;  %2949 = vmatmul.bf16.gmra.mxu2 %v8623_v63 }
 0x2bf   : > { %v2150_v21 = vld [vmem:[#allocation2 + $0x70] sm:$0xff] }
 0x2c0   : > { %v2170_v60 = vld [vmem:[#allocation2 + $0x72] sm:$0xff]  ;;  %2142 = vst [vmem:[#allocation2 + $0x81] sm:$0xff] %v2134_v32  ;;  %v2180_v7 = vpack.c.bf16 %v2150_v21, %v2150_v21  ;;  %v2198_v14 = vpack.c.bf16 %v2134_v32, %v2134_v32 }
 0x2c1   : > { %v2196_v48 = vpack.c.bf16 %v2170_v60, %v2170_v60  ;;  %3133 = vmatpush.bf16.msrb.mxu1 %v7286_v45 }
 0x2c2   : > { %v2218_v11 = vunpack.c.l.b16 %v2180_v7  ;;  %v2286_v22 = vunpack.c.l.b16 %v2198_v14 }
 0x2c3   : > { %v2266_v59 = vunpack.c.l.b16 %v2196_v48 }
 0x2c4   : > { %v2222_v20 = vpack.c.b16 %v2218_v11, %v2217_v62  ;;  %v2290_v2 = vpack.c.b16 %v2286_v22, %v8619_v9 }
 0x2c5   : > { %v8629_v27 = vpack.c.b16 %v2266_v59, %v2265_v23  ;;  %3134 = vmatpush.bf16.msrb.mxu1 %v7285_v46 }
 0x2c6   : > { %2920 = vmatmul.bf16.gmra.mxu1 %v2222_v20 }
 0x2c7   : > { %2978 = vmatmul.bf16.gmra.mxu3 %v8629_v27  ;;  %v2151_v52 = vld [vmem:[#allocation2 + $0x80] sm:$0xff] }
 0x2c8   : > { %v2197_v16 = vpack.c.bf16 %v2151_v52, %v2151_v52 }
 0x2ca   : > { %v2276_v51 = vunpack.c.l.b16 %v2197_v16 }
 0x2cc   : > { %v2280_v4 = vpack.c.b16 %v2276_v51, %v2218_v11  ;;  %v2307_v6 = vpack.c.b16 %v8280_v61, %v2276_v51  ;;  %v2172_v11 = vld [vmem:[#allocation2 + $0x92] sm:$0xff] }
 0x2cd   : > { %v2202_v56 = vpack.c.bf16 %v2172_v11, %v2172_v11 }
 0x2ce   : > { %3007 = vmatmul.bf16.gmra.mxu0 %v2280_v4  ;;  %3050 = vmatmul.bf16.vlgmr.msra.gmra.mxu2 %v2297_v1 }
 0x2cf   : > { %v2314_v52 = vunpack.c.l.b16 %v2202_v56 }
 0x2d6   : > { %3021 = vmatmul.bf16.vlgmr.msra.gmra.mxu1 %v2287_v49 }
 0x2d7   : > { %3079 = vmatmul.bf16.vlgmr.msra.gmra.mxu3 %v8530_v30  ;;  %v2171_v30 = vld [vmem:[#allocation2 + $0x82] sm:$0xff] }
 0x2d8   : > { %v2199_v43 = vpack.c.bf16 %v2171_v30, %v2171_v30 }
 0x2da   : > { %v2296_v3 = vunpack.c.l.b16 %v2199_v43 }
 0x2de   : > { %3108 = vmatmul.bf16.vlgmr.msra.gmra.mxu0 %v8496_v57  ;;  %3055 = vmatmul.bf16.gmra.mxu2 %v2298_v53  ;;  %v7284_v57 = vld [vmem:[%s9517_s5 + $0x208] sm:$0xff] }
 0x2df   : > { %3135 = vmatpush.bf16.msrb.mxu1 %v7284_v57 }
 0x2e3   : > { %3136 = vmatpush.bf16.msrb.mxu1 %v7283_v15 }
 0x2e6   : > { %3026 = vmatmul.bf16.gmra.mxu1 %v2288_v17 }
 0x2e7   : > { %3084 = vmatmul.bf16.gmra.mxu3 %v8603_v34  ;;  %v2311_v34 = vpack.c.b16 %v2310_v50, %v2286_v22 }
 0x2ee   : > { %3113 = vmatmul.bf16.gmra.mxu0 %v8575_v44  ;;  %3060 = vmatmul.bf16.gmra.mxu2 %v2299_v35  ;;  %v2300_v44 = vpack.c.b16 %v2296_v3, %v2266_v59 }
 0x2f6   : > { %3031 = vmatmul.bf16.gmra.mxu1 %v2289_v47 }
 0x2f7   : > { %3089 = vmatmul.bf16.gmra.mxu3 %v2222_v20 }
 0x2fe   : > { %3118 = vmatmul.bf16.gmra.mxu0 %v8623_v63  ;;  %3065 = vmatmul.bf16.gmra.mxu2 %v2300_v44 }
 0x306   : > { %3036 = vmatmul.bf16.gmra.mxu1 %v2290_v2 }
 0x307   : > { %3094 = vmatmul.bf16.gmra.mxu3 %v2307_v6 }
 0x30e   : > { %3123 = vmatmul.bf16.gmra.mxu0 %v2311_v34 }
 0x311   : > { %v2935_v38 = vpop.f32.mrf.mxu2 }
 0x313   : > { %v2906_v55 = vpop.f32.mrf.mxu1 }
 0x314   : > { %v2907_v33 = vadd.f32 %v8674_v12, %v2906_v55 }
 0x316   : > { %3137 = vmatmul.bf16.vlgmr.msrb.gmra.mxu1 %v8534_v31  ;;  %v2936_v37 = vadd.f32 %v2935_v38, %v2907_v33 }
 0x319   : > { %v8678_v61 = vpop.f32.mrf.mxu2 }
 0x31a   : > { %v2964_v26 = vpop.f32.mrf.mxu3 }
 0x31b   : > { %v2965_v13 = vadd.f32 %v2964_v26, %v2936_v37  ;;  %v2908_v19 = vpop.f32.mrf.mxu1  ;;  %v2993_v41 = vpop.f32.mrf.mxu0 }
 0x31c   : > { %v2909_v37 = vadd.f32 %v8674_v12, %v2908_v19 }
 0x31d   : > { %v2994_v39 = vadd.f32 %v2993_v41, %v2965_v13 }
 0x321   : > { %v2940_v62 = vpop.f32.mrf.mxu2 }
 0x322   : > { %v8680_v40 = vpop.f32.mrf.mxu3 }
 0x323   : > { %v2911_v25 = vpop.f32.mrf.mxu1  ;;  %v8682_v9 = vpop.f32.mrf.mxu0 }
 0x324   : > { %v2912_v28 = vadd.f32 %v8674_v12, %v2911_v25 }
 0x326   : > { %3142 = vmatmul.bf16.gmra.mxu1 %v8607_v18  ;;  %v2941_v24 = vadd.f32 %v2940_v62, %v2912_v28  ;;  %v3245_v62 = vld [vmem:[#allocation3] sm:$0xf] }
 0x327   : > { %3267 = vst [vmem:[#allocation1] ss:$2 sm:$0xff] %v3245_v62 }
 0x329   : > { %v8686_v36 = vpop.f32.mrf.mxu2 }
 0x32a   : > { %v2969_v31 = vpop.f32.mrf.mxu3 }
 0x32b   : > { %v2970_v10 = vadd.f32 %v2969_v31, %v2941_v24  ;;  %v8688_v63 = vpop.f32.mrf.mxu1  ;;  %v2998_v32 = vpop.f32.mrf.mxu0 }
 0x32d   : > { %v2999_v29 = vadd.f32 %v2998_v32, %v2970_v10 }
 0x331   : > { %v2945_v21 = vpop.f32.mrf.mxu2 }
 0x332   : > { %v8690_v8 = vpop.f32.mrf.mxu3 }
 0x333   : > { %v2916_v60 = vpop.f32.mrf.mxu1  ;;  %v8692_v7 = vpop.f32.mrf.mxu0 }
 0x334   : > { %v2917_v48 = vadd.f32 %v8674_v12, %v2916_v60 }
 0x336   : > { %3147 = vmatmul.bf16.gmra.mxu1 %v8629_v27  ;;  %v2946_v18 = vadd.f32 %v2945_v21, %v2917_v48  ;;  %v2315_v27 = vpack.c.b16 %v2314_v52, %v2296_v3 }
 0x339   : > { %v8696_v59 = vpop.f32.mrf.mxu2 }
 0x33a   : > { %v2974_v14 = vpop.f32.mrf.mxu3 }
 0x33b   : > { %v2975_v23 = vadd.f32 %v2974_v14, %v2946_v18  ;;  %v8698_v22 = vpop.f32.mrf.mxu1  ;;  %v3003_v20 = vpop.f32.mrf.mxu0  ;;  %v2914_v18 = vadd.f32 %v8674_v12, %v8688_v63  ;;  %v7296_v63 = vld [vmem:[%s9519_s7 + $0x28] sm:$0xff] }
 0x33d   : > { %v3004_v2 = vadd.f32 %v3003_v20, %v2975_v23  ;;  %v2943_v20 = vadd.f32 %v8686_v36, %v2914_v18 }
 0x33f   : > { %v2972_v56 = vadd.f32 %v8690_v8, %v2943_v20 }
 0x341   : > { %v2950_v5 = vpop.f32.mrf.mxu2  ;;  %v3001_v8 = vadd.f32 %v8692_v7, %v2972_v56  ;;  %v2919_v7 = vadd.f32 %v8674_v12, %v8698_v22  ;;  %v7293_v22 = vld [vmem:[%s9519_s7 + $0x10] sm:$0xff] }
 0x342   : > { %v8700_v16 = vpop.f32.mrf.mxu3 }
 0x343   : > { %v2921_v51 = vpop.f32.mrf.mxu1  ;;  %v8702_v1 = vpop.f32.mrf.mxu0 }
 0x344   : > { %v2922_v4 = vadd.f32 %v8674_v12, %v2921_v51 }
 0x346   : > { %3152 = vmatmul.bf16.gmra.mxu1 %v2315_v27  ;;  %v2951_v49 = vadd.f32 %v2950_v5, %v2922_v4  ;;  %v7306_v5 = vld [vmem:[%s9519_s7 + $0x78] sm:$0xff] }
 0x347   : > { %4046 = vmatpush.bf16.msrb.mxu3 %v7306_v5 }
 0x349   : > { %v8707_v44 = vpop.f32.mrf.mxu2 }
 0x34a   : > { %v2979_v54 = vpop.f32.mrf.mxu3 }
 0x34b   : > { %v2980_v53 = vadd.f32 %v2979_v54, %v2951_v49  ;;  %v8705_v45 = vpop.f32.mrf.mxu1  ;;  %v3008_v17 = vpop.f32.mrf.mxu0 }
 0x34d   : > { %v3009_v46 = vadd.f32 %v3008_v17, %v2980_v53 }
 0x351   : > { %v3051_v34 = vpop.f32.mrf.mxu2 }
 0x352   : > { %v8709_v58 = vpop.f32.mrf.mxu3 }
 0x353   : > { %v3022_v35 = vpop.f32.mrf.mxu1  ;;  %v8713_v0 = vpop.f32.mrf.mxu0 }
 0x354   : > { %v3023_v57 = vadd.f32 %v3022_v35, %v2994_v39  ;;  %v2938_v39 = vadd.f32 %v8678_v61, %v2909_v37  ;;  %v7298_v61 = vld [vmem:[%s9519_s7 + $0x38] sm:$0xff]  ;;  %v7295_v35 = vld [vmem:[%s9519_s7 + $0x20] sm:$0xff] }
 0x355   : > { %4032 = vmatpush.bf16.msrb.mxu2 %v7298_v61  ;;  %v7302_v61 = vld [vmem:[%s9519_s7 + $0x58] sm:$0xff] }
 0x356   : > { %v2967_v25 = vadd.f32 %v8680_v40, %v2938_v39  ;;  %v3052_v31 = vadd.f32 %v3051_v34, %v3023_v57  ;;  %v7305_v57 = vld [vmem:[%s9519_s7 + $0x70] sm:$0xff] }
 0x357   : > { %4047 = vmatpush.bf16.msrb.mxu3 %v7305_v57 }
 0x358   : > { %v2996_v10 = vadd.f32 %v8682_v9, %v2967_v25  ;;  %v7297_v9 = vld [vmem:[%s9519_s7 + $0x30] sm:$0xff] }
 0x359   : > { %v3053_v13 = vpop.f32.mrf.mxu2  ;;  %4033 = vmatpush.bf16.msrb.mxu2 %v7297_v9 }
 0x35a   : > { %v3080_v38 = vpop.f32.mrf.mxu3 }
 0x35b   : > { %v3024_v30 = vpop.f32.mrf.mxu1  ;;  %v3109_v55 = vpop.f32.mrf.mxu0  ;;  %v3081_v32 = vadd.f32 %v3080_v38, %v3052_v31  ;;  %v7303_v31 = vld [vmem:[%s9519_s7 + $0x60] sm:$0xff] }
 0x35d   : > { %v3110_v60 = vadd.f32 %v3109_v55, %v3081_v32  ;;  %4034 = vmatpush.bf16.msrb.mxu2 %v7296_v63  ;;  %v7294_v55 = vld [vmem:[%s9519_s7 + $0x18] sm:$0xff] }
 0x361   : > { %v3056_v21 = vpop.f32.mrf.mxu2  ;;  %4035 = vmatpush.bf16.msrb.mxu2 %v7295_v35 }
 0x362   : > { %v3082_v41 = vpop.f32.mrf.mxu3 }
 0x363   : > { %v3027_v15 = vpop.f32.mrf.mxu1  ;;  %v3111_v28 = vpop.f32.mrf.mxu0 }
 0x364   : > { %v3028_v47 = vadd.f32 %v3027_v15, %v2999_v29  ;;  %v3025_v29 = vadd.f32 %v3024_v30, %v2996_v10  ;;  %v2948_v10 = vadd.f32 %v8696_v59, %v2919_v7  ;;  %v7322_v7 = vld [vmem:[%s9519_s7 + $0xf8] sm:$0xff] }
 0x365   : > { %4036 = vmatpush.bf16.msrb.mxu2 %v7294_v55 }
 0x366   : > { %v3054_v40 = vadd.f32 %v3053_v13, %v3025_v29  ;;  %v3057_v49 = vadd.f32 %v3056_v21, %v3028_v47  ;;  %v2977_v21 = vadd.f32 %v8700_v16, %v2948_v10 }
 0x368   : > { %v3083_v23 = vadd.f32 %v3082_v41, %v3054_v40 }
 0x369   : > { %v3058_v51 = vpop.f32.mrf.mxu2  ;;  %4037 = vmatpush.bf16.msrb.mxu2 %v7293_v22 }
 0x36a   : > { %v3085_v19 = vpop.f32.mrf.mxu3  ;;  %v3112_v52 = vadd.f32 %v3111_v28, %v3083_v23 }
 0x36b   : > { %v3029_v43 = vpop.f32.mrf.mxu1  ;;  %v3114_v11 = vpop.f32.mrf.mxu0  ;;  %v3086_v53 = vadd.f32 %v3085_v19, %v3057_v49  ;;  %v7300_v49 = vld [vmem:[%s9519_s7 + $0x48] sm:$0xff] }
 0x36c   : > { %v3030_v30 = vadd.f32 %v3029_v43, %v3001_v8 }
 0x36e   : > { %v3059_v43 = vadd.f32 %v3058_v51, %v3030_v30  ;;  %v7314_v51 = vld [vmem:[%s9519_s7 + $0xb8] sm:$0xff]  ;;  %v7299_v30 = vld [vmem:[%s9519_s7 + $0x40] sm:$0xff] }
 0x371   : > { %v3061_v37 = vpop.f32.mrf.mxu2 }
 0x372   : > { %v3087_v4 = vpop.f32.mrf.mxu3 }
 0x373   : > { %v3032_v3 = vpop.f32.mrf.mxu1  ;;  %v3088_v25 = vadd.f32 %v3087_v4, %v3059_v43 }
 0x374   : > { %v8711_v6 = vadd.f32 %v3032_v3, %v3004_v2  ;;  %v3115_v3 = vadd.f32 %v3114_v11, %v3086_v53 }
 0x376   : > { %v3062_v18 = vadd.f32 %v3061_v37, %v8711_v6 }
 0x379   : > { %v3063_v11 = vpop.f32.mrf.mxu2 }
 0x37a   : > { %v3090_v62 = vpop.f32.mrf.mxu3 }
 0x37b   : > { %v8715_v50 = vpop.f32.mrf.mxu1  ;;  %v3091_v16 = vadd.f32 %v3090_v62, %v3062_v18 }
 0x382   : > { %v3092_v9 = vpop.f32.mrf.mxu3 }
 0x383   : > { %v3037_v33 = vpop.f32.mrf.mxu1 }
 0x384   : > { %v8718_v26 = vadd.f32 %v3037_v33, %v3009_v46  ;;  %v3116_v46 = vpop.f32.mrf.mxu0  ;;  %v7304_v33 = vld [vmem:[%s9519_s7 + $0x68] sm:$0xff] }
 0x385   : > { %4048 = vmatpush.bf16.msrb.mxu3 %v7304_v33  ;;  %v3117_v19 = vadd.f32 %v3116_v46, %v3088_v25  ;;  %v3251_v46 = vld [vmem:[#allocation3 + $0x1] sm:$0xf] }
 0x389   : > { %4049 = vmatpush.bf16.msrb.mxu3 %v7303_v31 }
 0x38b   : > { %v8722_v24 = vpop.f32.mrf.mxu1 }
 0x38c   : > { %v3119_v29 = vpop.f32.mrf.mxu0 }
 0x38d   : > { %4050 = vmatpush.bf16.msrb.mxu3 %v7302_v61  ;;  %v3120_v4 = vadd.f32 %v3119_v29, %v3091_v16  ;;  %v7330_v29 = vld [vmem:[%s9519_s7 + $0x138] sm:$0xff]  ;;  %v7320_v61 = vld [vmem:[%s9519_s7 + $0xe8] sm:$0xff] }
 0x38e   : > { %4088 = vmatpush.bf16.msrb.mxu0 %v7330_v29  ;;  %v7333_v29 = vld [vmem:[%s9519_s7 + $0x150] sm:$0xff] }
 0x393   : > { %v3138_v48 = vpop.f32.mrf.mxu1 }
 0x394   : > { %v3139_v14 = vadd.f32 %v3138_v48, %v3110_v60  ;;  %v7292_v48 = vld [vmem:[%s9519_s7 + $0x8] sm:$0xff]  ;;  %v3121_v63 = vpop.f32.mrf.mxu0 }
 0x395   : > { %4038 = vmatpush.bf16.msrb.mxu2 %v7292_v48 }
 0x396   : > { %v3158_v2 = vmax.f32 %v3139_v14, 0.0  ;;  %v3006_v14 = vadd.f32 %v8702_v1, %v2977_v21  ;;  %v7301_v1 = vld [vmem:[%s9519_s7 + $0x50] sm:$0xff] }
 0x397   : > { %4051 = vmatpush.bf16.msrb.mxu3 %v7301_v1 }
 0x398   : > { %v3169_v54 = vperm.slane %v3158_v2, %v7840_v42  ;;  %v3035_v2 = vadd.f32 %v8715_v50, %v3006_v14  ;;  %v2924_v50 = vadd.f32 %v8674_v12, %v8705_v45 }
 0x39a   : > { %v3206_v15 = vrot.slane %v3169_v54, 4 }
 0x39b   : > { %v3140_v27 = vpop.f32.mrf.mxu1  ;;  %4052 = vmatpush.bf16.msrb.mxu3 %v7300_v49 }
 0x39c   : > { %v3141_v36 = vadd.f32 %v3140_v27, %v3112_v52  ;;  %v3222_v13 = vmax.f32 %v3169_v54, %v3206_v15  ;;  %v7291_v52 = vld [vmem:[%s9519_s7] sm:$0xff]  ;;  %v3064_v54 = vadd.f32 %v3063_v11, %v3035_v2  ;;  %v2953_v15 = vadd.f32 %v8707_v44, %v2924_v50 }
 0x39d   : > { %4039 = vmatpush.bf16.msrb.mxu2 %v7291_v52  ;;  %v7319_v2 = vld [vmem:[%s9519_s7 + $0xe0] sm:$0xff] }
 0x39e   : > { %v3159_v17 = vmax.f32 %v3141_v36, 0.0  ;;  %v3093_v35 = vadd.f32 %v3092_v9, %v3064_v54  ;;  %v2982_v55 = vadd.f32 %v8709_v58, %v2953_v15  ;;  %v3124_v58 = vpop.f32.mrf.mxu0  ;;  %v7309_v9 = vld [vmem:[%s9519_s7 + $0x90] sm:$0xff]  ;;  %v7307_v54 = vld [vmem:[%s9519_s7 + $0x80] sm:$0xff]  ;;  %v7316_v15 = vld [vmem:[%s9519_s7 + $0xc8] sm:$0xff] }
 0x39f   : > { %4053 = vmatpush.bf16.msrb.mxu3 %v7299_v30 }
 0x3a0   : > { %v3173_v47 = vperm.slane %v3159_v17, %v7840_v42  ;;  %v7313_v17 = vld [vmem:[%s9519_s7 + $0xb0] sm:$0xff]  ;;  %v3122_v33 = vadd.f32 %v3121_v63, %v3093_v35  ;;  %v3011_v62 = vadd.f32 %v8713_v0, %v2982_v55  ;;  %v7310_v0 = vld [vmem:[%s9519_s7 + $0x98] sm:$0xff]  ;;  %v7328_v63 = vld [vmem:[%s9519_s7 + $0x128] sm:$0xff] }
 0x3a1   : > { %4060 = vmatpush.bf16.msra.mxu2 %v7314_v51  ;;  %v7338_v51 = vld [vmem:[%s9519_s7 + $0x178] sm:$0xff]  ;;  %v7325_v55 = vld [vmem:[%s9519_s7 + $0x110] sm:$0xff] }
 0x3a2   : > { %v3207_v34 = vrot.slane %v3173_v47, 4  ;;  %4102 = vmatpush.bf16.msra.mxu1 %v7338_v51  ;;  %v7342_v51 = vld [vmem:[%s9519_s7 + $0x198] sm:$0xff] }
 0x3a3   : > { %v3143_v38 = vpop.f32.mrf.mxu1  ;;  %4074 = vmatpush.bf16.msra.mxu3 %v7322_v7  ;;  %v7335_v7 = vld [vmem:[%s9519_s7 + $0x160] sm:$0xff] }
 0x3a4   : > { %v3223_v41 = vmax.f32 %v3173_v47, %v3207_v34  ;;  %v3144_v39 = vadd.f32 %v3143_v38, %v3115_v3  ;;  %v3066_v47 = vpop.f32.mrf.mxu2  ;;  %v7312_v34 = vld [vmem:[%s9519_s7 + $0xa8] sm:$0xff]  ;;  %v3095_v38 = vpop.f32.mrf.mxu3 }
 0x3a5   : > { %4061 = vmatpush.bf16.msra.mxu2 %v7313_v17  ;;  %v3067_v43 = vadd.f32 %v3066_v47, %v8718_v26  ;;  %v3040_v26 = vadd.f32 %v8722_v24, %v3011_v62  ;;  %v7337_v17 = vld [vmem:[%s9519_s7 + $0x170] sm:$0xff]  ;;  %v7326_v47 = vld [vmem:[%s9519_s7 + $0x118] sm:$0xff] }
 0x3a6   : > { %v3230_v28 = vmax.f32 %v3222_v13, %v3223_v41  ;;  %v3160_v32 = vmax.f32 %v3144_v39, 0.0  ;;  %v7311_v41 = vld [vmem:[%s9519_s7 + $0xa0] sm:$0xff]  ;;  %v7321_v39 = vld [vmem:[%s9519_s7 + $0xf0] sm:$0xff]  ;;  %v3126_v52 = vpop.f32.mrf.mxu0  ;;  %4103 = vmatpush.bf16.msra.mxu1 %v7337_v17  ;;  %v7334_v62 = vld [vmem:[%s9519_s7 + $0x158] sm:$0xff] }
 0x3a7   : > { %v3096_v25 = vadd.f32 %v3095_v38, %v3067_v43  ;;  %4075 = vmatpush.bf16.msra.mxu3 %v7321_v39  ;;  %v7315_v43 = vld [vmem:[%s9519_s7 + $0xc0] sm:$0xff] }
 0x3a8   : > { %3241 = vst [vmem:[#allocation3 + $0x9] sm:$0xf] %v3230_v28  ;;  %v3177_v59 = vperm.slane %v3160_v32, %v7840_v42  ;;  %v3257_v28 = vld [vmem:[#allocation3 + $0x2] sm:$0xf] }
 0x3a9   : > { %4062 = vmatpush.bf16.msra.mxu2 %v7312_v34 }
 0x3aa   : > { %v3208_v56 = vrot.slane %v3177_v59, 4 }
 0x3ab   : > { %v3145_v60 = vpop.f32.mrf.mxu1  ;;  %4076 = vmatpush.bf16.msra.mxu3 %v7320_v61 }
 0x3ac   : > { %v3146_v40 = vadd.f32 %v3145_v60, %v3117_v19  ;;  %v3224_v36 = vmax.f32 %v3177_v59, %v3208_v56  ;;  %v3125_v60 = vadd.f32 %v3124_v58, %v3096_v25  ;;  %v3068_v24 = vpop.f32.mrf.mxu2  ;;  %v3097_v18 = vpop.f32.mrf.mxu3  ;;  %v7324_v58 = vld [vmem:[%s9519_s7 + $0x108] sm:$0xff] }
 0x3ad   : > { %4063 = vmatpush.bf16.msra.mxu2 %v7311_v41 }
 0x3ae   : > { %v3161_v23 = vmax.f32 %v3146_v40, 0.0  ;;  %v3069_v40 = vadd.f32 %v3068_v24, %v3040_v26 }
 0x3af   : > { %v8775_v20 = vld [vmem:[#allocation3 + $0x8] sm:$0xf]  ;;  %4077 = vmatpush.bf16.msra.mxu3 %v7319_v2  ;;  %v7343_v2 = vld [vmem:[%s9519_s7 + $0x1a0] sm:$0xff] }
 0x3b0   : > { %3269 = vst [vmem:[#allocation1 + $0x1] ss:$2 sm:$0xff] %v8775_v20  ;;  %v3181_v6 = vperm.slane %v3161_v23, %v7840_v42  ;;  %v8797_v12 = vld [vmem:[#allocation3 + $0x9] sm:$0xf]  ;;  %v3098_v56 = vadd.f32 %v3097_v18, %v3069_v40  ;;  %v7362_v40 = vld [vmem:[%s9519_s7 + $0x238] sm:$0xff] }
 0x3b1   : > { %v8832_v21 = vld [vmem:[#allocation3 + $0xa] sm:$0xf]  ;;  %4064 = vmatpush.bf16.msra.mxu2 %v7310_v0 }
 0x3b2   : > { %v3209_v27 = vrot.slane %v3181_v6, 4  ;;  %v7329_v23 = vld [vmem:[%s9519_s7 + $0x130] sm:$0xff] }
 0x3b3   : > { %v3148_v5 = vpop.f32.mrf.mxu1  ;;  %4089 = vmatpush.bf16.msrb.mxu0 %v7329_v23  ;;  %v7361_v23 = vld [vmem:[%s9519_s7 + $0x230] sm:$0xff] }
 0x3b4   : > { %v3225_v8 = vmax.f32 %v3181_v6, %v3209_v27  ;;  %v3149_v53 = vadd.f32 %v3148_v5, %v3120_v4  ;;  %v7308_v4 = vld [vmem:[%s9519_s7 + $0x88] sm:$0xff]  ;;  %v7318_v27 = vld [vmem:[%s9519_s7 + $0xd8] sm:$0xff]  ;;  %v3127_v5 = vadd.f32 %v3126_v52, %v3098_v56 }
 0x3b5   : > { %4065 = vmatpush.bf16.msra.mxu2 %v7309_v9  ;;  %4078 = vmatpush.bf16.msra.mxu3 %v7318_v27 }
 0x3b6   : > { %v3231_v57 = vmax.f32 %v3224_v36, %v3225_v8  ;;  %v3162_v3 = vmax.f32 %v3149_v53, 0.0  ;;  %v7327_v36 = vld [vmem:[%s9519_s7 + $0x120] sm:$0xff] }
 0x3b7   : > { %v8799_v45 = vld.sshfl [vmem:[#allocation1] sm:$0xff pattern:$0x75316420]  ;;  %4090 = vmatpush.bf16.msrb.mxu0 %v7328_v63  ;;  %v7352_v63 = vld [vmem:[%s9519_s7 + $0x1e8] sm:$0xff] }
 0x3b8   : > { %3284 = vst [vmem:[#allocation1] ss:$2 sm:$0xff] %v3251_v46  ;;  %v3185_v37 = vperm.slane %v3162_v3, %v7840_v42  ;;  %v7336_v3 = vld [vmem:[%s9519_s7 + $0x168] sm:$0xff] }
 0x3b9   : > { %3286 = vst [vmem:[#allocation1 + $0x1] ss:$2 sm:$0xff] %v8797_v12  ;;  %4066 = vmatpush.bf16.msra.mxu2 %v7308_v4  ;;  %4104 = vmatpush.bf16.msra.mxu1 %v7336_v3  ;;  %v7360_v4 = vld [vmem:[%s9519_s7 + $0x228] sm:$0xff]  ;;  %v7357_v3 = vld [vmem:[%s9519_s7 + $0x210] sm:$0xff] }
 0x3ba   : > { %3242 = vst [vmem:[#allocation3 + $0x11] sm:$0xf] %v3231_v57  ;;  %v3210_v10 = vrot.slane %v3185_v37, 4 }
 0x3bb   : > { %v3150_v44 = vpop.f32.mrf.mxu1  ;;  %4091 = vmatpush.bf16.msrb.mxu0 %v7327_v36  ;;  %v7341_v36 = vld [vmem:[%s9519_s7 + $0x190] sm:$0xff] }
 0x3bc   : > { %v3151_v13 = vadd.f32 %v3150_v44, %v3122_v33  ;;  %v3226_v14 = vmax.f32 %v3185_v37, %v3210_v10 }
 0x3bd   : > { %4067 = vmatpush.bf16.msra.mxu2 %v7307_v54  ;;  %4105 = vmatpush.bf16.msra.mxu1 %v7335_v7  ;;  %v7339_v7 = vld [vmem:[%s9519_s7 + $0x180] sm:$0xff] }
 0x3be   : > { %v3163_v22 = vmax.f32 %v3151_v13, 0.0  ;;  %v3278_v13 = vpack.c.bf16 %v8799_v45, %v8799_v45 }
 0x3bf   : > { %4092 = vmatpush.bf16.msrb.mxu0 %v7326_v47 }
 0x3c0   : > { %v8823_v31 = vld.sshfl [vmem:[#allocation1] sm:$0xff pattern:$0x75316420]  ;;  %v3189_v32 = vperm.slane %v3163_v22, %v7840_v42  ;;  %v3400_v45 = vunpack.c.l.b16 %v3278_v13  ;;  %v7356_v13 = vld [vmem:[%s9519_s7 + $0x208] sm:$0xff] }
 0x3c1   : > { %3301 = vst [vmem:[#allocation1] ss:$2 sm:$0xff] %v3257_v28  ;;  %v8834_v19 = vld [vmem:[#allocation3 + $0x10] sm:$0xf]  ;;  %4106 = vmatpush.bf16.msra.mxu1 %v7334_v62  ;;  %v7323_v22 = vld [vmem:[%s9519_s7 + $0x100] sm:$0xff]  ;;  %v3295_v0 = vpack.c.bf16 %v8823_v31, %v8823_v31 }
 0x3c2   : > { %3303 = vst [vmem:[#allocation1 + $0x1] ss:$2 sm:$0xff] %v8832_v21  ;;  %v3211_v48 = vrot.slane %v3189_v32, 4  ;;  %v8897_v38 = vld [vmem:[#allocation3 + $0x11] sm:$0xf]  ;;  %v7347_v62 = vld [vmem:[%s9519_s7 + $0x1c0] sm:$0xff] }
 0x3c3   : > { %3271 = vst [vmem:[#allocation1 + $0x10] ss:$2 sm:$0xff] %v8834_v19  ;;  %v3153_v59 = vpop.f32.mrf.mxu1  ;;  %4093 = vmatpush.bf16.msrb.mxu0 %v7325_v55  ;;  %v7346_v28 = vld [vmem:[%s9519_s7 + $0x1b8] sm:$0xff]  ;;  %v3406_v31 = vunpack.c.l.b16 %v3295_v0  ;;  %v3256_v0 = vld [vmem:[#allocation3 + $0x29] sm:$0xf] }
 0x3c4   : > { %v3227_v16 = vmax.f32 %v3189_v32, %v3211_v48  ;;  %v3154_v11 = vadd.f32 %v3153_v59, %v3125_v60  ;;  %v8927_v10 = vld [vmem:[#allocation3 + $0x12] sm:$0xf]  ;;  %v7345_v60 = vld [vmem:[%s9519_s7 + $0x1b0] sm:$0xff]  ;;  %v7344_v59 = vld [vmem:[%s9519_s7 + $0x1a8] sm:$0xff] }
 0x3c5   : > { %4107 = vmatpush.bf16.msra.mxu1 %v7333_v29 }
 0x3c6   : > { %v3232_v6 = vmax.f32 %v3226_v14, %v3227_v16  ;;  %v3164_v1 = vmax.f32 %v3154_v11, 0.0  ;;  %v7354_v14 = vld [vmem:[%s9519_s7 + $0x1f8] sm:$0xff]  ;;  %v7331_v16 = vld [vmem:[%s9519_s7 + $0x140] sm:$0xff] }
 0x3c7   : > { %4094 = vmatpush.bf16.msrb.mxu0 %v7324_v58 }
 0x3c8   : > { %3243 = vst [vmem:[#allocation3 + $0x19] sm:$0xf] %v3232_v6  ;;  %v3193_v8 = vperm.slane %v3164_v1, %v7840_v42  ;;  %v7353_v6 = vld [vmem:[%s9519_s7 + $0x1f0] sm:$0xff] }
 0x3c9   : > { %v8859_v50 = vld.sshfl [vmem:[#allocation1] sm:$0xff pattern:$0x75316420] }
 0x3ca   : > { %3315 = vst [vmem:[#allocation1] ss:$2 sm:$0xff] %v8775_v20  ;;  %v7317_v20 = vld [vmem:[%s9519_s7 + $0xd0] sm:$0xff]  ;;  %v3212_v57 = vrot.slane %v3193_v8, 4  ;;  %v3312_v56 = vpack.c.bf16 %v8859_v50, %v8859_v50 }
 0x3cb   : > { %3317 = vst [vmem:[#allocation1 + $0x1] ss:$2 sm:$0xff] %v8834_v19  ;;  %v3155_v49 = vpop.f32.mrf.mxu1  ;;  %4079 = vmatpush.bf16.msra.mxu3 %v7317_v20  ;;  %4095 = vmatpush.bf16.msrb.mxu0 %v7323_v22 }
 0x3cc   : > { %v3156_v53 = vadd.f32 %v3155_v49, %v3127_v5  ;;  %v3228_v33 = vmax.f32 %v3193_v8, %v3212_v57  ;;  %v3412_v27 = vunpack.c.l.b16 %v3312_v56  ;;  %v7359_v5 = vld [vmem:[%s9519_s7 + $0x220] sm:$0xff]  ;;  %v7350_v57 = vld [vmem:[%s9519_s7 + $0x1d8] sm:$0xff] }
 0x3cd   : > { %v7351_v8 = vld [vmem:[%s9519_s7 + $0x1e0] sm:$0xff] }
 0x3ce   : > { %v3165_v46 = vmax.f32 %v3156_v53, 0.0 }
 0x3cf   : > { %v8879_v35 = vld [vmem:[#allocation3 + $0x18] sm:$0xf]  ;;  %4080 = vmatpush.bf16.msra.mxu3 %v7316_v15  ;;  %4144 = vmatpush.bf16.msra.mxu0 %v7362_v40 }
 0x3d0   : > { %3273 = vst [vmem:[#allocation1 + $0x11] ss:$2 sm:$0xff] %v8879_v35  ;;  %v3197_v30 = vperm.slane %v3165_v46, %v7840_v42  ;;  %v8909_v39 = vld [vmem:[#allocation3 + $0x19] sm:$0xf] }
 0x3d1   : > { %v8939_v48 = vld [vmem:[#allocation3 + $0x1a] sm:$0xf] }
 0x3d2   : > { %v3213_v34 = vrot.slane %v3197_v30, 4  ;;  %v8895_v42 = vld.sshfl [vmem:[#allocation1] sm:$0xff pattern:$0x75316420] }
 0x3d3   : > { %3329 = vst [vmem:[#allocation1] ss:$2 sm:$0xff] %v8797_v12  ;;  %4081 = vmatpush.bf16.msra.mxu3 %v7315_v43  ;;  %4145 = vmatpush.bf16.msra.mxu0 %v7361_v23  ;;  %v3326_v53 = vpack.c.bf16 %v8895_v42, %v8895_v42 }
 0x3d4   : > { %v3229_v44 = vmax.f32 %v3197_v30, %v3213_v34  ;;  %3331 = vst [vmem:[#allocation1 + $0x1] ss:$2 sm:$0xff] %v8897_v38  ;;  %v7358_v30 = vld [vmem:[%s9519_s7 + $0x218] sm:$0xff] }
 0x3d5   : > { %v3418_v15 = vunpack.c.l.b16 %v3326_v53  ;;  %v7367_v53 = vld [vmem:[%s9521_s9 + $0x20] sm:$0xff] }
 0x3d6   : > { %v3233_v37 = vmax.f32 %v3228_v33, %v3229_v44 }
 0x3d7   : > { %v3275_v41 = vld.sshfl [vmem:[#allocation1 + $0x10] sm:$0xff pattern:$0x75316420]  ;;  %4146 = vmatpush.bf16.msra.mxu0 %v7360_v4  ;;  %v7386_v4 = vld [vmem:[%s9521_s9 + $0xb8] sm:$0xff] }
 0x3d8   : > { %3288 = vst [vmem:[#allocation1 + $0x10] ss:$2 sm:$0xff] %v8897_v38  ;;  %v3279_v12 = vpack.c.bf16 %v3275_v41, %v3275_v41 }
 0x3d9   : > { %3290 = vst [vmem:[#allocation1 + $0x11] ss:$2 sm:$0xff] %v8909_v39 }
 0x3da   : > { %3244 = vst [vmem:[#allocation3 + $0x21] sm:$0xf] %v3233_v37  ;;  %v3401_v25 = vunpack.c.l.b16 %v3279_v12  ;;  %v7348_v37 = vld [vmem:[%s9519_s7 + $0x1c8] sm:$0xff]  ;;  %v7355_v12 = vld [vmem:[%s9519_s7 + $0x200] sm:$0xff] }
 0x3db   : > { %v8925_v26 = vld.sshfl [vmem:[#allocation1] sm:$0xff pattern:$0x75316420]  ;;  %4147 = vmatpush.bf16.msra.mxu0 %v7359_v5  ;;  %v7385_v5 = vld [vmem:[%s9521_s9 + $0xb0] sm:$0xff] }
 0x3dc   : > { %v3402_v32 = vpack.c.b16 %v3401_v25, %v3400_v45  ;;  %3343 = vst [vmem:[#allocation1] ss:$2 sm:$0xff] %v8832_v21  ;;  %v7332_v21 = vld [vmem:[%s9519_s7 + $0x148] sm:$0xff]  ;;  %v3340_v55 = vpack.c.bf16 %v8925_v26, %v8925_v26  ;;  %v3250_v45 = vld [vmem:[#allocation3 + $0x28] sm:$0xf] }
 0x3dd   : > { %3345 = vst [vmem:[#allocation1 + $0x1] ss:$2 sm:$0xff] %v8927_v10  ;;  %4108 = vmatpush.bf16.msra.mxu1 %v7332_v21 }
 0x3de   : > { %4040 = vmatmul.bf16.vlgmr.msrb.gmra.mxu2 %v3402_v32  ;;  %v3424_v41 = vunpack.c.l.b16 %v3340_v55  ;;  %v7372_v55 = vld [vmem:[%s9521_s9 + $0x48] sm:$0xff] }
 0x3df   : > { %4116 = vmatpush.bf16.msrb.mxu2 %v7346_v28  ;;  %4148 = vmatpush.bf16.msra.mxu0 %v7358_v30  ;;  %v7374_v30 = vld [vmem:[%s9521_s9 + $0x58] sm:$0xff] }
 0x3e0   : > { %v3292_v24 = vld.sshfl [vmem:[#allocation1 + $0x10] sm:$0xff pattern:$0x75316420] }
 0x3e1   : > { %3305 = vst [vmem:[#allocation1 + $0x10] ss:$2 sm:$0xff] %v8927_v10  ;;  %v3296_v61 = vpack.c.bf16 %v3292_v24, %v3292_v24  ;;  %4109 = vmatpush.bf16.msra.mxu1 %v7331_v16  ;;  %v3255_v17 = vld [vmem:[#allocation3 + $0x21] sm:$0xf] }
 0x3e2   : > { %3307 = vst [vmem:[#allocation1 + $0x11] ss:$2 sm:$0xff] %v8939_v48  ;;  %v3261_v44 = vld [vmem:[#allocation3 + $0x22] sm:$0xf] }
 0x3e3   : > { %v3407_v18 = vunpack.c.l.b16 %v3296_v61  ;;  %4117 = vmatpush.bf16.msrb.mxu2 %v7345_v60  ;;  %4149 = vmatpush.bf16.msra.mxu0 %v7357_v3  ;;  %v7390_v3 = vld [vmem:[%s9521_s9 + $0xd8] sm:$0xff] }
 0x3e4   : > { %v8961_v9 = vld.sshfl [vmem:[#allocation1] sm:$0xff pattern:$0x75316420] }
 0x3e5   : > { %v3408_v11 = vpack.c.b16 %v3407_v18, %v3406_v31  ;;  %3357 = vst [vmem:[#allocation1] ss:$2 sm:$0xff] %v8834_v19  ;;  %v8974_v19 = vld [vmem:[#allocation3 + $0x20] sm:$0xf]  ;;  %v3354_v25 = vpack.c.bf16 %v8961_v9, %v8961_v9  ;;  %v3262_v18 = vld [vmem:[#allocation3 + $0x2a] sm:$0xf] }
 0x3e6   : > { %3359 = vst [vmem:[#allocation1 + $0x1] ss:$2 sm:$0xff] %v8879_v35 }
 0x3e7   : > { %4054 = vmatmul.bf16.vlgmr.msrb.gmra.mxu3 %v3408_v11  ;;  %4118 = vmatpush.bf16.msrb.mxu2 %v7344_v59  ;;  %v3430_v26 = vunpack.c.l.b16 %v3354_v25  ;;  %v7409_v25 = vld [vmem:[%s9521_s9 + $0x170] sm:$0xff] }
 0x3e8   : > { %4130 = vmatpush.bf16.msrb.mxu3 %v7354_v14  ;;  %4150 = vmatpush.bf16.msra.mxu0 %v7356_v13  ;;  %v7371_v13 = vld [vmem:[%s9521_s9 + $0x40] sm:$0xff] }
 0x3e9   : > { %v3309_v52 = vld.sshfl [vmem:[#allocation1 + $0x10] sm:$0xff pattern:$0x75316420] }
 0x3ea   : > { %3319 = vst [vmem:[#allocation1 + $0x10] ss:$2 sm:$0xff] %v8879_v35  ;;  %v3313_v1 = vpack.c.bf16 %v3309_v52, %v3309_v52  ;;  %v7340_v35 = vld [vmem:[%s9519_s7 + $0x188] sm:$0xff] }
 0x3eb   : > { %3321 = vst [vmem:[#allocation1 + $0x11] ss:$2 sm:$0xff] %v8974_v19  ;;  %4119 = vmatpush.bf16.msrb.mxu2 %v7343_v2 }
 0x3ec   : > { %v3413_v50 = vunpack.c.l.b16 %v3313_v1  ;;  %4131 = vmatpush.bf16.msrb.mxu3 %v7353_v6  ;;  %4151 = vmatpush.bf16.msra.mxu0 %v7355_v12  ;;  %v7370_v1 = vld [vmem:[%s9521_s9 + $0x38] sm:$0xff] }
 0x3ed   : > { %v8989_v54 = vld.sshfl [vmem:[#allocation1] sm:$0xff pattern:$0x75316420]  ;;  %5240 = vmatpush.bf16.msrb.mxu1 %v7370_v1  ;;  %v7418_v12 = vld [vmem:[%s9521_s9 + $0x1b8] sm:$0xff]  ;;  %v7420_v1 = vld [vmem:[%s9521_s9 + $0x1c8] sm:$0xff] }
 0x3ee   : > { %v3414_v49 = vpack.c.b16 %v3413_v50, %v3412_v27  ;;  %3371 = vst [vmem:[#allocation1] ss:$2 sm:$0xff] %v8897_v38  ;;  %v7349_v38 = vld [vmem:[%s9519_s7 + $0x1d0] sm:$0xff]  ;;  %v3368_v29 = vpack.c.bf16 %v8989_v54, %v8989_v54  ;;  %v7394_v27 = vld [vmem:[%s9521_s9 + $0xf8] sm:$0xff] }
 0x3ef   : > { %4120 = vmatpush.bf16.msrb.mxu2 %v7342_v51  ;;  %3373 = vst [vmem:[#allocation1 + $0x1] ss:$2 sm:$0xff] %v8909_v39  ;;  %v7378_v51 = vld [vmem:[%s9521_s9 + $0x78] sm:$0xff]  ;;  %v7369_v50 = vld [vmem:[%s9521_s9 + $0x30] sm:$0xff] }
 0x3f0   : > { %4068 = vmatmul.bf16.vlgmr.msra.gmra.mxu2 %v3414_v49  ;;  %4132 = vmatpush.bf16.msrb.mxu3 %v7352_v63  ;;  %v7377_v63 = vld [vmem:[%s9521_s9 + $0x70] sm:$0xff]  ;;  %v7368_v49 = vld [vmem:[%s9521_s9 + $0x28] sm:$0xff] }
 0x3f1   : > { %5241 = vmatpush.bf16.msrb.mxu1 %v7369_v50  ;;  %v7393_v54 = vld [vmem:[%s9521_s9 + $0xf0] sm:$0xff]  ;;  %v7543_v50 = vld [vmem:[%s9520_s8] ss:$0 sm:$0xff] }
 0x3f2   : > { %v3323_v20 = vld.sshfl [vmem:[#allocation1 + $0x10] sm:$0xff pattern:$0x75316420] }
 0x3f3   : > { %v3327_v46 = vpack.c.bf16 %v3323_v20, %v3323_v20  ;;  %3333 = vst [vmem:[#allocation1 + $0x10] ss:$2 sm:$0xff] %v8909_v39  ;;  %4121 = vmatpush.bf16.msrb.mxu2 %v7341_v36  ;;  %v7376_v36 = vld [vmem:[%s9521_s9 + $0x68] sm:$0xff] }
 0x3f4   : > { %3335 = vst [vmem:[#allocation1 + $0x11] ss:$2 sm:$0xff] %v3255_v17  ;;  %4133 = vmatpush.bf16.msrb.mxu3 %v7351_v8  ;;  %v7384_v8 = vld [vmem:[%s9521_s9 + $0xa8] sm:$0xff] }
 0x3f5   : > { %v3419_v47 = vunpack.c.l.b16 %v3327_v46  ;;  %5242 = vmatpush.bf16.msrb.mxu1 %v7368_v49  ;;  %v7392_v20 = vld [vmem:[%s9521_s9 + $0xe8] sm:$0xff]  ;;  %v7383_v46 = vld [vmem:[%s9521_s9 + $0xa0] sm:$0xff] }
 0x3f6   : > { %v3378_v42 = vld.sshfl [vmem:[#allocation1] sm:$0xff pattern:$0x75316420] }
 0x3f7   : > { %v3420_v34 = vpack.c.b16 %v3419_v47, %v3418_v15  ;;  %4122 = vmatpush.bf16.msrb.mxu2 %v7340_v35  ;;  %3385 = vst [vmem:[#allocation1] ss:$2 sm:$0xff] %v8927_v10  ;;  %v3382_v31 = vpack.c.bf16 %v3378_v42, %v3378_v42  ;;  %v7366_v35 = vld [vmem:[%s9521_s9 + $0x18] sm:$0xff]  ;;  %v7365_v47 = vld [vmem:[%s9521_s9 + $0x10] sm:$0xff]  ;;  %v7364_v42 = vld [vmem:[%s9521_s9 + $0x8] sm:$0xff] }
 0x3f8   : > { %4134 = vmatpush.bf16.msrb.mxu3 %v7350_v57  ;;  %3387 = vst [vmem:[#allocation1 + $0x1] ss:$2 sm:$0xff] %v8939_v48  ;;  %v7391_v57 = vld [vmem:[%s9521_s9 + $0xe0] sm:$0xff]  ;;  %v7382_v15 = vld [vmem:[%s9521_s9 + $0x98] sm:$0xff] }
 0x3f9   : > { %4082 = vmatmul.bf16.vlgmr.msra.gmra.mxu3 %v3420_v34  ;;  %v3442_v14 = vunpack.c.l.b16 %v3382_v31  ;;  %5243 = vmatpush.bf16.msrb.mxu1 %v7367_v53  ;;  %v7373_v34 = vld [vmem:[%s9521_s9 + $0x50] sm:$0xff]  ;;  %v7423_v31 = vld [vmem:[%s9521_s9 + $0x1e0] sm:$0xff] }
 0x3fb   : > { %v3337_v33 = vld.sshfl [vmem:[#allocation1 + $0x10] sm:$0xff pattern:$0x75316420]  ;;  %4123 = vmatpush.bf16.msrb.mxu2 %v7339_v7 }
 0x3fc   : > { %v3341_v43 = vpack.c.bf16 %v3337_v33, %v3337_v33  ;;  %3347 = vst [vmem:[#allocation1 + $0x10] ss:$2 sm:$0xff] %v8939_v48  ;;  %4135 = vmatpush.bf16.msrb.mxu3 %v7349_v38  ;;  %v3436_v48 = vunpack.c.l.b16 %v3368_v29  ;;  %v7381_v7 = vld [vmem:[%s9521_s9 + $0x90] sm:$0xff]  ;;  %v7380_v33 = vld [vmem:[%s9521_s9 + $0x88] sm:$0xff] }
 0x3fd   : > { %3349 = vst [vmem:[#allocation1 + $0x11] ss:$2 sm:$0xff] %v3261_v44  ;;  %5244 = vmatpush.bf16.msrb.mxu1 %v7366_v35  ;;  %v7389_v38 = vld [vmem:[%s9521_s9 + $0xd0] sm:$0xff] }
 0x3fe   : > { %v3425_v39 = vunpack.c.l.b16 %v3341_v43  ;;  %v7388_v43 = vld [vmem:[%s9521_s9 + $0xc8] sm:$0xff] }
 0x3ff   : > { %v3392_v23 = vld.sshfl [vmem:[#allocation1] sm:$0xff pattern:$0x75316420]  ;;  %5253 = vmatpush.bf16.msra.mxu2 %v7378_v51 }
 0x400   : > { %v3426_v58 = vpack.c.b16 %v3425_v39, %v3424_v41  ;;  %4136 = vmatpush.bf16.msrb.mxu3 %v7348_v37  ;;  %v3396_v9 = vpack.c.bf16 %v3392_v23, %v3392_v23  ;;  %v7402_v37 = vld [vmem:[%s9521_s9 + $0x138] sm:$0xff]  ;;  %v7379_v41 = vld [vmem:[%s9521_s9 + $0x80] sm:$0xff]  ;;  %v7413_v23 = vld [vmem:[%s9521_s9 + $0x190] sm:$0xff] }
 0x401   : > { %5245 = vmatpush.bf16.msrb.mxu1 %v7365_v47  ;;  %v7410_v39 = vld [vmem:[%s9521_s9 + $0x178] sm:$0xff] }
 0x402   : > { %4096 = vmatmul.bf16.vlgmr.msrb.gmra.mxu0 %v3426_v58  ;;  %v3448_v6 = vunpack.c.l.b16 %v3396_v9  ;;  %v7387_v58 = vld [vmem:[%s9521_s9 + $0xc0] sm:$0xff] }
 0x403   : > { %5279 = vmatpush.bf16.msrb.mxu0 %v7394_v27  ;;  %5254 = vmatpush.bf16.msra.mxu2 %v7377_v63  ;;  %v7411_v27 = vld [vmem:[%s9521_s9 + $0x180] sm:$0xff] }
 0x404   : > { %v3351_v28 = vld.sshfl [vmem:[#allocation1 + $0x10] sm:$0xff pattern:$0x75316420]  ;;  %4137 = vmatpush.bf16.msrb.mxu3 %v7347_v62  ;;  %v7419_v63 = vld [vmem:[%s9521_s9 + $0x1c0] sm:$0xff] }
 0x405   : > { %v3355_v22 = vpack.c.bf16 %v3351_v28, %v3351_v28  ;;  %3361 = vst [vmem:[#allocation1 + $0x10] ss:$2 sm:$0xff] %v8974_v19  ;;  %5246 = vmatpush.bf16.msrb.mxu1 %v7364_v42  ;;  %v7401_v62 = vld [vmem:[%s9521_s9 + $0x130] sm:$0xff] }
 0x406   : > { %3363 = vst [vmem:[#allocation1 + $0x11] ss:$2 sm:$0xff] %v3250_v45  ;;  %v7426_v45 = vld [vmem:[%s9521_s9 + $0x1f8] sm:$0xff]  ;;  %v7417_v28 = vld [vmem:[%s9521_s9 + $0x1b0] sm:$0xff] }
 0x407   : > { %v3431_v10 = vunpack.c.l.b16 %v3355_v22  ;;  %5280 = vmatpush.bf16.msrb.mxu0 %v7393_v54  ;;  %5255 = vmatpush.bf16.msra.mxu2 %v7376_v36  ;;  %v7400_v22 = vld [vmem:[%s9521_s9 + $0x128] sm:$0xff] }
 0x408   : > { %5266 = vmatpush.bf16.msra.mxu3 %v7386_v4  ;;  %v7403_v4 = vld [vmem:[%s9521_s9 + $0x140] sm:$0xff] }
 0x409   : > { %v3432_v32 = vpack.c.b16 %v3431_v10, %v3430_v26  ;;  %v7425_v26 = vld [vmem:[%s9521_s9 + $0x1f0] sm:$0xff]  ;;  %v7408_v10 = vld [vmem:[%s9521_s9 + $0x168] sm:$0xff] }
 0x40b   : > { %4110 = vmatmul.bf16.vlgmr.msra.gmra.mxu1 %v3432_v32  ;;  %5281 = vmatpush.bf16.msrb.mxu0 %v7392_v20  ;;  %v7416_v32 = vld [vmem:[%s9521_s9 + $0x1a8] sm:$0xff] }
 0x40c   : > { %5267 = vmatpush.bf16.msra.mxu3 %v7385_v5 }
 0x40d   : > { %v3365_v60 = vld.sshfl [vmem:[#allocation1 + $0x10] sm:$0xff pattern:$0x75316420] }
 0x40e   : > { %v3369_v24 = vpack.c.bf16 %v3365_v60, %v3365_v60  ;;  %3375 = vst [vmem:[#allocation1 + $0x10] ss:$2 sm:$0xff] %v3255_v17  ;;  %v7375_v17 = vld [vmem:[%s9521_s9 + $0x60] sm:$0xff]  ;;  %v7424_v60 = vld [vmem:[%s9521_s9 + $0x1e8] sm:$0xff] }
 0x40f   : > { %3377 = vst [vmem:[#allocation1 + $0x11] ss:$2 sm:$0xff] %v3256_v0  ;;  %5256 = vmatpush.bf16.msra.mxu2 %v7375_v17  ;;  %5282 = vmatpush.bf16.msrb.mxu0 %v7391_v57  ;;  %v7399_v0 = vld [vmem:[%s9521_s9 + $0x120] sm:$0xff] }
 0x410   : > { %v3437_v61 = vunpack.c.l.b16 %v3369_v24  ;;  %5268 = vmatpush.bf16.msra.mxu3 %v7384_v8  ;;  %v7407_v24 = vld [vmem:[%s9521_s9 + $0x160] sm:$0xff] }
 0x412   : > { %v3438_v21 = vpack.c.b16 %v3437_v61, %v3436_v48  ;;  %v7415_v48 = vld [vmem:[%s9521_s9 + $0x1a0] sm:$0xff] }
 0x413   : > { %5257 = vmatpush.bf16.msra.mxu2 %v7374_v30  ;;  %5283 = vmatpush.bf16.msrb.mxu0 %v7390_v3 }
 0x414   : > { %4124 = vmatmul.bf16.vlgmr.msrb.gmra.mxu2 %v3438_v21  ;;  %5269 = vmatpush.bf16.msra.mxu3 %v7383_v46  ;;  %v7398_v21 = vld [vmem:[%s9521_s9 + $0x118] sm:$0xff] }
 0x416   : > { %v3379_v59 = vld.sshfl [vmem:[#allocation1 + $0x10] sm:$0xff pattern:$0x75316420] }
 0x417   : > { %v3383_v40 = vpack.c.bf16 %v3379_v59, %v3379_v59  ;;  %3389 = vst [vmem:[#allocation1 + $0x10] ss:$2 sm:$0xff] %v3261_v44  ;;  %5258 = vmatpush.bf16.msra.mxu2 %v7373_v34  ;;  %5284 = vmatpush.bf16.msrb.mxu0 %v7389_v38  ;;  %v7363_v44 = vld [vmem:[%s9521_s9] sm:$0xff]  ;;  %v7414_v59 = vld [vmem:[%s9521_s9 + $0x198] sm:$0xff] }
 0x418   : > { %3391 = vst [vmem:[#allocation1 + $0x11] ss:$2 sm:$0xff] %v3262_v18  ;;  %5270 = vmatpush.bf16.msra.mxu3 %v7382_v15  ;;  %5247 = vmatpush.bf16.msrb.mxu1 %v7363_v44  ;;  %v7406_v18 = vld [vmem:[%s9521_s9 + $0x158] sm:$0xff] }
 0x419   : > { %v3443_v16 = vunpack.c.l.b16 %v3383_v40  ;;  %v7434_v44 = vld [vmem:[%s9521_s9 + $0x238] sm:$0xff] }
 0x41b   : > { %v3444_v11 = vpack.c.b16 %v3443_v16, %v3442_v14  ;;  %5259 = vmatpush.bf16.msra.mxu2 %v7372_v55  ;;  %5285 = vmatpush.bf16.msrb.mxu0 %v7388_v43  ;;  %v7397_v14 = vld [vmem:[%s9521_s9 + $0x110] sm:$0xff]  ;;  %v7422_v16 = vld [vmem:[%s9521_s9 + $0x1d8] sm:$0xff] }
 0x41c   : > { %5271 = vmatpush.bf16.msra.mxu3 %v7381_v7  ;;  %5292 = vmatpush.bf16.msra.mxu1 %v7402_v37 }
 0x41d   : > { %4138 = vmatmul.bf16.vlgmr.msrb.gmra.mxu3 %v3444_v11  ;;  %v7405_v11 = vld [vmem:[%s9521_s9 + $0x150] sm:$0xff] }
 0x41f   : > { %v3393_v2 = vld.sshfl [vmem:[#allocation1 + $0x10] sm:$0xff pattern:$0x75316420]  ;;  %5260 = vmatpush.bf16.msra.mxu2 %v7371_v13  ;;  %5286 = vmatpush.bf16.msrb.mxu0 %v7387_v58 }
 0x420   : > { %v3397_v56 = vpack.c.bf16 %v3393_v2, %v3393_v2  ;;  %5272 = vmatpush.bf16.msra.mxu3 %v7380_v33  ;;  %5293 = vmatpush.bf16.msra.mxu1 %v7401_v62  ;;  %v7396_v2 = vld [vmem:[%s9521_s9 + $0x108] sm:$0xff] }
 0x422   : > { %v3449_v52 = vunpack.c.l.b16 %v3397_v56  ;;  %v7421_v56 = vld [vmem:[%s9521_s9 + $0x1d0] sm:$0xff] }
 0x423   : > { %5305 = vmatpush.bf16.msrb.mxu2 %v7410_v39  ;;  %v7442_v39 = vld [vmem:[%s9521_s9 + $0x278] sm:$0xff] }
 0x424   : > { %v3450_v19 = vpack.c.b16 %v3449_v52, %v3448_v6  ;;  %5273 = vmatpush.bf16.msra.mxu3 %v7379_v41  ;;  %5294 = vmatpush.bf16.msra.mxu1 %v7400_v22  ;;  %v7404_v6 = vld [vmem:[%s9521_s9 + $0x148] sm:$0xff]  ;;  %v7458_v22 = vld [vmem:[%s9521_s9 + $0x2f8] sm:$0xff] }
 0x425   : > { %v7412_v52 = vld [vmem:[%s9521_s9 + $0x188] sm:$0xff] }
 0x426   : > { %4152 = vmatmul.bf16.vlgmr.msra.gmra.mxu0 %v3450_v19  ;;  %v7395_v19 = vld [vmem:[%s9521_s9 + $0x100] sm:$0xff] }
 0x427   : > { %5331 = vmatpush.bf16.msra.mxu0 %v7426_v45  ;;  %5306 = vmatpush.bf16.msrb.mxu2 %v7409_v25 }
 0x428   : > { %5318 = vmatpush.bf16.msrb.mxu3 %v7418_v12  ;;  %5295 = vmatpush.bf16.msra.mxu1 %v7399_v0  ;;  %v7450_v12 = vld [vmem:[%s9521_s9 + $0x2b8] sm:$0xff]  ;;  %v7449_v0 = vld [vmem:[%s9521_s9 + $0x2b0] sm:$0xff] }
 0x42b   : > { %5332 = vmatpush.bf16.msra.mxu0 %v7425_v26  ;;  %5307 = vmatpush.bf16.msrb.mxu2 %v7408_v10 }
 0x42c   : > { %5319 = vmatpush.bf16.msrb.mxu3 %v7417_v28  ;;  %5296 = vmatpush.bf16.msra.mxu1 %v7398_v21  ;;  %v7433_v28 = vld [vmem:[%s9521_s9 + $0x230] sm:$0xff] }
 0x42f   : > { %5333 = vmatpush.bf16.msra.mxu0 %v7424_v60  ;;  %5308 = vmatpush.bf16.msrb.mxu2 %v7407_v24  ;;  %v7432_v24 = vld [vmem:[%s9521_s9 + $0x228] sm:$0xff] }
 0x430   : > { %5320 = vmatpush.bf16.msrb.mxu3 %v7416_v32  ;;  %5297 = vmatpush.bf16.msra.mxu1 %v7397_v14 }
 0x433   : > { %5334 = vmatpush.bf16.msra.mxu0 %v7423_v31  ;;  %5309 = vmatpush.bf16.msrb.mxu2 %v7406_v18  ;;  %v7440_v18 = vld [vmem:[%s9521_s9 + $0x268] sm:$0xff] }
 0x434   : > { %5321 = vmatpush.bf16.msrb.mxu3 %v7415_v48  ;;  %5298 = vmatpush.bf16.msra.mxu1 %v7396_v2  ;;  %v7457_v48 = vld [vmem:[%s9521_s9 + $0x2f0] sm:$0xff]  ;;  %v7447_v2 = vld [vmem:[%s9521_s9 + $0x2a0] sm:$0xff] }
 0x437   : > { %5335 = vmatpush.bf16.msra.mxu0 %v7422_v16  ;;  %5310 = vmatpush.bf16.msrb.mxu2 %v7405_v11  ;;  %v7431_v16 = vld [vmem:[%s9521_s9 + $0x220] sm:$0xff]  ;;  %v7456_v11 = vld [vmem:[%s9521_s9 + $0x2e8] sm:$0xff] }
 0x438   : > { %5322 = vmatpush.bf16.msrb.mxu3 %v7414_v59  ;;  %5299 = vmatpush.bf16.msra.mxu1 %v7395_v19  ;;  %v7448_v59 = vld [vmem:[%s9521_s9 + $0x2a8] sm:$0xff]  ;;  %v7430_v19 = vld [vmem:[%s9521_s9 + $0x218] sm:$0xff] }
 0x43b   : > { %5336 = vmatpush.bf16.msra.mxu0 %v7421_v56  ;;  %5311 = vmatpush.bf16.msrb.mxu2 %v7404_v6 }
 0x43c   : > { %5323 = vmatpush.bf16.msrb.mxu3 %v7413_v23 }
 0x43f   : > { %5337 = vmatpush.bf16.msra.mxu0 %v7420_v1  ;;  %5312 = vmatpush.bf16.msrb.mxu2 %v7403_v4  ;;  %v7455_v1 = vld [vmem:[%s9521_s9 + $0x2e0] sm:$0xff] }
 0x440   : > { %5324 = vmatpush.bf16.msrb.mxu3 %v7412_v52 }
 0x443   : > { %5338 = vmatpush.bf16.msra.mxu0 %v7419_v63 }
 0x444   : > { %5325 = vmatpush.bf16.msrb.mxu3 %v7411_v27  ;;  %v7438_v27 = vld [vmem:[%s9521_s9 + $0x258] sm:$0xff] }
 0x461   : > { %v4041_v29 = vpop.f32.mrf.mxu2 }
 0x462   : > { %v4042_v49 = vadd.f32 %v7543_v50, %v4041_v29  ;;  %v7441_v29 = vld [vmem:[%s9521_s9 + $0x270] sm:$0xff] }
 0x469   : > { %v4043_v40 = vpop.f32.mrf.mxu2 }
 0x46a   : > { %v4055_v61 = vpop.f32.mrf.mxu3  ;;  %v4044_v55 = vadd.f32 %v7543_v50, %v4043_v40  ;;  %v7446_v50 = vld [vmem:[%s9521_s9 + $0x298] sm:$0xff] }
 0x46b   : > { %v4056_v36 = vadd.f32 %v4055_v61, %v4042_v49 }
 0x472   : > { %v4057_v9 = vpop.f32.mrf.mxu3 }
 0x473   : > { %v4069_v51 = vpop.f32.mrf.mxu2  ;;  %v4058_v43 = vadd.f32 %v4057_v9, %v4044_v55  ;;  %v7439_v9 = vld [vmem:[%s9521_s9 + $0x260] sm:$0xff] }
 0x474   : > { %v4070_v53 = vadd.f32 %v4069_v51, %v4056_v36  ;;  %v7429_v36 = vld [vmem:[%s9521_s9 + $0x210] sm:$0xff] }
 0x47b   : > { %v4071_v8 = vpop.f32.mrf.mxu2 }
 0x47c   : > { %v4083_v5 = vpop.f32.mrf.mxu3  ;;  %v4072_v58 = vadd.f32 %v4071_v8, %v4058_v43  ;;  %v7454_v8 = vld [vmem:[%s9521_s9 + $0x2d8] sm:$0xff]  ;;  %v7451_v43 = vld [vmem:[%s9521_s9 + $0x2c0] sm:$0xff] }
 0x47d   : > { %v4084_v20 = vadd.f32 %v4083_v5, %v4070_v53 }
 0x47f   : > { %v4097_v54 = vpop.f32.mrf.mxu0 }
 0x480   : > { %v4098_v35 = vadd.f32 %v4097_v54, %v4084_v20  ;;  %v7437_v20 = vld [vmem:[%s9521_s9 + $0x250] sm:$0xff] }
 0x484   : > { %v4085_v17 = vpop.f32.mrf.mxu3 }
 0x485   : > { %v4086_v26 = vadd.f32 %v4085_v17, %v4072_v58  ;;  %v7445_v17 = vld [vmem:[%s9521_s9 + $0x290] sm:$0xff] }
 0x486   : > { %v7481_v58 = vld [vmem:[%s9521_s9 + $0x3b0] sm:$0xff] }
 0x487   : > { %v4099_v57 = vpop.f32.mrf.mxu0 }
 0x488   : > { %v4111_v46 = vpop.f32.mrf.mxu1  ;;  %v4100_v61 = vadd.f32 %v4099_v57, %v4086_v26  ;;  %v7453_v57 = vld [vmem:[%s9521_s9 + $0x2d0] sm:$0xff] }
 0x489   : > { %v4112_v15 = vadd.f32 %v4111_v46, %v4098_v35  ;;  %v7428_v35 = vld [vmem:[%s9521_s9 + $0x208] sm:$0xff] }
 0x490   : > { %v4113_v60 = vpop.f32.mrf.mxu1 }
 0x491   : > { %v4114_v40 = vadd.f32 %v4113_v60, %v4100_v61  ;;  %v7471_v60 = vld [vmem:[%s9521_s9 + $0x360] sm:$0xff] }
 0x492   : > { %v7487_v61 = vld [vmem:[%s9521_s9 + $0x3e0] sm:$0xff] }
 0x497   : > { %v4125_v30 = vpop.f32.mrf.mxu2 }
 0x498   : > { %v4126_v47 = vadd.f32 %v4125_v30, %v4112_v15  ;;  %v7436_v30 = vld [vmem:[%s9521_s9 + $0x248] sm:$0xff] }
 0x499   : > { %v7444_v15 = vld [vmem:[%s9521_s9 + $0x288] sm:$0xff] }
 0x49f   : > { %v4127_v21 = vpop.f32.mrf.mxu2 }
 0x4a0   : > { %v4139_v3 = vpop.f32.mrf.mxu3  ;;  %v4128_v23 = vadd.f32 %v4127_v21, %v4114_v40  ;;  %v7470_v21 = vld [vmem:[%s9521_s9 + $0x358] sm:$0xff] }
 0x4a1   : > { %v4140_v34 = vadd.f32 %v4139_v3, %v4126_v47  ;;  %v7427_v3 = vld [vmem:[%s9521_s9 + $0x200] sm:$0xff] }
 0x4a3   : > { %v4153_v7 = vpop.f32.mrf.mxu0 }
 0x4a4   : > { %v4154_v42 = vadd.f32 %v4153_v7, %v4140_v34  ;;  %v7452_v34 = vld [vmem:[%s9521_s9 + $0x2c8] sm:$0xff]  ;;  %v7466_v7 = vld [vmem:[%s9521_s9 + $0x338] sm:$0xff] }
 0x4a6   : > { %v4158_v38 = vmax.f32 %v4154_v42, 0.0  ;;  %v7435_v42 = vld [vmem:[%s9521_s9 + $0x240] sm:$0xff] }
 0x4a8   : > { %v4166_v33 = vpack.c.bf16 %v4158_v38, %v4158_v38  ;;  %v4162_v10 = vrot.slane %v4158_v38, 4  ;;  %v4141_v14 = vpop.f32.mrf.mxu3  ;;  %v7443_v38 = vld [vmem:[%s9521_s9 + $0x280] sm:$0xff] }
 0x4a9   : > { %v4142_v6 = vadd.f32 %v4141_v14, %v4128_v23  ;;  %v7469_v14 = vld [vmem:[%s9521_s9 + $0x350] sm:$0xff] }
 0x4aa   : > { %v4173_v37 = vshrl.u32 %v4166_v33, 16  ;;  %v4176_v13 = vrot.slane %v4166_v33, 1  ;;  %v4171_v41 = vsel %vm4170_vm0, %v4166_v33, 0  ;;  %v4167_v31 = vpack.c.bf16 %v4162_v10, %v4162_v10  ;;  %v7474_v33 = vld [vmem:[%s9521_s9 + $0x378] sm:$0xff]  ;;  %v7472_v10 = vld [vmem:[%s9521_s9 + $0x368] sm:$0xff]  ;;  %v7485_v23 = vld [vmem:[%s9521_s9 + $0x3d0] sm:$0xff] }
 0x4ab   : > { %5248 = vmatmul.bf16.vlgmr.msrb.gmra.mxu1 %v4171_v41  ;;  %v4155_v52 = vpop.f32.mrf.mxu0  ;;  %v7490_v41 = vld [vmem:[%s9521_s9 + $0x3f8] sm:$0xff] }
 0x4ac   : > { %5344 = vmatpush.bf16.msrb.mxu1 %v7434_v44  ;;  %v4175_v62 = vsel %vm4170_vm0, %v4173_v37, 0  ;;  %v4177_v45 = vsel %vm4170_vm0, %v4176_v13, 0  ;;  %v4179_v25 = vshrl.u32 %v4176_v13, 16  ;;  %v4187_v56 = vrot.slane %v4167_v31, 1  ;;  %v7482_v44 = vld [vmem:[%s9521_s9 + $0x3b8] sm:$0xff]  ;;  %v7465_v13 = vld [vmem:[%s9521_s9 + $0x330] sm:$0xff] }
 0x4ad   : > { %5261 = vmatmul.bf16.vlgmr.msra.gmra.mxu2 %v4175_v62  ;;  %5274 = vmatmul.bf16.vlgmr.msra.gmra.mxu3 %v4177_v45  ;;  %v4184_v51 = vshrl.u32 %v4167_v31, 16  ;;  %v4182_v4 = vsel %vm4170_vm0, %v4167_v31, 0  ;;  %v4156_v5 = vadd.f32 %v4155_v52, %v4142_v6  ;;  %v7478_v31 = vld [vmem:[%s9521_s9 + $0x398] sm:$0xff]  ;;  %v7459_v6 = vld [vmem:[%s9521_s9 + $0x300] sm:$0xff]  ;;  %v7484_v52 = vld [vmem:[%s9521_s9 + $0x3c8] sm:$0xff] }
 0x4ae   : > { %5357 = vmatpush.bf16.msra.mxu2 %v7442_v39  ;;  %5370 = vmatpush.bf16.msra.mxu3 %v7450_v12  ;;  %v4181_v32 = vsel %vm4170_vm0, %v4179_v25, 0  ;;  %v4190_v63 = vshrl.u32 %v4187_v56, 16  ;;  %v4188_v54 = vsel %vm4170_vm0, %v4187_v56, 0  ;;  %v7473_v12 = vld [vmem:[%s9521_s9 + $0x370] sm:$0xff]  ;;  %v7476_v56 = vld [vmem:[%s9521_s9 + $0x388] sm:$0xff] }
 0x4af   : > { %5287 = vmatmul.bf16.vlgmr.msrb.gmra.mxu0 %v4181_v32  ;;  %v4186_v49 = vsel %vm4170_vm0, %v4184_v51, 0  ;;  %v9314_v46 = vmax.f32 %v4156_v5, 0.0  ;;  %v7480_v32 = vld [vmem:[%s9521_s9 + $0x3a8] sm:$0xff] }
 0x4b0   : > { %5345 = vmatpush.bf16.msrb.mxu1 %v7433_v28  ;;  %5383 = vmatpush.bf16.msrb.mxu0 %v7458_v22  ;;  %v4192_v53 = vsel %vm4170_vm0, %v4190_v63, 0  ;;  %v7464_v28 = vld [vmem:[%s9521_s9 + $0x328] sm:$0xff]  ;;  %v7489_v22 = vld [vmem:[%s9521_s9 + $0x3f0] sm:$0xff] }
 0x4b1   : > { %v4168_v47 = vpack.c.bf16 %v9314_v46, %v9314_v46  ;;  %v4163_v40 = vrot.slane %v9314_v46, 4 }
 0x4b2   : > { %5358 = vmatpush.bf16.msra.mxu2 %v7441_v29  ;;  %5371 = vmatpush.bf16.msra.mxu3 %v7449_v0  ;;  %v7463_v29 = vld [vmem:[%s9521_s9 + $0x320] sm:$0xff]  ;;  %v7488_v0 = vld [vmem:[%s9521_s9 + $0x3e8] sm:$0xff] }
 0x4b3   : > { %v4198_v55 = vrot.slane %v4168_v47, 1  ;;  %v4195_v37 = vshrl.u32 %v4168_v47, 16  ;;  %v4193_v39 = vsel %vm4170_vm0, %v4168_v47, 0  ;;  %v7497_v47 = vld [vmem:[%s9523_s11 + $0x30] sm:$0xff] }
 0x4b4   : > { %5346 = vmatpush.bf16.msrb.mxu1 %v7432_v24  ;;  %5384 = vmatpush.bf16.msrb.mxu0 %v7457_v48  ;;  %v7479_v24 = vld [vmem:[%s9521_s9 + $0x3a0] sm:$0xff]  ;;  %v7462_v48 = vld [vmem:[%s9521_s9 + $0x318] sm:$0xff] }
 0x4b5   : > { %v4201_v62 = vshrl.u32 %v4198_v55, 16  ;;  %v4197_v45 = vsel %vm4170_vm0, %v4195_v37, 0  ;;  %v4199_v25 = vsel %vm4170_vm0, %v4198_v55, 0 }
 0x4b6   : > { %5359 = vmatpush.bf16.msra.mxu2 %v7440_v18  ;;  %5372 = vmatpush.bf16.msra.mxu3 %v7448_v59  ;;  %v7461_v18 = vld [vmem:[%s9521_s9 + $0x310] sm:$0xff]  ;;  %v7486_v59 = vld [vmem:[%s9521_s9 + $0x3d8] sm:$0xff] }
 0x4b7   : > { %v4203_v26 = vsel %vm4170_vm0, %v4201_v62, 0 }
 0x4b8   : > { %5347 = vmatpush.bf16.msrb.mxu1 %v7431_v16  ;;  %5385 = vmatpush.bf16.msrb.mxu0 %v7456_v11  ;;  %v7477_v16 = vld [vmem:[%s9521_s9 + $0x390] sm:$0xff]  ;;  %v7460_v11 = vld [vmem:[%s9521_s9 + $0x308] sm:$0xff] }
 0x4ba   : > { %5360 = vmatpush.bf16.msra.mxu2 %v7439_v9  ;;  %5373 = vmatpush.bf16.msra.mxu3 %v7447_v2  ;;  %v4169_v9 = vpack.c.bf16 %v4163_v40, %v4163_v40  ;;  %v7468_v2 = vld [vmem:[%s9521_s9 + $0x348] sm:$0xff] }
 0x4bb   : > { %5300 = vmatmul.bf16.vlgmr.msra.gmra.mxu1 %v4182_v4  ;;  %v7483_v4 = vld [vmem:[%s9521_s9 + $0x3c0] sm:$0xff] }
 0x4bc   : > { %5348 = vmatpush.bf16.msrb.mxu1 %v7430_v19  ;;  %5386 = vmatpush.bf16.msrb.mxu0 %v7455_v1  ;;  %v7467_v19 = vld [vmem:[%s9521_s9 + $0x340] sm:$0xff]  ;;  %v4209_v51 = vrot.slane %v4169_v9, 1 }
 0x4bd   : > { %5313 = vmatmul.bf16.vlgmr.msrb.gmra.mxu2 %v4186_v49  ;;  %5326 = vmatmul.bf16.vlgmr.msrb.gmra.mxu3 %v4188_v54  ;;  %v7475_v1 = vld [vmem:[%s9521_s9 + $0x380] sm:$0xff] }
 0x4be   : > { %5361 = vmatpush.bf16.msra.mxu2 %v7438_v27  ;;  %5374 = vmatpush.bf16.msra.mxu3 %v7446_v50  ;;  %v4206_v27 = vshrl.u32 %v4169_v9, 16  ;;  %v4204_v50 = vsel %vm4170_vm0, %v4169_v9, 0  ;;  %v4212_v63 = vshrl.u32 %v4209_v51, 16  ;;  %v4210_v49 = vsel %vm4170_vm0, %v4209_v51, 0 }
 0x4bf   : > { %5339 = vmatmul.bf16.vlgmr.msra.gmra.mxu0 %v4192_v53 }
 0x4c0   : > { %5349 = vmatpush.bf16.msrb.mxu1 %v7429_v36  ;;  %5387 = vmatpush.bf16.msrb.mxu0 %v7454_v8  ;;  %v4208_v5 = vsel %vm4170_vm0, %v4206_v27, 0  ;;  %v4214_v54 = vsel %vm4170_vm0, %v4212_v63, 0 }
 0x4c2   : > { %5362 = vmatpush.bf16.msra.mxu2 %v7437_v20  ;;  %5375 = vmatpush.bf16.msra.mxu3 %v7445_v17 }
 0x4c4   : > { %5350 = vmatpush.bf16.msrb.mxu1 %v7428_v35  ;;  %5388 = vmatpush.bf16.msrb.mxu0 %v7453_v57 }
 0x4c6   : > { %5363 = vmatpush.bf16.msra.mxu2 %v7436_v30  ;;  %5376 = vmatpush.bf16.msra.mxu3 %v7444_v15  ;;  %v7498_v30 = vld [vmem:[%s9523_s11 + $0x38] sm:$0xff] }
 0x4c8   : > { %5351 = vmatpush.bf16.msrb.mxu1 %v7427_v3  ;;  %5389 = vmatpush.bf16.msrb.mxu0 %v7452_v34  ;;  %v7496_v34 = vld [vmem:[%s9523_s11 + $0x28] sm:$0xff] }
 0x4ca   : > { %5364 = vmatpush.bf16.msra.mxu2 %v7435_v42  ;;  %5377 = vmatpush.bf16.msra.mxu3 %v7443_v38 }
 0x4cb   : > { %5352 = vmatmul.bf16.vlgmr.msrb.gmra.mxu1 %v4193_v39 }
 0x4cc   : > { %5396 = vmatpush.bf16.msra.mxu1 %v7466_v7  ;;  %5390 = vmatpush.bf16.msrb.mxu0 %v7451_v43 }
 0x4cd   : > { %5365 = vmatmul.bf16.vlgmr.msra.gmra.mxu2 %v4197_v45  ;;  %5378 = vmatmul.bf16.vlgmr.msra.gmra.mxu3 %v4199_v25  ;;  %v7492_v25 = vld [vmem:[%s9523_s11 + $0x8] sm:$0xff] }
 0x4ce   : > { %5409 = vmatpush.bf16.msrb.mxu2 %v7474_v33  ;;  %5422 = vmatpush.bf16.msrb.mxu3 %v7482_v44  ;;  %v7495_v33 = vld [vmem:[%s9523_s11 + $0x20] sm:$0xff] }
 0x4cf   : > { %5391 = vmatmul.bf16.vlgmr.msrb.gmra.mxu0 %v4203_v26  ;;  %v4471_v44 = vld [vmem:[%s9522_s10] sm:$0x1] }
 0x4d0   : > { %5397 = vmatpush.bf16.msra.mxu1 %v7465_v13  ;;  %5435 = vmatpush.bf16.msra.mxu0 %v7490_v41  ;;  %v7494_v13 = vld [vmem:[%s9523_s11 + $0x18] sm:$0xff] }
 0x4d2   : > { %5410 = vmatpush.bf16.msrb.mxu2 %v7473_v12  ;;  %5423 = vmatpush.bf16.msrb.mxu3 %v7481_v58  ;;  %v7493_v58 = vld [vmem:[%s9523_s11 + $0x10] sm:$0xff] }
 0x4d4   : > { %5398 = vmatpush.bf16.msra.mxu1 %v7464_v28  ;;  %5436 = vmatpush.bf16.msra.mxu0 %v7489_v22 }
 0x4d6   : > { %5411 = vmatpush.bf16.msrb.mxu2 %v7472_v10  ;;  %5424 = vmatpush.bf16.msrb.mxu3 %v7480_v32 }
 0x4d8   : > { %5399 = vmatpush.bf16.msra.mxu1 %v7463_v29  ;;  %5437 = vmatpush.bf16.msra.mxu0 %v7488_v0  ;;  %v7491_v29 = vld [vmem:[%s9523_s11] sm:$0xff] }
 0x4da   : > { %5412 = vmatpush.bf16.msrb.mxu2 %v7471_v60  ;;  %5425 = vmatpush.bf16.msrb.mxu3 %v7479_v24 }
 0x4dc   : > { %5400 = vmatpush.bf16.msra.mxu1 %v7462_v48  ;;  %5438 = vmatpush.bf16.msra.mxu0 %v7487_v61 }
 0x4de   : > { %5413 = vmatpush.bf16.msrb.mxu2 %v7470_v21  ;;  %5426 = vmatpush.bf16.msrb.mxu3 %v7478_v31 }
 0x4e0   : > { %5401 = vmatpush.bf16.msra.mxu1 %v7461_v18  ;;  %5439 = vmatpush.bf16.msra.mxu0 %v7486_v59 }
 0x4e2   : > { %5414 = vmatpush.bf16.msrb.mxu2 %v7469_v14  ;;  %5427 = vmatpush.bf16.msrb.mxu3 %v7477_v16 }
 0x4e4   : > { %5402 = vmatpush.bf16.msra.mxu1 %v7460_v11  ;;  %5440 = vmatpush.bf16.msra.mxu0 %v7485_v23 }
 0x4e6   : > { %5415 = vmatpush.bf16.msrb.mxu2 %v7468_v2  ;;  %5428 = vmatpush.bf16.msrb.mxu3 %v7476_v56 }
 0x4e8   : > { %5403 = vmatpush.bf16.msra.mxu1 %v7459_v6  ;;  %5441 = vmatpush.bf16.msra.mxu0 %v7484_v52 }
 0x4ea   : > { %5416 = vmatpush.bf16.msrb.mxu2 %v7467_v19  ;;  %5429 = vmatpush.bf16.msrb.mxu3 %v7475_v1 }
 0x4eb   : > { %5404 = vmatmul.bf16.vlgmr.msra.gmra.mxu1 %v4204_v50  ;;  %v5466_v50 = vld [vmem:[%s9524_s12] sm:$0x1] }
 0x4ec   : > { %5442 = vmatpush.bf16.msra.mxu0 %v7483_v4  ;;  %5515 = vmatpush.bf16.msrb.mxu1 %v7498_v30 }
 0x4ed   : > { %5417 = vmatmul.bf16.vlgmr.msrb.gmra.mxu2 %v4208_v5  ;;  %5430 = vmatmul.bf16.vlgmr.msrb.gmra.mxu3 %v4210_v49 }
 0x4ef   : > { %5443 = vmatmul.bf16.vlgmr.msra.gmra.mxu0 %v4214_v54 }
 0x4f0   : > { %5516 = vmatpush.bf16.msrb.mxu1 %v7497_v47 }
 0x4f4   : > { %5517 = vmatpush.bf16.msrb.mxu1 %v7496_v34 }
 0x4f8   : > { %5518 = vmatpush.bf16.msrb.mxu1 %v7495_v33 }
 0x4fc   : > { %5519 = vmatpush.bf16.msrb.mxu1 %v7494_v13 }
 0x500   : > { %5520 = vmatpush.bf16.msrb.mxu1 %v7493_v58 }
 0x504   : > { %5521 = vmatpush.bf16.msrb.mxu1 %v7492_v25 }
 0x508   : > { %5522 = vmatpush.bf16.msrb.mxu1 %v7491_v29 }
 0x528   : > { %v5249_v36 = vpop.f32.mrf.mxu1 }
 0x529   : > { %v5250_v43 = vadd.f32 %v5249_v36, %v4471_v44 }
 0x52c   : > { %v5288_v8 = vpop.f32.mrf.mxu0 }
 0x530   : > { %v5251_v53 = vpop.f32.mrf.mxu1  ;;  %v5262_v20 = vpop.f32.mrf.mxu2 }
 0x531   : > { %v5275_v17 = vpop.f32.mrf.mxu3  ;;  %v5263_v12 = vadd.f32 %v5262_v20, %v5250_v43 }
 0x533   : > { %v5276_v45 = vadd.f32 %v5275_v17, %v5263_v12 }
 0x534   : > { %v5290_v46 = vpop.f32.mrf.mxu0 }
 0x535   : > { %v5289_v26 = vadd.f32 %v5288_v8, %v5276_v45 }
 0x538   : > { %v5264_v35 = vpop.f32.mrf.mxu2  ;;  %v5301_v57 = vpop.f32.mrf.mxu1 }
 0x539   : > { %v5277_v15 = vpop.f32.mrf.mxu3  ;;  %v5302_v32 = vadd.f32 %v5301_v57, %v5289_v26 }
 0x53c   : > { %v5340_v3 = vpop.f32.mrf.mxu0 }
 0x540   : > { %v5303_v7 = vpop.f32.mrf.mxu1  ;;  %v5314_v42 = vpop.f32.mrf.mxu2 }
 0x541   : > { %v5327_v38 = vpop.f32.mrf.mxu3  ;;  %v5315_v60 = vadd.f32 %v5314_v42, %v5302_v32 }
 0x543   : > { %v5328_v48 = vadd.f32 %v5327_v38, %v5315_v60 }
 0x544   : > { %v5342_v55 = vpop.f32.mrf.mxu0 }
 0x545   : > { %v5341_v21 = vadd.f32 %v5340_v3, %v5328_v48 }
 0x548   : > { %v5316_v37 = vpop.f32.mrf.mxu2  ;;  %v5353_v39 = vpop.f32.mrf.mxu1 }
 0x549   : > { %v5329_v41 = vpop.f32.mrf.mxu3  ;;  %v5354_v31 = vadd.f32 %v5353_v39, %v5341_v21 }
 0x54c   : > { %v5392_v62 = vpop.f32.mrf.mxu0 }
 0x550   : > { %v5355_v28 = vpop.f32.mrf.mxu1  ;;  %v5366_v22 = vpop.f32.mrf.mxu2 }
 0x551   : > { %v5379_v10 = vpop.f32.mrf.mxu3  ;;  %v5367_v18 = vadd.f32 %v5366_v22, %v5354_v31 }
 0x553   : > { %v5380_v40 = vadd.f32 %v5379_v10, %v5367_v18 }
 0x554   : > { %v5394_v0 = vpop.f32.mrf.mxu0 }
 0x555   : > { %v5393_v16 = vadd.f32 %v5392_v62, %v5380_v40 }
 0x558   : > { %v5368_v24 = vpop.f32.mrf.mxu2 }
 0x559   : > { %v5381_v61 = vpop.f32.mrf.mxu3 }
 0x568   : > { %v5405_v59 = vpop.f32.mrf.mxu1 }
 0x569   : > { %v5406_v11 = vadd.f32 %v5405_v59, %v5393_v16 }
 0x56c   : > { %v5444_v14 = vpop.f32.mrf.mxu0 }
 0x570   : > { %v5407_v23 = vpop.f32.mrf.mxu1  ;;  %v5418_v9 = vpop.f32.mrf.mxu2 }
 0x571   : > { %v5419_v2 = vadd.f32 %v5418_v9, %v5406_v11  ;;  %v5431_v56 = vpop.f32.mrf.mxu3 }
 0x573   : > { %v5432_v6 = vadd.f32 %v5431_v56, %v5419_v2 }
 0x574   : > { %v5446_v52 = vpop.f32.mrf.mxu0 }
 0x575   : > { %v5445_v19 = vadd.f32 %v5444_v14, %v5432_v6 }
 0x577   : > { %v5448_v1 = vmax.f32 %v5445_v19, 0.0 }
 0x578   : > { %v5420_v51 = vpop.f32.mrf.mxu2 }
 0x579   : > { %v5449_v4 = vpack.c.bf16 %v5448_v1, %v5448_v1  ;;  %v5433_v27 = vpop.f32.mrf.mxu3 }
 0x57b   : > { %5523 = vmatmul.bf16.vlgmr.msrb.gmra.mxu1 %v5449_v4 }
 0x5f8   : > { %v5524_v63 = vpop.f32.mrf.mxu1 }
 0x5f9   : > { %v5525_v5 = vadd.f32 %v5524_v63, %v5466_v50 }
 0x5fb   : > { %v5529_v49 = vsel %vm5528_vm1, %v5525_v5, -inf }
 0x5fc   : > { %5530 = vmax.xlane.f32.xlu0 %v5529_v49 }
 0x600   : > { %v5526_v54 = vpop.f32.mrf.mxu1 }
 0x66f   : > { %v5531_v36 = vpop.xlane.xlu0 %5530 }
 0x670   : > { %v5532_v8 = vsub.f32 %v5525_v5, %v5531_v36 }
 0x672   : > { %v5533_v53 = vmul.f32 1.442695, %v5532_v8 }
 0x674   : > { %7544 = vpow2.f32 %v5533_v53 }
 0x67a   : > { %v7545_v20 = vpop.eup %7544 }
 0x67b   : > { %v5535_v17 = vsel %vm5528_vm1, %v7545_v20, 0.0 }
 0x67c   : > { %5536 = vadd.xlane.f32.xlu0 %v5535_v17 }
 0x6ef   : > { %v5537_v46 = vpop.xlane.xlu0 %5536 }
 0x6f0   : > { %7546 = vlog2.f32 %v5537_v46 }
 0x6f6   : > { %v7547_v35 = vpop.eup %7546 }
 0x6f7   : > { %v5539_v57 = vmul.f32 0.6931472, %v7547_v35 }
 0x6f9   : > { %v5540_v30 = vsub.f32 %v5532_v8, %v5539_v57 }
 0x6fb   : > { %5541 = vst [vmem:[%s432_s27] sm:$0x1] %v5540_v30 }
 0x6fc   : > { %7577 = shalt.err (!%p7574_p3)
}
 0x6fd   : > { %7499 = dma.vmem_to_hbm [thread:$0]  (%p7725_p5), %s5554_s17, 16, %s5556_s22, %s5543_s23  }
 0x6fe PF: > { %p7505_p4 = scmp.ge.s32.totalorder %s7612_s28, 2  ;;  %s5567_s16 = sand.u32 1, %s7600_s25  }
 0x6ff   : > { %s5568_s14 = scalar_lea.sflag [#allocation5], %s5567_s16 }
 0x700   : > { %p7502_p7 = pnand %p7505_p4, %p7729_p6 }
 0x702   : > { %p7503_p8 = pneg %p7502_p7 }
 0x704   : > { %7595 = dma.done.wait (%p7503_p8), %s5568_s14, 16  }
 0x705   : > { %7597 = vsyncadd (%p7503_p8), %s5568_s14, 4294967280  ;;  %s9536_s28 = sld [smem:[#allocation8_spill]]  ;;  %s9539_s25 = smov %s7604_s26 }
 0x706   : > { %s9537_s0 = sld [smem:[#allocation7_spill]] }
 0x707   : > { %s9538_s27 = sld [smem:[#allocation9_spill]] }
 0x70b   : > { %p23_p9 = scmp.ge.s32.totalorder %s9536_s28, 4  }
 0x70c   : > { %s9540_s26 = smov %s9537_s0 }
 0x70d   :  { %25 = sbr.rel (!%p23_p9) target bundleno = 5 (0x5), region = 143 }
 0x712   :  { %5573 = vsyncpa [#allocation5], 1 }
 0x713   :  { %5575 = vsyncpa [#allocation5 + $0x1], 1 }

</bundles_post_ra>
